<compile_context>
chip_gen: v5e
topology: v5e:2x2
jax: 0.10.0
libtpu: 0.0.40
codegen_flags: <defaults>
</compile_context>

<pallas_src>
import jax
import jax.numpy as jnp
import numpy as np
from jax.experimental import pallas as pl
from jax.experimental.pallas import tpu as pltpu

_PAD1 = 4   # conv1: kernel_size=9, padding=4
_K1 = 9
_K2 = 3


def cnn_kernel(x_ref, z_ref,
               w1_ref, b1_ref, wc1_ref, bc1_ref,
               w2_ref, b2_ref, wc2_ref, bc2_ref,
               wf1_ref, bf1_ref, wf2_ref, bf2_ref,
               o_ref):
    TB, Lp, Cin = x_ref.shape
    L = Lp - 2 * _PAD1
    L5 = L // 5
    L10 = L5 // 2
    C1 = w1_ref.shape[1]          # 16
    C2 = w2_ref.shape[1]          # 32
    mm_dtype = w1_ref.dtype       # f32 (exact) or bf16 (v6e/v7x fast path)

    x_pad = x_ref[...]            # (TB, L+8, 4) f32, zero-padded sequence
    zc = z_ref[...]               # (TB, 1) f32

    # Conditioning embeddings: Linear(1, C)(z) == outer(z, w_row) + bias, then ReLU.
    cond1 = jnp.maximum(zc * wc1_ref[...] + bc1_ref[...], 0.0)     # (TB, 16)
    cond2 = jnp.maximum(zc * wc2_ref[...] + bc2_ref[...], 0.0)     # (TB, 32)

    # ---- conv1 (k=9, 'same'): im2col of 9 shifted slices -> ONE MXU matmul ----
    x_col = jnp.concatenate([x_pad[:, t:t + L, :] for t in range(_K1)], axis=-1)
    h = jnp.dot(x_col.reshape(TB * L, _K1 * Cin).astype(mm_dtype), w1_ref[...],
                preferred_element_type=jnp.float32) + b1_ref[...]
    h = h.reshape(TB, L, C1)
    # max_pool1d(5) BEFORE relu/cond (relu monotone, cond >= 0): 5x less VPU work.
    h = jnp.max(h.reshape(TB, L5, 5, C1), axis=2)      # (TB, L5, 16)
    h = jnp.maximum(h, 0.0) * cond1[:, None, :]        # relu + conditioning multiply
    # TODO(synk): conv_dropout / fc_dropout are identity (eval mode); training-mode
    # dropout would need pltpu.prng_seed + pltpu.prng_random_bits.

    # ---- conv2 (k=3, pad=1): zero-row pad + im2col (K=48) -> ONE matmul ----
    zrow = jnp.zeros((TB, 1, C1), jnp.float32)
    h_pad = jnp.concatenate([zrow, h, zrow], axis=1)   # (TB, L5+2, 16)
    h_col = jnp.concatenate([h_pad[:, t:t + L5, :] for t in range(_K2)], axis=-1)
    g = jnp.dot(h_col.reshape(TB * L5, _K2 * C1).astype(mm_dtype), w2_ref[...],
                preferred_element_type=jnp.float32) + b2_ref[...]
    g = g.reshape(TB, L5, C2)
    g = jnp.max(g.reshape(TB, L10, 2, C2), axis=2)     # max_pool1d(2) first
    g = jnp.maximum(g, 0.0) * cond2[:, None, :]        # relu + conditioning multiply

    # ---- flatten: lane-contiguous reshape (wf1 rows were permuted host-side) ----
    flat = g.reshape(TB, L10 * C2)

    # ---- fc1 -> ReLU ----
    y = jnp.dot(flat.astype(mm_dtype), wf1_ref[...],
                preferred_element_type=jnp.float32) + bf1_ref[...]
    y = jnp.maximum(y, 0.0)                            # (TB, 64)

    # ---- fc2 (N=1) on the VPU: broadcast-mul + lane reduce ----
    out = jnp.sum(y * wf2_ref[...], axis=-1, keepdims=True) + bf2_ref[...]   # (TB, 1)

    # Lane-dense store: replicate across 128 lanes -> unmasked vst.
    o_ref[...] = jnp.broadcast_to(out, o_ref.shape).astype(o_ref.dtype)


def _round_up(n, m):
    return (n + m - 1) // m * m


def cnn_forward(x, z, kernel_params, *, tb_max=128, matmul_dtype=jnp.float32,
                out_lanes=128):
    """x: (B, L, 4) f32 (same layout the PyTorch module receives), z: (B,) f32."""
    B, L, Cin = x.shape
    assert Cin == 4 and L % 10 == 0, "seq_length must be a multiple of 10"
    (w1c, b1, wc1, bc1, w2c, b2, wc2, bc2, wf1, bf1, wf2, bf2) = kernel_params

    # Optional bf16 matmul operands (v6e/v7x); biases / elementwise stay f32.
    w1c = w1c.astype(matmul_dtype)
    w2c = w2c.astype(matmul_dtype)
    wf1 = wf1.astype(matmul_dtype)

    # Batch tiling: TB rows per grid step (TB is the MXU "M" for fc1).
    TB = min(tb_max, _round_up(B, 8))
    B_pad = _round_up(B, TB)
    nb = B_pad // TB

    # One-time host-side layout work: pad sequence by 4 zeros each side (conv1
    # 'same' padding) and pad batch to a multiple of TB.
    x_pad = jnp.zeros((B_pad, L + 2 * _PAD1, Cin), jnp.float32)
    x_pad = x_pad.at[:B, _PAD1:_PAD1 + L, :].set(x.astype(jnp.float32))
    z_pad = jnp.zeros((B_pad, 1), jnp.float32).at[:B, 0].set(z.astype(jnp.float32))

    def _const_spec(a):
        nd = a.ndim
        return pl.BlockSpec(a.shape, lambda i, _nd=nd: (0,) * _nd)

    weights = (w1c, b1, wc1, bc1, w2c, b2, wc2, bc2, wf1, bf1, wf2, bf2)

    out = pl.pallas_call(
        cnn_kernel,
        out_shape=jax.ShapeDtypeStruct((B_pad, out_lanes), jnp.float32),
        grid_spec=pltpu.PrefetchScalarGridSpec(
            num_scalar_prefetch=0,
            grid=(nb,),
            in_specs=[
                pl.BlockSpec((TB, L + 2 * _PAD1, Cin), lambda i: (i, 0, 0)),
                pl.BlockSpec((TB, 1), lambda i: (i, 0)),
                *[_const_spec(w) for w in weights],
            ],
            out_specs=pl.BlockSpec((TB, out_lanes), lambda i: (i, 0)),
        ),
        compiler_params=pltpu.CompilerParams(
            dimension_semantics=("parallel",)),
    )(x_pad, z_pad, *weights)

    return out[:B, :1]          # (B, 1)


def init_torch_params(key, seq_length, scale=0.1):
    """Random parameters in the PyTorch module's native layouts."""
    flat = 32 * (seq_length // 5 // 2)
    ks = jax.random.split(key, 12)
    n = lambda k, s: scale * jax.random.normal(k, s, jnp.float32)
    return dict(
        w1=n(ks[0], (16, 4, _K1)),  b1=n(ks[1], (16,)),    # Conv1d(4,16,9,p=4)
        w2=n(ks[2], (32, 16, _K2)), b2=n(ks[3], (32,)),    # Conv1d(16,32,3,p=1)
        wc1=n(ks[4], (16, 1)),      bc1=n(ks[5], (16,)),   # Linear(1,16)
        wc2=n(ks[6], (32, 1)),      bc2=n(ks[7], (32,)),   # Linear(1,32)
        wf1=n(ks[8], (64, flat)),   bf1=n(ks[9], (64,)),   # Linear(flat,64)
        wf2=n(ks[10], (1, 64)),     bf2=n(ks[11], (1,)),   # Linear(64,1)
    )


def prepare_params(tp, seq_length):
    """Repack PyTorch-layout params into the kernel's layouts (one-time, on host)."""
    L10 = (seq_length // 5) // 2
    flat = 32 * L10
    # Convs: torch (out, in, k) -> im2col weights (k*in, out), row index = t*in + c.
    w1c = jnp.transpose(tp["w1"], (2, 1, 0)).reshape(_K1 * 4, 16)
    w2c = jnp.transpose(tp["w2"], (2, 1, 0)).reshape(_K2 * 16, 32)
    # fc1: permute rows from torch's channel-major flatten (c*L10 + l) to the
    # kernel's lane-contiguous flatten (l*32 + c) -> kills the in-kernel transpose.
    wf1 = (tp["wf1"].T.reshape(32, L10, 64).transpose(1, 0, 2).reshape(flat, 64))
    return (w1c, tp["b1"][None, :],
            tp["wc1"].T, tp["bc1"][None, :],
            w2c, tp["b2"][None, :],
            tp["wc2"].T, tp["bc2"][None, :],
            wf1, tp["bf1"][None, :],
            tp["wf2"], tp["bf2"][None, :])


def ref_forward(x, z, tp):
    """Pure-JAX transcription of the PyTorch forward (NCL layout), for checking."""
    B, L, _ = x.shape
    xn = jnp.transpose(x, (0, 2, 1))                           # (B, 4, L)
    zb = z[:, None]
    c1 = jax.nn.relu(zb @ tp["wc1"].T + tp["bc1"])             # (B, 16)
    c2 = jax.nn.relu(zb @ tp["wc2"].T + tp["bc2"])             # (B, 32)

    def conv1d(a, w, b, pad):                                  # a (B,C,L), w (O,C,K)
        K = w.shape[2]
        ap = jnp.pad(a, ((0, 0), (0, 0), (pad, pad)))
        y = sum(jnp.einsum("bcl,oc->bol", ap[:, :, t:t + a.shape[2]], w[:, :, t])
                for t in range(K))
        return y + b[None, :, None]

    x1 = jax.nn.relu(conv1d(xn, tp["w1"], tp["b1"], _PAD1)) * c1[:, :, None]
    L5 = x1.shape[2] // 5
    x1 = jnp.max(x1[:, :, :L5 * 5].reshape(B, 16, L5, 5), axis=3)
    x2 = jax.nn.relu(conv1d(x1, tp["w2"], tp["b2"], 1)) * c2[:, :, None]
    L10 = x2.shape[2] // 2
    x2 = jnp.max(x2[:, :, :L10 * 2].reshape(B, 32, L10, 2), axis=3)
    flat = x2.reshape(B, 32 * L10)                             # channel-major .view
    h = jax.nn.relu(flat @ tp["wf1"].T + tp["bf1"])
    return h @ tp["wf2"].T + tp["bf2"]                         # (B, 1)


if __name__ == "__main__":
    B, SEQ = 2, 20                      # small shapes; SEQ divisible by 10
    key = jax.random.PRNGKey(0)
    kx, kz, kp = jax.random.split(key, 3)
    x = jax.random.normal(kx, (B, SEQ, 4), jnp.float32)
    z = jax.random.normal(kz, (B,), jnp.float32)

    torch_params = init_torch_params(kp, SEQ)
    kparams = prepare_params(torch_params, SEQ)

    out = jax.block_until_ready(cnn_forward(x, z, kparams))
    assert out.shape == (B, 1) and out.dtype == jnp.float32

    ref = jax.block_until_ready(ref_forward(x, z, torch_params))
    np.testing.assert_allclose(np.asarray(out), np.asarray(ref), rtol=5e-2, atol=5e-2)

    print("KERNEL_OK")
</pallas_src>

<mosaic_0001>
module attributes {stable_mosaic.version = 11 : i64} {
  func.func @cnn_kernel(%arg0: i32, %arg1: memref<8x28x4xf32, #tpu.memory_space<vmem>>, %arg2: memref<8x1xf32, #tpu.memory_space<vmem>>, %arg3: memref<36x16xf32, #tpu.memory_space<vmem>>, %arg4: memref<1x16xf32, #tpu.memory_space<vmem>>, %arg5: memref<1x16xf32, #tpu.memory_space<vmem>>, %arg6: memref<1x16xf32, #tpu.memory_space<vmem>>, %arg7: memref<48x32xf32, #tpu.memory_space<vmem>>, %arg8: memref<1x32xf32, #tpu.memory_space<vmem>>, %arg9: memref<1x32xf32, #tpu.memory_space<vmem>>, %arg10: memref<1x32xf32, #tpu.memory_space<vmem>>, %arg11: memref<64x64xf32, #tpu.memory_space<vmem>>, %arg12: memref<1x64xf32, #tpu.memory_space<vmem>>, %arg13: memref<1x64xf32, #tpu.memory_space<vmem>>, %arg14: memref<1x1xf32, #tpu.memory_space<vmem>>, %arg15: memref<8x128xf32, #tpu.memory_space<vmem>>) attributes {dimension_semantics = [#tpu.dimension_semantics<parallel>], iteration_bounds = array<i64: 1>, scalar_prefetch = 0 : i64, scratch_operands = 0 : i64, tpu.core_type = #tpu.core_type<tc>, window_params = [{transform_indices = @transform_0, window_bounds = array<i64: 8, 28, 4>}, {transform_indices = @transform_1, window_bounds = array<i64: 8, 1>}, {pipeline_mode = #tpu.pipeline_mode<synchronous>, transform_indices = @transform_2, window_bounds = array<i64: 36, 16>}, {pipeline_mode = #tpu.pipeline_mode<synchronous>, transform_indices = @transform_3, window_bounds = array<i64: 1, 16>}, {pipeline_mode = #tpu.pipeline_mode<synchronous>, transform_indices = @transform_4, window_bounds = array<i64: 1, 16>}, {pipeline_mode = #tpu.pipeline_mode<synchronous>, transform_indices = @transform_5, window_bounds = array<i64: 1, 16>}, {pipeline_mode = #tpu.pipeline_mode<synchronous>, transform_indices = @transform_6, window_bounds = array<i64: 48, 32>}, {pipeline_mode = #tpu.pipeline_mode<synchronous>, transform_indices = @transform_7, window_bounds = array<i64: 1, 32>}, {pipeline_mode = #tpu.pipeline_mode<synchronous>, transform_indices = @transform_8, window_bounds = array<i64: 1, 32>}, {pipeline_mode = #tpu.pipeline_mode<synchronous>, transform_indices = @transform_9, window_bounds = array<i64: 1, 32>}, {pipeline_mode = #tpu.pipeline_mode<synchronous>, transform_indices = @transform_10, window_bounds = array<i64: 64, 64>}, {pipeline_mode = #tpu.pipeline_mode<synchronous>, transform_indices = @transform_11, window_bounds = array<i64: 1, 64>}, {pipeline_mode = #tpu.pipeline_mode<synchronous>, transform_indices = @transform_12, window_bounds = array<i64: 1, 64>}, {pipeline_mode = #tpu.pipeline_mode<synchronous>, transform_indices = @transform_13, window_bounds = array<i64: 1, 1>}, {transform_indices = @transform_14, window_bounds = array<i64: 8, 128>}]} {
    %c0 = arith.constant 0 : index
    %c0_0 = arith.constant 0 : index
    %c0_1 = arith.constant 0 : index
    %0 = vector.load %arg1[%c0, %c0_0, %c0_1] : memref<8x28x4xf32, #tpu.memory_space<vmem>>, vector<8x28x4xf32>
    %c0_2 = arith.constant 0 : index
    %c0_3 = arith.constant 0 : index
    %1 = vector.load %arg2[%c0_2, %c0_3] : memref<8x1xf32, #tpu.memory_space<vmem>>, vector<8x1xf32>
    %c0_4 = arith.constant 0 : index
    %c0_5 = arith.constant 0 : index
    %2 = vector.load %arg5[%c0_4, %c0_5] : memref<1x16xf32, #tpu.memory_space<vmem>>, vector<1x16xf32>
    %3 = vector.broadcast %1 : vector<8x1xf32> to vector<8x16xf32>
    %4 = vector.broadcast %2 : vector<1x16xf32> to vector<8x16xf32>
    %5 = arith.mulf %3, %4 : vector<8x16xf32>
    %c0_6 = arith.constant 0 : index
    %c0_7 = arith.constant 0 : index
    %6 = vector.load %arg6[%c0_6, %c0_7] : memref<1x16xf32, #tpu.memory_space<vmem>>, vector<1x16xf32>
    %7 = vector.broadcast %6 : vector<1x16xf32> to vector<8x16xf32>
    %8 = arith.addf %5, %7 : vector<8x16xf32>
    %cst = arith.constant 0.000000e+00 : f32
    %9 = vector.broadcast %cst : f32 to vector<8x16xf32>
    %10 = arith.maximumf %8, %9 : vector<8x16xf32>
    %c0_8 = arith.constant 0 : index
    %c0_9 = arith.constant 0 : index
    %11 = vector.load %arg9[%c0_8, %c0_9] : memref<1x32xf32, #tpu.memory_space<vmem>>, vector<1x32xf32>
    %12 = vector.broadcast %1 : vector<8x1xf32> to vector<8x32xf32>
    %13 = vector.broadcast %11 : vector<1x32xf32> to vector<8x32xf32>
    %14 = arith.mulf %12, %13 : vector<8x32xf32>
    %c0_10 = arith.constant 0 : index
    %c0_11 = arith.constant 0 : index
    %15 = vector.load %arg10[%c0_10, %c0_11] : memref<1x32xf32, #tpu.memory_space<vmem>>, vector<1x32xf32>
    %16 = vector.broadcast %15 : vector<1x32xf32> to vector<8x32xf32>
    %17 = arith.addf %14, %16 : vector<8x32xf32>
    %cst_12 = arith.constant 0.000000e+00 : f32
    %18 = vector.broadcast %cst_12 : f32 to vector<8x32xf32>
    %19 = arith.maximumf %17, %18 : vector<8x32xf32>
    %20 = vector.extract_strided_slice %0 {offsets = [0, 0, 0], sizes = [8, 20, 4], strides = [1, 1, 1]} : vector<8x28x4xf32> to vector<8x20x4xf32>
    %21 = vector.extract_strided_slice %0 {offsets = [0, 1, 0], sizes = [8, 20, 4], strides = [1, 1, 1]} : vector<8x28x4xf32> to vector<8x20x4xf32>
    %22 = vector.extract_strided_slice %0 {offsets = [0, 2, 0], sizes = [8, 20, 4], strides = [1, 1, 1]} : vector<8x28x4xf32> to vector<8x20x4xf32>
    %23 = vector.extract_strided_slice %0 {offsets = [0, 3, 0], sizes = [8, 20, 4], strides = [1, 1, 1]} : vector<8x28x4xf32> to vector<8x20x4xf32>
    %24 = vector.extract_strided_slice %0 {offsets = [0, 4, 0], sizes = [8, 20, 4], strides = [1, 1, 1]} : vector<8x28x4xf32> to vector<8x20x4xf32>
    %25 = vector.extract_strided_slice %0 {offsets = [0, 5, 0], sizes = [8, 20, 4], strides = [1, 1, 1]} : vector<8x28x4xf32> to vector<8x20x4xf32>
    %26 = vector.extract_strided_slice %0 {offsets = [0, 6, 0], sizes = [8, 20, 4], strides = [1, 1, 1]} : vector<8x28x4xf32> to vector<8x20x4xf32>
    %27 = vector.extract_strided_slice %0 {offsets = [0, 7, 0], sizes = [8, 20, 4], strides = [1, 1, 1]} : vector<8x28x4xf32> to vector<8x20x4xf32>
    %28 = vector.extract_strided_slice %0 {offsets = [0, 8, 0], sizes = [8, 20, 4], strides = [1, 1, 1]} : vector<8x28x4xf32> to vector<8x20x4xf32>
    %29 = tpu.concatenate %20, %21, %22, %23, %24, %25, %26, %27, %28 in 2 : vector<8x20x4xf32>, vector<8x20x4xf32>, vector<8x20x4xf32>, vector<8x20x4xf32>, vector<8x20x4xf32>, vector<8x20x4xf32>, vector<8x20x4xf32>, vector<8x20x4xf32>, vector<8x20x4xf32> -> vector<8x20x36xf32>
    %30 = vector.shape_cast %29 : vector<8x20x36xf32> to vector<160x36xf32>
    %c0_13 = arith.constant 0 : index
    %c0_14 = arith.constant 0 : index
    %31 = vector.load %arg3[%c0_13, %c0_14] : memref<36x16xf32, #tpu.memory_space<vmem>>, vector<36x16xf32>
    %cst_15 = arith.constant dense<0.000000e+00> : vector<160x16xf32>
    %32 = tpu.matmul %30, %31, %cst_15 {dimension_numbers = #tpu.dot_dimension_numbers<[1], [0], [0], [1], [0, 0, 1, 1], [], []>} : vector<160x36xf32>, vector<36x16xf32>, vector<160x16xf32> -> vector<160x16xf32>
    %c0_16 = arith.constant 0 : index
    %c0_17 = arith.constant 0 : index
    %33 = vector.load %arg4[%c0_16, %c0_17] : memref<1x16xf32, #tpu.memory_space<vmem>>, vector<1x16xf32>
    %34 = vector.broadcast %33 : vector<1x16xf32> to vector<160x16xf32>
    %35 = arith.addf %32, %34 : vector<160x16xf32>
    %36 = vector.shape_cast %35 : vector<160x16xf32> to vector<8x20x16xf32>
    %37 = vector.shape_cast %36 : vector<8x20x16xf32> to vector<8x4x5x16xf32>
    %cst_18 = arith.constant dense<0xFF800000> : vector<8x4x16xf32>
    %38 = vector.multi_reduction <maximumf>, %37, %cst_18 [2] : vector<8x4x5x16xf32> to vector<8x4x16xf32>
    %cst_19 = arith.constant 0.000000e+00 : f32
    %39 = vector.broadcast %cst_19 : f32 to vector<8x4x16xf32>
    %40 = arith.maximumf %38, %39 : vector<8x4x16xf32>
    %41 = vector.shape_cast %10 : vector<8x16xf32> to vector<8x1x16xf32>
    %42 = vector.broadcast %41 : vector<8x1x16xf32> to vector<8x4x16xf32>
    %43 = arith.mulf %40, %42 : vector<8x4x16xf32>
    %cst_20 = arith.constant 0.000000e+00 : f32
    %44 = vector.broadcast %cst_20 : f32 to vector<8x1x16xf32>
    %45 = tpu.concatenate %44, %43, %44 in 1 : vector<8x1x16xf32>, vector<8x4x16xf32>, vector<8x1x16xf32> -> vector<8x6x16xf32>
    %46 = vector.extract_strided_slice %45 {offsets = [0, 0, 0], sizes = [8, 4, 16], strides = [1, 1, 1]} : vector<8x6x16xf32> to vector<8x4x16xf32>
    %47 = vector.extract_strided_slice %45 {offsets = [0, 1, 0], sizes = [8, 4, 16], strides = [1, 1, 1]} : vector<8x6x16xf32> to vector<8x4x16xf32>
    %48 = vector.extract_strided_slice %45 {offsets = [0, 2, 0], sizes = [8, 4, 16], strides = [1, 1, 1]} : vector<8x6x16xf32> to vector<8x4x16xf32>
    %49 = tpu.concatenate %46, %47, %48 in 2 : vector<8x4x16xf32>, vector<8x4x16xf32>, vector<8x4x16xf32> -> vector<8x4x48xf32>
    %50 = vector.shape_cast %49 : vector<8x4x48xf32> to vector<32x48xf32>
    %c0_21 = arith.constant 0 : index
    %c0_22 = arith.constant 0 : index
    %51 = vector.load %arg7[%c0_21, %c0_22] : memref<48x32xf32, #tpu.memory_space<vmem>>, vector<48x32xf32>
    %cst_23 = arith.constant dense<0.000000e+00> : vector<32x32xf32>
    %52 = tpu.matmul %50, %51, %cst_23 {dimension_numbers = #tpu.dot_dimension_numbers<[1], [0], [0], [1], [0, 0, 1, 1], [], []>} : vector<32x48xf32>, vector<48x32xf32>, vector<32x32xf32> -> vector<32x32xf32>
    %c0_24 = arith.constant 0 : index
    %c0_25 = arith.constant 0 : index
    %53 = vector.load %arg8[%c0_24, %c0_25] : memref<1x32xf32, #tpu.memory_space<vmem>>, vector<1x32xf32>
    %54 = vector.broadcast %53 : vector<1x32xf32> to vector<32x32xf32>
    %55 = arith.addf %52, %54 : vector<32x32xf32>
    %56 = vector.shape_cast %55 : vector<32x32xf32> to vector<8x4x32xf32>
    %57 = vector.shape_cast %56 : vector<8x4x32xf32> to vector<8x2x2x32xf32>
    %cst_26 = arith.constant dense<0xFF800000> : vector<8x2x32xf32>
    %58 = vector.multi_reduction <maximumf>, %57, %cst_26 [2] : vector<8x2x2x32xf32> to vector<8x2x32xf32>
    %cst_27 = arith.constant 0.000000e+00 : f32
    %59 = vector.broadcast %cst_27 : f32 to vector<8x2x32xf32>
    %60 = arith.maximumf %58, %59 : vector<8x2x32xf32>
    %61 = vector.shape_cast %19 : vector<8x32xf32> to vector<8x1x32xf32>
    %62 = vector.broadcast %61 : vector<8x1x32xf32> to vector<8x2x32xf32>
    %63 = arith.mulf %60, %62 : vector<8x2x32xf32>
    %64 = vector.shape_cast %63 : vector<8x2x32xf32> to vector<8x64xf32>
    %c0_28 = arith.constant 0 : index
    %c0_29 = arith.constant 0 : index
    %65 = vector.load %arg11[%c0_28, %c0_29] : memref<64x64xf32, #tpu.memory_space<vmem>>, vector<64x64xf32>
    %cst_30 = arith.constant dense<0.000000e+00> : vector<8x64xf32>
    %66 = tpu.matmul %64, %65, %cst_30 {dimension_numbers = #tpu.dot_dimension_numbers<[1], [0], [0], [1], [0, 0, 1, 1], [], []>} : vector<8x64xf32>, vector<64x64xf32>, vector<8x64xf32> -> vector<8x64xf32>
    %c0_31 = arith.constant 0 : index
    %c0_32 = arith.constant 0 : index
    %67 = vector.load %arg12[%c0_31, %c0_32] : memref<1x64xf32, #tpu.memory_space<vmem>>, vector<1x64xf32>
    %68 = vector.broadcast %67 : vector<1x64xf32> to vector<8x64xf32>
    %69 = arith.addf %66, %68 : vector<8x64xf32>
    %cst_33 = arith.constant 0.000000e+00 : f32
    %70 = vector.broadcast %cst_33 : f32 to vector<8x64xf32>
    %71 = arith.maximumf %69, %70 : vector<8x64xf32>
    %c0_34 = arith.constant 0 : index
    %c0_35 = arith.constant 0 : index
    %72 = vector.load %arg13[%c0_34, %c0_35] : memref<1x64xf32, #tpu.memory_space<vmem>>, vector<1x64xf32>
    %73 = vector.broadcast %72 : vector<1x64xf32> to vector<8x64xf32>
    %74 = arith.mulf %71, %73 : vector<8x64xf32>
    %cst_36 = arith.constant dense<0.000000e+00> : vector<8xf32>
    %75 = vector.multi_reduction <add>, %74, %cst_36 [1] : vector<8x64xf32> to vector<8xf32>
    %76 = vector.shape_cast %75 : vector<8xf32> to vector<8x1xf32>
    %c0_37 = arith.constant 0 : index
    %c0_38 = arith.constant 0 : index
    %77 = vector.load %arg14[%c0_37, %c0_38] : memref<1x1xf32, #tpu.memory_space<vmem>>, vector<1x1xf32>
    %78 = vector.broadcast %77 : vector<1x1xf32> to vector<8x1xf32>
    %79 = arith.addf %76, %78 : vector<8x1xf32>
    %80 = vector.shape_cast %79 : vector<8x1xf32> to vector<8x1xf32>
    %81 = vector.broadcast %80 : vector<8x1xf32> to vector<8x128xf32>
    %c0_39 = arith.constant 0 : index
    %c0_40 = arith.constant 0 : index
    %82 = vector.load %arg15[%c0_39, %c0_40] : memref<8x128xf32, #tpu.memory_space<vmem>>, vector<8x128xf32>
    tpu.vector_store %arg15[%c0_39, %c0_40], %81 {strides = array<i32>} : memref<8x128xf32, #tpu.memory_space<vmem>>, vector<8x128xf32>,
    return
  }
  func.func @transform_0(%arg0: i32) -> (i32, i32, i32) {
    %c0_i32 = arith.constant 0 : i32
    %c0_i32_0 = arith.constant 0 : i32
    %c0_i32_1 = arith.constant 0 : i32
    return %arg0, %c0_i32, %c0_i32_0 : i32, i32, i32
  }
  func.func @transform_1(%arg0: i32) -> (i32, i32) {
    %c0_i32 = arith.constant 0 : i32
    %c0_i32_0 = arith.constant 0 : i32
    return %arg0, %c0_i32 : i32, i32
  }
  func.func @transform_2(%arg0: i32) -> (i32, i32) {
    %c0_i32 = arith.constant 0 : i32
    %c0_i32_0 = arith.constant 0 : i32
    %c0_i32_1 = arith.constant 0 : i32
    return %c0_i32, %c0_i32_0 : i32, i32
  }
  func.func @transform_3(%arg0: i32) -> (i32, i32) {
    %c0_i32 = arith.constant 0 : i32
    %c0_i32_0 = arith.constant 0 : i32
    %c0_i32_1 = arith.constant 0 : i32
    return %c0_i32, %c0_i32_0 : i32, i32
  }
  func.func @transform_4(%arg0: i32) -> (i32, i32) {
    %c0_i32 = arith.constant 0 : i32
    %c0_i32_0 = arith.constant 0 : i32
    %c0_i32_1 = arith.constant 0 : i32
    return %c0_i32, %c0_i32_0 : i32, i32
  }
  func.func @transform_5(%arg0: i32) -> (i32, i32) {
    %c0_i32 = arith.constant 0 : i32
    %c0_i32_0 = arith.constant 0 : i32
    %c0_i32_1 = arith.constant 0 : i32
    return %c0_i32, %c0_i32_0 : i32, i32
  }
  func.func @transform_6(%arg0: i32) -> (i32, i32) {
    %c0_i32 = arith.constant 0 : i32
    %c0_i32_0 = arith.constant 0 : i32
    %c0_i32_1 = arith.constant 0 : i32
    return %c0_i32, %c0_i32_0 : i32, i32
  }
  func.func @transform_7(%arg0: i32) -> (i32, i32) {
    %c0_i32 = arith.constant 0 : i32
    %c0_i32_0 = arith.constant 0 : i32
    %c0_i32_1 = arith.constant 0 : i32
    return %c0_i32, %c0_i32_0 : i32, i32
  }
  func.func @transform_8(%arg0: i32) -> (i32, i32) {
    %c0_i32 = arith.constant 0 : i32
    %c0_i32_0 = arith.constant 0 : i32
    %c0_i32_1 = arith.constant 0 : i32
    return %c0_i32, %c0_i32_0 : i32, i32
  }
  func.func @transform_9(%arg0: i32) -> (i32, i32) {
    %c0_i32 = arith.constant 0 : i32
    %c0_i32_0 = arith.constant 0 : i32
    %c0_i32_1 = arith.constant 0 : i32
    return %c0_i32, %c0_i32_0 : i32, i32
  }
  func.func @transform_10(%arg0: i32) -> (i32, i32) {
    %c0_i32 = arith.constant 0 : i32
    %c0_i32_0 = arith.constant 0 : i32
    %c0_i32_1 = arith.constant 0 : i32
    return %c0_i32, %c0_i32_0 : i32, i32
  }
  func.func @transform_11(%arg0: i32) -> (i32, i32) {
    %c0_i32 = arith.constant 0 : i32
    %c0_i32_0 = arith.constant 0 : i32
    %c0_i32_1 = arith.constant 0 : i32
    return %c0_i32, %c0_i32_0 : i32, i32
  }
  func.func @transform_12(%arg0: i32) -> (i32, i32) {
    %c0_i32 = arith.constant 0 : i32
    %c0_i32_0 = arith.constant 0 : i32
    %c0_i32_1 = arith.constant 0 : i32
    return %c0_i32, %c0_i32_0 : i32, i32
  }
  func.func @transform_13(%arg0: i32) -> (i32, i32) {
    %c0_i32 = arith.constant 0 : i32
    %c0_i32_0 = arith.constant 0 : i32
    %c0_i32_1 = arith.constant 0 : i32
    return %c0_i32, %c0_i32_0 : i32, i32
  }
  func.func @transform_14(%arg0: i32) -> (i32, i32) {
    %c0_i32 = arith.constant 0 : i32
    %c0_i32_0 = arith.constant 0 : i32
    return %arg0, %c0_i32 : i32, i32
  }
}

</mosaic_0001>

<bundles_post_ra>
// kernel: tpu_custom_call.1
= control target key start
LH: loop header
LB: loop body
LE: loop exit
PB: predicated region body
PF: predicated region fallthrough
CT: control target
= control target key end

     0   :  { %s4585_s0 = inlined_call_operand.vmem [shape: f32[8,28,4], index: 0, kind: input, shape index: {}]   ;;  %s4586_s1 = inlined_call_operand.vmem [shape: f32[8,1], index: 1, kind: input, shape index: {}]   ;;  %s4587_s2 = inlined_call_operand.vmem [shape: f32[36,16], index: 2, kind: input, shape index: {}]   ;;  %s4588_s3 = inlined_call_operand.vmem [shape: f32[1,16], index: 3, kind: input, shape index: {}]   ;;  %s4589_s4 = inlined_call_operand.vmem [shape: f32[1,16], index: 4, kind: input, shape index: {}]   ;;  %s4590_s5 = inlined_call_operand.vmem [shape: f32[1,16], index: 5, kind: input, shape index: {}]   ;;  %s4591_s6 = inlined_call_operand.vmem [shape: f32[48,32], index: 6, kind: input, shape index: {}]   ;;  %s4592_s7 = inlined_call_operand.vmem [shape: f32[1,32], index: 7, kind: input, shape index: {}]   ;;  %s4593_s8 = inlined_call_operand.vmem [shape: f32[1,32], index: 8, kind: input, shape index: {}]   ;;  %s4594_s9 = inlined_call_operand.vmem [shape: f32[1,32], index: 9, kind: input, shape index: {}]   ;;  %s4595_s10 = inlined_call_operand.vmem [shape: f32[64,64], index: 10, kind: input, shape index: {}]   ;;  %s4596_s11 = inlined_call_operand.vmem [shape: f32[1,64], index: 11, kind: input, shape index: {}]   ;;  %s4597_s12 = inlined_call_operand.vmem [shape: f32[1,64], index: 12, kind: input, shape index: {}]   ;;  %s4598_s13 = inlined_call_operand.<no memory space> [shape: f32[1,1], index: 13, kind: input, shape index: {}]   ;;  %s4599_s14 = inlined_call_operand.hbm [shape: f32[8,128], index: 14, kind: output, shape index: {}]  }
   0x1   :  { %v19_v0 = vstv %s4598_s13 }
   0x2   :  { %20 = vst [vmem:[#allocation2] sm:$0x1] %v19_v0 }
   0x3   :  { %v3004_v1 = vld [vmem:[%s4585_s0] sm:$0xff]  ;;  %v3009_v2 = vld [vmem:[%s4585_s0 + $0x8] sm:$0xff]  ;;  %vm360_vm0 = vcmask 1044480   ;;  %vm134_vm1 = vcmask 1046528   ;;  %s2911_s13 = smov 12   ;;  %s2912_s19 = smov 4  }
   0x4   :  { %v361_v3 = vrot.slane %v3004_v1, 3  ;;  %v362_v4 = vrot.slane %v3009_v2, 3  ;;  %v135_v5 = vrot.slane %v3004_v1, 1  ;;  %v136_v6 = vrot.slane %v3009_v2, 1  ;;  %s2913_s20 = smov 20  }
   0x5   :  { %vm594_vm2 = vcmask 1042432   ;;  %v595_v9 = vrot.slane %v3004_v1, 5  ;;  %v596_v10 = vrot.slane %v3009_v2, 5  ;;  %v474_v11 = vrot.slane %v3004_v1, 4 }
   0x6   :  { %v363_v7 = vsel %vm360_vm0, %v361_v3, %v362_v4  ;;  %v137_v8 = vsel %vm134_vm1, %v135_v5, %v136_v6  ;;  %v475_v12 = vrot.slane %v3009_v2, 4  ;;  %v248_v13 = vrot.slane %v3004_v1, 2 }
   0x7   :  { %401 = vrot.lane.b32.xlu1 %v363_v7, %s2911_s13  ;;  %175 = vrot.lane.b32.xlu0 %v137_v8, %s2912_s19  ;;  %v249_v14 = vrot.slane %v3009_v2, 2  ;;  %vm473_vm3 = vcmask 1043456   ;;  %vm247_vm4 = vcmask 1045504   ;;  %v597_v15 = vsel %vm594_vm2, %v595_v9, %v596_v10 }
   0x8   :  { %651 = vrot.lane.b32.xlu2 %v597_v15, %s2913_s20  ;;  %vm723_vm5 = vcmask 1041408   ;;  %v724_v16 = vrot.slane %v3004_v1, 6  ;;  %v725_v17 = vrot.slane %v3009_v2, 6  ;;  %v476_v18 = vsel %vm473_vm3, %v474_v11, %v475_v12 }
   0x9   :  { %v250_v19 = vsel %vm247_vm4, %v248_v13, %v249_v14 }
   0xa   :  { %21 = vsyncpa [#allocation4], 0  ;;  %s2914_s21 = smov 16   ;;  %s2915_s22 = smov 8   ;;  %v726_v20 = vsel %vm723_vm5, %v724_v16, %v725_v17  ;;  %v853_v21 = vrot.slane %v3004_v1, 7  ;;  %v854_v22 = vrot.slane %v3009_v2, 7 }
   0xb   :  { %v3039_v23 = vld [vmem:[%s4585_s0 + $0x10] sm:$0xff]  ;;  %vm852_vm6 = vcmask 1040384   ;;  %s2916_s25 = smov 24   ;;  %s2917_s26 = smov 32   ;;  %v3069_v39 = vld [vmem:[%s4585_s0 + $0x20] sm:$0xff]  ;;  %v3074_v40 = vld [vmem:[%s4585_s0 + $0x28] sm:$0xff] }
   0xc   :  { %v138_v24 = vrot.slane %v3039_v23, 1  ;;  %v855_v25 = vsel %vm852_vm6, %v853_v21, %v854_v22  ;;  %s2918_s27 = smov 28   ;;  %v364_v27 = vrot.slane %v3039_v23, 3  ;;  %v251_v28 = vrot.slane %v3039_v23, 2  ;;  %v53_v52 = vld [vmem:[%s4585_s0 + $0x18] sm:$0xf] }
   0xd   :  { %v477_v29 = vrot.slane %v3039_v23, 4  ;;  %v727_v33 = vrot.slane %v3039_v23, 6  ;;  %v598_v34 = vrot.slane %v3039_v23, 5  ;;  %v856_v35 = vrot.slane %v3039_v23, 7  ;;  %v3122_v7 = vld [vmem:[%s4585_s0 + $0x30] sm:$0xff] }
   0xe   :  { %v139_v26 = vsel %vm134_vm1, %v136_v6, %v138_v24  ;;  %v365_v30 = vsel %vm360_vm0, %v362_v4, %v364_v27  ;;  %v252_v31 = vsel %vm247_vm4, %v249_v14, %v251_v28  ;;  %v140_v41 = vrot.slane %v3069_v39, 1 }
   0xf   :  { %514 = vrot.lane.b32.xlu1 %v476_v18, %s2914_s21  ;;  %288 = vrot.lane.b32.xlu0 %v250_v19, %s2915_s22  ;;  %v478_v32 = vsel %vm473_vm3, %v475_v12, %v477_v29  ;;  %v728_v36 = vsel %vm723_vm5, %v725_v17, %v727_v33  ;;  %v599_v37 = vsel %vm594_vm2, %v596_v10, %v598_v34  ;;  %v141_v42 = vrot.slane %v3074_v40, 1 }
  0x10   :  { %780 = vrot.lane.b32.xlu2 %v726_v20, %s2916_s25  ;;  %v857_v38 = vsel %vm852_vm6, %v854_v22, %v856_v35  ;;  %v253_v44 = vrot.slane %v3069_v39, 2  ;;  %v254_v45 = vrot.slane %v3074_v40, 2  ;;  %v366_v47 = vrot.slane %v3069_v39, 3 }
  0x11   :  { %v142_v43 = vsel %vm134_vm1, %v140_v41, %v141_v42  ;;  %v367_v48 = vrot.slane %v3074_v40, 3  ;;  %v479_v49 = vrot.slane %v3069_v39, 4  ;;  %v480_v50 = vrot.slane %v3074_v40, 4 }
  0x12   :  { %v255_v46 = vsel %vm247_vm4, %v253_v44, %v254_v45  ;;  %v602_v54 = vrot.slane %v3069_v39, 5  ;;  %v603_v55 = vrot.slane %v3074_v40, 5  ;;  %v600_v56 = vrot.slane %v53_v52, 5  ;;  %v3196_v44 = vld [vmem:[%s4585_s0 + $0x48] sm:$0xff] }
  0x13   :  { %v368_v51 = vsel %vm360_vm0, %v366_v47, %v367_v48  ;;  %v481_v53 = vsel %vm473_vm3, %v479_v49, %v480_v50  ;;  %v729_v57 = vrot.slane %v53_v52, 6  ;;  %v858_v61 = vrot.slane %v53_v52, 7 }
  0x14   :  { %v604_v58 = vsel %vm594_vm2, %v602_v54, %v603_v55  ;;  %v601_v59 = vsel %vm594_vm2, %v598_v34, %v600_v56  ;;  %v731_v62 = vrot.slane %v3069_v39, 6  ;;  %v732_v63 = vrot.slane %v3074_v40, 6 }
  0x15   :  { %v730_v60 = vsel %vm723_vm5, %v727_v33, %v729_v57  ;;  %v860_v0 = vrot.slane %v3069_v39, 7  ;;  %v861_v3 = vrot.slane %v3074_v40, 7  ;;  %v859_v4 = vsel %vm852_vm6, %v856_v35, %v858_v61 }
  0x16   :  { %v733_v5 = vsel %vm723_vm5, %v731_v62, %v732_v63  ;;  %v143_v8 = vrot.slane %v3122_v7, 1  ;;  %v369_v10 = vrot.slane %v3122_v7, 3  ;;  %v256_v11 = vrot.slane %v3122_v7, 2 }
  0x17   :  { %981 = vrot.lane.b32.xlu1 %v3009_v2, %s2917_s26  ;;  %909 = vrot.lane.b32.xlu0 %v855_v25, %s2918_s27  ;;  %v862_v6 = vsel %vm852_vm6, %v860_v0, %v861_v3  ;;  %v482_v12 = vrot.slane %v3122_v7, 4  ;;  %v734_v16 = vrot.slane %v3122_v7, 6  ;;  %v605_v17 = vrot.slane %v3122_v7, 5  ;;  %v1297_v25 = vld [vmem:[%s4587_s2 + $0x20] sm:$0xf] }
  0x18   :  { %177 = vrot.lane.b32.xlu2 %v139_v26, %s2912_s19  ;;  %v144_v9 = vsel %vm134_vm1, %v141_v42, %v143_v8  ;;  %v370_v13 = vsel %vm360_vm0, %v367_v48, %v369_v10  ;;  %v257_v14 = vsel %vm247_vm4, %v254_v45, %v256_v11  ;;  %v863_v18 = vrot.slane %v3122_v7, 7  ;;  %2825 = vmatpush.msk.msra.mxu0 %vm473_vm3, %v1297_v25  ;;  %v1296_v26 = vld [vmem:[%s4587_s2 + $0x18] sm:$0xff] }
  0x19   :  { %v483_v15 = vsel %vm473_vm3, %v480_v50, %v482_v12  ;;  %v735_v19 = vsel %vm723_vm5, %v732_v63, %v734_v16  ;;  %v606_v20 = vsel %vm594_vm2, %v603_v55, %v605_v17  ;;  %2851 = vmatpush.msk.msra.mxu2 %vm473_vm3, %v1297_v25  ;;  %2852 = vmatpush.msk.msra.mxu3 %vm473_vm3, %v1297_v25  ;;  %vm1053_vm7 = vcmask 31744  }
  0x1a   :  { %v864_v22 = vsel %vm852_vm6, %v861_v3, %v863_v18  ;;  %1425 = vmatpush.msra.mxu0 %v1296_v26  ;;  %vm1078_vm8 = vcmask 64512   ;;  %vm1103_vm9 = vcmask 97280   ;;  %v146_v48 = vrot.slane %v3196_v44, 1 }
  0x1b   :  { %2853 = vmatpush.msra.mxu2 %v1296_v26  ;;  %2854 = vmatpush.msra.mxu3 %v1296_v26  ;;  %vm1128_vm10 = vcmask 130048   ;;  %vm1153_vm11 = vcmask 162816   ;;  %v372_v55 = vrot.slane %v3196_v44, 3  ;;  %vm1178_vm12 = vcmask 195584  }
  0x1c   :  { %vm1203_vm13 = vcmask 228352   ;;  %vm1228_vm14 = vcmask 261120   ;;  %v610_v62 = vrot.slane %v3196_v44, 5  ;;  %v485_v0 = vrot.slane %v3196_v44, 4 }
  0x1d   :  { %vm1369_vm15 = vcmask 293888  }
  0x1f   :  { %403 = vrot.lane.b32.xlu1 %v365_v30, %s2911_s13  ;;  %290 = vrot.lane.b32.xlu0 %v252_v31, %s2915_s22 }
  0x20   :  { %516 = vrot.lane.b32.xlu2 %v478_v32, %s2914_s21  ;;  %v1293_v32 = vld [vmem:[%s4587_s2] sm:$0xff] }
  0x27   :  { %782 = vrot.lane.b32.xlu1 %v728_v36, %s2916_s25  ;;  %653 = vrot.lane.b32.xlu0 %v599_v37, %s2913_s20 }
  0x28   :  { %911 = vrot.lane.b32.xlu2 %v857_v38, %s2918_s27 }
  0x2f   :  { %179 = vrot.lane.b32.xlu1 %v138_v24, %s2912_s19  ;;  %983 = vrot.lane.b32.xlu0 %v3039_v23, %s2917_s26 }
  0x30   :  { %181 = vrot.lane.b32.xlu2 %v142_v43, %s2912_s19  ;;  %v3191_v43 = vld [vmem:[%s4585_s0 + $0x40] sm:$0xff] }
  0x31   :  { %v258_v45 = vrot.slane %v3191_v43, 2  ;;  %v145_v47 = vrot.slane %v3191_v43, 1  ;;  %v371_v54 = vrot.slane %v3191_v43, 3  ;;  %v609_v61 = vrot.slane %v3191_v43, 5 }
  0x32   :  { %v484_v63 = vrot.slane %v3191_v43, 4 }
  0x33   :  { %v147_v57 = vsel %vm134_vm1, %v145_v47, %v146_v48 }
  0x37   :  { %294 = vrot.lane.b32.xlu1 %v255_v46, %s2915_s22  ;;  %292 = vrot.lane.b32.xlu0 %v251_v28, %s2915_s22  ;;  %v1295_v28 = vld [vmem:[%s4587_s2 + $0x10] sm:$0xff]  ;;  %v259_v46 = vrot.slane %v3196_v44, 2 }
  0x38   :  { %405 = vrot.lane.b32.xlu2 %v364_v27, %s2911_s13  ;;  %v57_v27 = vld [vmem:[%s4585_s0 + $0x38] sm:$0xf]  ;;  %1426 = vmatpush.msra.mxu0 %v1295_v28 }
  0x39   :  { %v607_v30 = vrot.slane %v57_v27, 5  ;;  %2855 = vmatpush.msra.mxu2 %v1295_v28  ;;  %2856 = vmatpush.msra.mxu3 %v1295_v28  ;;  %v865_v34 = vrot.slane %v57_v27, 7  ;;  %v736_v35 = vrot.slane %v57_v27, 6 }
  0x3b   :  { %v608_v33 = vsel %vm594_vm2, %v605_v17, %v607_v30  ;;  %v866_v38 = vsel %vm852_vm6, %v863_v18, %v865_v34  ;;  %v737_v41 = vsel %vm723_vm5, %v734_v16, %v736_v35  ;;  %v867_v16 = vrot.slane %v3191_v43, 7  ;;  %v3248_v18 = vld [vmem:[%s4585_s0 + $0x50] sm:$0xff] }
  0x3c   :  { %v868_v17 = vrot.slane %v3196_v44, 7  ;;  %v261_v30 = vrot.slane %v3248_v18, 2  ;;  %v487_v35 = vrot.slane %v3248_v18, 4  ;;  %v612_v47 = vrot.slane %v3248_v18, 5 }
  0x3e   :  { %v869_v25 = vsel %vm852_vm6, %v867_v16, %v868_v17 }
  0x3f   :  { %518 = vrot.lane.b32.xlu1 %v477_v29, %s2914_s21  ;;  %407 = vrot.lane.b32.xlu0 %v368_v51, %s2911_s13  ;;  %v1294_v29 = vld [vmem:[%s4587_s2 + $0x8] sm:$0xff] }
  0x40   :  { %520 = vrot.lane.b32.xlu2 %v481_v53, %s2914_s21  ;;  %1427 = vmatpush.msra.mxu0 %v1294_v29 }
  0x41   :  { %2857 = vmatpush.msra.mxu2 %v1294_v29  ;;  %2858 = vmatpush.msra.mxu3 %v1294_v29  ;;  %v374_v29 = vrot.slane %v3248_v18, 3 }
  0x42   :  { %1428 = vmatpush.msra.mxu0 %v1293_v32 }
  0x43   :  { %2859 = vmatpush.msra.mxu2 %v1293_v32  ;;  %2860 = vmatpush.msra.mxu3 %v1293_v32 }
  0x47   :  { %657 = vrot.lane.b32.xlu1 %v604_v58, %s2913_s20  ;;  %655 = vrot.lane.b32.xlu0 %v601_v59, %s2913_s20 }
  0x48   :  { %784 = vrot.lane.b32.xlu2 %v730_v60, %s2916_s25  ;;  %v373_v60 = vsel %vm360_vm0, %v371_v54, %v372_v55  ;;  %v613_v54 = vsel %vm594_vm2, %v610_v62, %v612_v47 }
  0x4f   :  { %913 = vrot.lane.b32.xlu1 %v859_v4, %s2918_s27  ;;  %786 = vrot.lane.b32.xlu0 %v733_v5, %s2916_s25 }
  0x50   :  { %915 = vrot.lane.b32.xlu2 %v862_v6, %s2918_s27 }
  0x57   :  { %987 = vrot.lane.b32.xlu1 %v3074_v40, %s2917_s26  ;;  %985 = vrot.lane.b32.xlu0 %v53_v52, %s2917_s26 }
  0x58   :  { %183 = vrot.lane.b32.xlu2 %v144_v9, %s2912_s19  ;;  %v738_v9 = vrot.slane %v3191_v43, 6 }
  0x5f   :  { %409 = vrot.lane.b32.xlu1 %v370_v13, %s2911_s13  ;;  %296 = vrot.lane.b32.xlu0 %v257_v14, %s2915_s22  ;;  %v486_v13 = vsel %vm473_vm3, %v484_v63, %v485_v0 }
  0x60   :  { %522 = vrot.lane.b32.xlu2 %v483_v15, %s2914_s21 }
  0x62   :  { %v3145_v21 = vpop.permute.xlu2 %651 }
  0x67   :  { %788 = vrot.lane.b32.xlu1 %v735_v19, %s2916_s25  ;;  %659 = vrot.lane.b32.xlu0 %v606_v20, %s2913_s20 }
  0x68   :  { %917 = vrot.lane.b32.xlu2 %v864_v22, %s2918_s27  ;;  %v148_v22 = vrot.slane %v3248_v18, 1 }
  0x6a   :  { %v3151_v24 = vpop.permute.xlu2 %780 }
  0x6f   :  { %185 = vrot.lane.b32.xlu1 %v143_v8, %s2912_s19  ;;  %989 = vrot.lane.b32.xlu0 %v3122_v7, %s2917_s26 }
  0x70   :  { %298 = vrot.lane.b32.xlu2 %v256_v11, %s2915_s22 }
  0x72   :  { %v3175_v31 = vpop.permute.xlu2 %177 }
  0x77   :  { %524 = vrot.lane.b32.xlu1 %v482_v12, %s2914_s21  ;;  %411 = vrot.lane.b32.xlu0 %v369_v10, %s2911_s13  ;;  %v739_v10 = vrot.slane %v3196_v44, 6  ;;  %v611_v12 = vsel %vm594_vm2, %v609_v61, %v610_v62 }
  0x78   :  { %661 = vrot.lane.b32.xlu2 %v608_v33, %s2913_s20 }
  0x79   :  { %v402_v36 = vpop.permute.xlu1 %401  ;;  %v176_v37 = vpop.permute.xlu0 %175  ;;  %v740_v15 = vsel %vm723_vm5, %v738_v9, %v739_v10 }
  0x7a   :  { %v3186_v42 = vpop.permute.xlu2 %516  ;;  %v1054_v49 = vsel %vm1053_vm7, %v3004_v1, %v176_v37  ;;  %v260_v1 = vsel %vm247_vm4, %v258_v45, %v259_v46  ;;  %v262_v37 = vsel %vm247_vm4, %v259_v46, %v261_v30  ;;  %v741_v45 = vrot.slane %v3248_v18, 6 }
  0x7f   :  { %919 = vrot.lane.b32.xlu1 %v866_v38, %s2918_s27  ;;  %790 = vrot.lane.b32.xlu0 %v737_v41, %s2916_s25 }
  0x80   :  { %991 = vrot.lane.b32.xlu2 %v57_v27, %s2917_s26 }
  0x81   :  { %v515_v50 = vpop.permute.xlu1 %514  ;;  %v289_v51 = vpop.permute.xlu0 %288 }
  0x82   :  { %v1079_v52 = vsel %vm1078_vm8, %v1054_v49, %v289_v51  ;;  %v3216_v58 = vpop.permute.xlu2 %911 }
  0x83   :  { %v1104_v53 = vsel %vm1103_vm9, %v1079_v52, %v402_v36  ;;  %v375_v36 = vsel %vm360_vm0, %v372_v55, %v374_v29  ;;  %v870_v52 = vrot.slane %v3248_v18, 7 }
  0x84   :  { %v1129_v56 = vsel %vm1128_vm10, %v1104_v53, %v515_v50  ;;  %v742_v53 = vsel %vm723_vm5, %v739_v10, %v741_v45 }
  0x85   :  { %v1154_v59 = vsel %vm1153_vm11, %v1129_v56, %v3145_v21  ;;  %v1055_v21 = vsel %vm1053_vm7, %v3009_v2, %v3175_v31  ;;  %v149_v2 = vsel %vm134_vm1, %v146_v48, %v148_v22  ;;  %v871_v56 = vsel %vm852_vm6, %v868_v17, %v870_v52 }
  0x86   :  { %v1179_v4 = vsel %vm1178_vm12, %v1154_v59, %v3151_v24 }
  0x87   :  { %300 = vrot.lane.b32.xlu1 %v260_v1, %s2915_s22  ;;  %187 = vrot.lane.b32.xlu0 %v147_v57, %s2912_s19  ;;  %v3307_v1 = vld [vmem:[%s4585_s0 + $0x60] sm:$0xff]  ;;  %v3312_v57 = vld [vmem:[%s4585_s0 + $0x68] sm:$0xff] }
  0x88   :  { %413 = vrot.lane.b32.xlu2 %v373_v60, %s2911_s13  ;;  %v150_v60 = vrot.slane %v3307_v1, 1  ;;  %v151_v61 = vrot.slane %v3312_v57, 1  ;;  %v376_v10 = vrot.slane %v3307_v1, 3  ;;  %v490_v16 = vrot.slane %v3312_v57, 4 }
  0x89   :  { %v982_v3 = vpop.permute.xlu1 %981  ;;  %v910_v5 = vpop.permute.xlu0 %909 }
  0x8a   :  { %v1204_v6 = vsel %vm1203_vm13, %v1179_v4, %v910_v5  ;;  %v3238_v14 = vpop.permute.xlu2 %181  ;;  %v264_v4 = vrot.slane %v3312_v57, 2 }
  0x8b   :  { %v1229_v8 = vsel %vm1228_vm14, %v1204_v6, %v982_v3  ;;  %v263_v3 = vrot.slane %v3307_v1, 2 }
  0x8c   :  { %v1277_v11 = vrot.slane %v1229_v8, 4  ;;  %1302 = vst [vmem:[#allocation1] ss:$2 sm:$0xff] %v1229_v8 }
  0x8d   :  { %v265_v8 = vsel %vm247_vm4, %v263_v3, %v264_v4 }
  0x8e   :  { %1304 = vst [vmem:[#allocation1 + $0x1] ss:$2 sm:$0xff] %v1277_v11  ;;  %v377_v11 = vrot.slane %v3312_v57, 3 }
  0x8f   :  { %663 = vrot.lane.b32.xlu1 %v611_v12, %s2913_s20  ;;  %526 = vrot.lane.b32.xlu0 %v486_v13, %s2914_s21 }
  0x90   :  { %792 = vrot.lane.b32.xlu2 %v740_v15, %s2916_s25  ;;  %v489_v15 = vrot.slane %v3307_v1, 4  ;;  %v378_v17 = vsel %vm360_vm0, %v376_v10, %v377_v11 }
  0x91   :  { %v404_v19 = vpop.permute.xlu1 %403  ;;  %v291_v20 = vpop.permute.xlu0 %290 }
  0x92   :  { %v1080_v24 = vsel %vm1078_vm8, %v1055_v21, %v291_v20  ;;  %v3257_v26 = vpop.permute.xlu2 %405  ;;  %v3347_v20 = vld [vmem:[%s4585_s0 + $0x58] sm:$0xf]  ;;  %v1057_v21 = vsel %vm1053_vm7, %v3069_v39, %v3238_v14 }
  0x93   :  { %v1105_v28 = vsel %vm1103_vm9, %v1080_v24, %v404_v19  ;;  %v616_v24 = vrot.slane %v3307_v1, 5  ;;  %v614_v39 = vrot.slane %v3347_v20, 5 }
  0x94   :  { %v1130_v33 = vsel %vm1128_vm10, %v1105_v28, %v3186_v42  ;;  %v488_v42 = vsel %vm473_vm3, %v485_v0, %v487_v35  ;;  %v152_v0 = vsel %vm134_vm1, %v150_v60, %v151_v61 }
  0x95   :  { %v1317_v27 = vld.sshfl [vmem:[#allocation1] sm:$0xff pattern:$0x75316420] }
  0x96   :  { %2826 = vmatmul.msk.f32.vlgmr.msra.gmra.mxu0 %vm1369_vm15, %v1317_v27 }
  0x97   :  { %993 = vrot.lane.b32.xlu1 %v3196_v44, %s2917_s26  ;;  %921 = vrot.lane.b32.xlu0 %v869_v25, %s2918_s27  ;;  %v491_v25 = vsel %vm473_vm3, %v489_v15, %v490_v16 }
  0x98   :  { %189 = vrot.lane.b32.xlu2 %v149_v2, %s2912_s19  ;;  %v617_v2 = vrot.slane %v3312_v57, 5 }
  0x99   :  { %v783_v31 = vpop.permute.xlu1 %782  ;;  %v654_v32 = vpop.permute.xlu0 %653 }
  0x9a   :  { %v1155_v34 = vsel %vm1153_vm11, %v1130_v33, %v654_v32  ;;  %v3276_v38 = vpop.permute.xlu2 %520 }
  0x9b   :  { %v1180_v41 = vsel %vm1178_vm12, %v1155_v34, %v783_v31  ;;  %v743_v31 = vrot.slane %v3347_v20, 6  ;;  %v618_v34 = vsel %vm594_vm2, %v616_v24, %v617_v2 }
  0x9c   :  { %v1205_v49 = vsel %vm1203_vm13, %v1180_v41, %v3216_v58 }
  0x9f   :  { %415 = vrot.lane.b32.xlu1 %v375_v36, %s2911_s13  ;;  %302 = vrot.lane.b32.xlu0 %v262_v37, %s2915_s22 }
  0xa0   :  { %528 = vrot.lane.b32.xlu2 %v488_v42, %s2914_s21 }
  0xa1   :  { %v180_v48 = vpop.permute.xlu1 %179  ;;  %v984_v50 = vpop.permute.xlu0 %983 }
  0xa2   :  { %v1230_v46 = vsel %vm1228_vm14, %v1205_v49, %v984_v50  ;;  %v3297_v55 = vpop.permute.xlu2 %784  ;;  %v746_v49 = vrot.slane %v3312_v57, 6 }
  0xa3   :  { %v1278_v51 = vrot.slane %v1230_v46, 4  ;;  %1306 = vst [vmem:[#allocation1 + $0x10] ss:$2 sm:$0xff] %v1230_v46 }
  0xa5   :  { %1308 = vst [vmem:[#allocation1 + $0x11] ss:$2 sm:$0xff] %v1278_v51 }
  0xa7   :  { %794 = vrot.lane.b32.xlu1 %v742_v53, %s2916_s25  ;;  %665 = vrot.lane.b32.xlu0 %v613_v54, %s2913_s20 }
  0xa8   :  { %923 = vrot.lane.b32.xlu2 %v871_v56, %s2918_s27 }
  0xa9   :  { %v295_v58 = vpop.permute.xlu1 %294  ;;  %v293_v59 = vpop.permute.xlu0 %292 }
  0xaa   :  { %v916_v63 = vpop.permute.xlu2 %915  ;;  %v1082_v27 = vsel %vm1078_vm8, %v1057_v21, %v295_v58  ;;  %v875_v58 = vrot.slane %v3312_v57, 7 }
  0xac   :  { %v1318_v62 = vld.sshfl [vmem:[#allocation1 + $0x10] sm:$0xff pattern:$0x75316420] }
  0xad   :  { %2827 = vmatmul.msk.f32.gmra.mxu0 %vm1369_vm15, %v1318_v62 }
  0xaf   :  { %191 = vrot.lane.b32.xlu1 %v148_v22, %s2912_s19  ;;  %995 = vrot.lane.b32.xlu0 %v3248_v18, %s2917_s26  ;;  %v1056_v22 = vsel %vm1053_vm7, %v3039_v23, %v180_v48  ;;  %v745_v48 = vrot.slane %v3307_v1, 6 }
  0xb0   :  { %193 = vrot.lane.b32.xlu2 %v152_v0, %s2912_s19  ;;  %v1081_v28 = vsel %vm1078_vm8, %v1056_v22, %v293_v59  ;;  %v3410_v0 = vld [vmem:[%s4585_s0 + $0x70] sm:$0xff] }
  0xb1   :  { %v519_v5 = vpop.permute.xlu1 %518  ;;  %v408_v6 = vpop.permute.xlu0 %407  ;;  %v747_v60 = vsel %vm723_vm5, %v745_v48, %v746_v49  ;;  %v266_v15 = vrot.slane %v3410_v0, 2 }
  0xb2   :  { %v3330_v9 = vpop.permute.xlu2 %183  ;;  %v1107_v23 = vsel %vm1103_vm9, %v1082_v27, %v408_v6 }
  0xb3   :  { %v1132_v33 = vsel %vm1128_vm10, %v1107_v23, %v3276_v38  ;;  %v744_v38 = vsel %vm723_vm5, %v741_v45, %v743_v31  ;;  %v619_v23 = vrot.slane %v3410_v0, 5  ;;  %v877_v31 = vrot.slane %v3410_v0, 7 }
  0xb7   :  { %306 = vrot.lane.b32.xlu1 %v265_v8, %s2915_s22  ;;  %304 = vrot.lane.b32.xlu0 %v261_v30, %s2915_s22  ;;  %v1106_v30 = vsel %vm1103_vm9, %v1081_v28, %v3257_v26  ;;  %v153_v8 = vrot.slane %v3410_v0, 1 }
  0xb8   :  { %417 = vrot.lane.b32.xlu2 %v374_v29, %s2911_s13  ;;  %v1131_v32 = vsel %vm1128_vm10, %v1106_v30, %v519_v5 }
  0xb9   :  { %v658_v12 = vpop.permute.xlu1 %657  ;;  %v656_v13 = vpop.permute.xlu0 %655 }
  0xba   :  { %v3342_v19 = vpop.permute.xlu2 %522  ;;  %v1157_v37 = vsel %vm1153_vm11, %v1132_v33, %v658_v12  ;;  %v1156_v26 = vsel %vm1153_vm11, %v1131_v32, %v656_v13 }
  0xbb   :  { %v1181_v42 = vsel %vm1178_vm12, %v1156_v26, %v3297_v55  ;;  %v874_v55 = vrot.slane %v3307_v1, 7 }
  0xbf   :  { %530 = vrot.lane.b32.xlu1 %v487_v35, %s2914_s21  ;;  %419 = vrot.lane.b32.xlu0 %v378_v17, %s2911_s13  ;;  %v615_v35 = vsel %vm594_vm2, %v612_v47, %v614_v39  ;;  %v872_v47 = vrot.slane %v3347_v20, 7  ;;  %v748_v39 = vrot.slane %v3410_v0, 6 }
  0xc0   :  { %532 = vrot.lane.b32.xlu2 %v491_v25, %s2914_s21  ;;  %v492_v25 = vrot.slane %v3410_v0, 4 }
  0xc1   :  { %v914_v14 = vpop.permute.xlu1 %913  ;;  %v787_v29 = vpop.permute.xlu0 %786  ;;  %v873_v59 = vsel %vm852_vm6, %v870_v52, %v872_v47  ;;  %v1058_v52 = vsel %vm1053_vm7, %v3074_v40, %v3330_v9  ;;  %v154_v40 = vsel %vm134_vm1, %v151_v61, %v153_v8  ;;  %v379_v9 = vrot.slane %v3410_v0, 3 }
  0xc2   :  { %v3378_v36 = vpop.permute.xlu2 %917  ;;  %v1182_v41 = vsel %vm1178_vm12, %v1157_v37, %v787_v29  ;;  %v1206_v50 = vsel %vm1203_vm13, %v1181_v42, %v914_v14  ;;  %v267_v61 = vsel %vm247_vm4, %v264_v4, %v266_v15  ;;  %v749_v32 = vsel %vm723_vm5, %v746_v49, %v748_v39  ;;  %v3475_v42 = vld [vmem:[%s4585_s0 + $0x78] sm:$0xf] }
  0xc3   :  { %v1207_v51 = vsel %vm1203_vm13, %v1182_v41, %v916_v63  ;;  %v876_v63 = vsel %vm852_vm6, %v874_v55, %v875_v58 }
  0xc7   :  { %669 = vrot.lane.b32.xlu1 %v618_v34, %s2913_s20  ;;  %667 = vrot.lane.b32.xlu0 %v615_v35, %s2913_s20  ;;  %v878_v35 = vsel %vm852_vm6, %v875_v58, %v877_v31 }
  0xc8   :  { %796 = vrot.lane.b32.xlu2 %v744_v38, %s2916_s25 }
  0xc9   :  { %v988_v46 = vpop.permute.xlu1 %987  ;;  %v986_v53 = vpop.permute.xlu0 %985 }
  0xca   :  { %v1232_v54 = vsel %vm1228_vm14, %v1207_v51, %v988_v46  ;;  %v1231_v56 = vsel %vm1228_vm14, %v1206_v50, %v986_v53  ;;  %v299_v62 = vpop.permute.xlu2 %298  ;;  %v621_v51 = vrot.slane %v3475_v42, 5 }
  0xcb   :  { %v1279_v45 = vrot.slane %v1232_v54, 4  ;;  %1312 = vst [vmem:[#allocation1 + $0x21] ss:$2 sm:$0xff] %v1232_v54 }
  0xcc   :  { %1310 = vst [vmem:[#allocation1 + $0x20] ss:$2 sm:$0xff] %v1231_v56  ;;  %v3488_v56 = vld [vmem:[%s4585_s0 + $0x80] sm:$0xff]  ;;  %v622_v55 = vsel %vm594_vm2, %v619_v23, %v621_v51 }
  0xcd   :  { %1314 = vst [vmem:[#allocation1 + $0x30] ss:$2 sm:$0xff] %v1279_v45  ;;  %v3493_v45 = vld [vmem:[%s4585_s0 + $0x88] sm:$0xff]  ;;  %v155_v58 = vrot.slane %v3488_v56, 1  ;;  %v752_v51 = vrot.slane %v3488_v56, 6 }
  0xcf   :  { %925 = vrot.lane.b32.xlu1 %v873_v59, %s2918_s27  ;;  %798 = vrot.lane.b32.xlu0 %v747_v60, %s2916_s25  ;;  %v156_v59 = vrot.slane %v3493_v45, 1  ;;  %v750_v60 = vrot.slane %v3475_v42, 6 }
  0xd0   :  { %927 = vrot.lane.b32.xlu2 %v876_v63, %s2918_s27 }
  0xd1   :  { %v410_v3 = vpop.permute.xlu1 %409  ;;  %v297_v5 = vpop.permute.xlu0 %296 }
  0xd2   :  { %v1083_v10 = vsel %vm1078_vm8, %v1058_v52, %v297_v5  ;;  %v662_v12 = vpop.permute.xlu2 %661 }
  0xd3   :  { %v1319_v6 = vld.sshfl [vmem:[#allocation1 + $0x20] sm:$0xff pattern:$0x75316420]  ;;  %v1108_v13 = vsel %vm1103_vm9, %v1083_v10, %v410_v3  ;;  %v751_v10 = vsel %vm723_vm5, %v748_v39, %v750_v60  ;;  %v381_v39 = vrot.slane %v3488_v56, 3 }
  0xd4   :  { %2828 = vmatmul.msk.f32.gmra.mxu0 %vm1369_vm15, %v1319_v6  ;;  %v1133_v22 = vsel %vm1128_vm10, %v1108_v13, %v3342_v19  ;;  %v493_v19 = vsel %vm473_vm3, %v490_v16, %v492_v25  ;;  %v620_v16 = vsel %vm594_vm2, %v617_v2, %v619_v23  ;;  %v382_v23 = vrot.slane %v3493_v45, 3 }
  0xd7   :  { %999 = vrot.lane.b32.xlu1 %v3312_v57, %s2917_s26  ;;  %997 = vrot.lane.b32.xlu0 %v3347_v20, %s2917_s26  ;;  %v380_v20 = vsel %vm360_vm0, %v377_v11, %v379_v9 }
  0xd8   :  { %195 = vrot.lane.b32.xlu2 %v154_v40, %s2912_s19 }
  0xd9   :  { %v789_v17 = vpop.permute.xlu1 %788  ;;  %v660_v21 = vpop.permute.xlu0 %659 }
  0xda   :  { %v1158_v24 = vsel %vm1153_vm11, %v1133_v22, %v660_v21  ;;  %v992_v27 = vpop.permute.xlu2 %991 }
  0xdb   :  { %v1183_v28 = vsel %vm1178_vm12, %v1158_v24, %v789_v17 }
  0xdc   :  { %v1208_v14 = vsel %vm1203_vm13, %v1183_v28, %v3378_v36 }
  0xdf   :  { %421 = vrot.lane.b32.xlu1 %v380_v20, %s2911_s13  ;;  %308 = vrot.lane.b32.xlu0 %v267_v61, %s2915_s22 }
  0xe0   :  { %534 = vrot.lane.b32.xlu2 %v493_v19, %s2914_s21 }
  0xe1   :  { %v186_v11 = vpop.permute.xlu1 %185  ;;  %v990_v4 = vpop.permute.xlu0 %989 }
  0xe2   :  { %v1233_v29 = vsel %vm1228_vm14, %v1208_v14, %v990_v4  ;;  %v414_v33 = vpop.permute.xlu2 %413  ;;  %v1059_v34 = vsel %vm1053_vm7, %v3122_v7, %v186_v11 }
  0xe3   :  { %v1280_v30 = vrot.slane %v1233_v29, 4  ;;  %1316 = vst [vmem:[#allocation1 + $0x31] ss:$2 sm:$0xff] %v1233_v29  ;;  %v1084_v41 = vsel %vm1078_vm8, %v1059_v34, %v299_v62  ;;  %v3504_v62 = vld [vmem:[%s4585_s0 + $0x90] sm:$0xff] }
  0xe4   :  { %v158_v5 = vrot.slane %v3504_v62, 1 }
  0xe5   :  { %1321 = vst [vmem:[#allocation1] ss:$2 sm:$0xff] %v1280_v30 }
  0xe6   :  { %v159_v40 = vsel %vm134_vm1, %v156_v59, %v158_v5 }
  0xe7   :  { %800 = vrot.lane.b32.xlu1 %v749_v32, %s2916_s25  ;;  %671 = vrot.lane.b32.xlu0 %v620_v16, %s2913_s20  ;;  %v383_v16 = vsel %vm360_vm0, %v381_v39, %v382_v23  ;;  %v3624_v39 = vld [vmem:[%s4585_s0 + $0xb0] sm:$0xff] }
  0xe8   :  { %929 = vrot.lane.b32.xlu2 %v878_v35, %s2918_s27  ;;  %v495_v35 = vrot.slane %v3493_v45, 4 }
  0xe9   :  { %v525_v36 = vpop.permute.xlu1 %524  ;;  %v412_v37 = vpop.permute.xlu0 %411 }
  0xea   :  { %v1320_v26 = vld.sshfl [vmem:[#allocation1 + $0x30] sm:$0xff pattern:$0x75316420]  ;;  %v1109_v2 = vsel %vm1103_vm9, %v1084_v41, %v412_v37  ;;  %v793_v7 = vpop.permute.xlu2 %792  ;;  %v494_v37 = vrot.slane %v3488_v56, 4 }
  0xeb   :  { %2829 = vmatmul.msk.f32.gmra.mxu0 %vm1369_vm15, %v1320_v26  ;;  %v1134_v38 = vsel %vm1128_vm10, %v1109_v2, %v525_v36  ;;  %v497_v36 = vrot.slane %v3504_v62, 4 }
  0xec   :  { %v1159_v48 = vsel %vm1153_vm11, %v1134_v38, %v662_v12  ;;  %v623_v38 = vrot.slane %v3488_v56, 5 }
  0xef   :  { %197 = vrot.lane.b32.xlu1 %v153_v8, %s2912_s19  ;;  %1001 = vrot.lane.b32.xlu0 %v3410_v0, %s2917_s26  ;;  %v157_v8 = vsel %vm134_vm1, %v155_v58, %v156_v59 }
  0xf0   :  { %310 = vrot.lane.b32.xlu2 %v266_v15, %s2915_s22  ;;  %v879_v15 = vrot.slane %v3475_v42, 7 }
  0xf1   :  { %v920_v47 = vpop.permute.xlu1 %919  ;;  %v791_v49 = vpop.permute.xlu0 %790 }
  0xf2   :  { %v1184_v50 = vsel %vm1178_vm12, %v1159_v48, %v791_v49  ;;  %v3483_v54 = vpop.permute.xlu2 %189  ;;  %v880_v61 = vsel %vm852_vm6, %v877_v31, %v879_v15  ;;  %v384_v31 = vrot.slane %v3504_v62, 3  ;;  %v496_v48 = vsel %vm473_vm3, %v494_v37, %v495_v35 }
  0xf3   :  { %v1209_v46 = vsel %vm1203_vm13, %v1184_v50, %v920_v47  ;;  %v1061_v2 = vsel %vm1053_vm7, %v3196_v44, %v3483_v54  ;;  %v498_v47 = vsel %vm473_vm3, %v495_v35, %v497_v36  ;;  %v626_v54 = vrot.slane %v3504_v62, 5 }
  0xf4   :  { %v1234_v53 = vsel %vm1228_vm14, %v1209_v46, %v992_v27  ;;  %v385_v34 = vsel %vm360_vm0, %v382_v23, %v384_v31 }
  0xf5   :  { %1322 = vst [vmem:[#allocation1 + $0x1] ss:$2 sm:$0xff] %v1234_v53  ;;  %v753_v53 = vrot.slane %v3493_v45, 6 }
  0xf7   :  { %536 = vrot.lane.b32.xlu1 %v492_v25, %s2914_s21  ;;  %423 = vrot.lane.b32.xlu0 %v379_v9, %s2911_s13  ;;  %v269_v9 = vrot.slane %v3493_v45, 2  ;;  %v271_v25 = vrot.slane %v3504_v62, 2 }
  0xf8   :  { %673 = vrot.lane.b32.xlu2 %v622_v55, %s2913_s20 }
  0xf9   :  { %v301_v63 = vpop.permute.xlu1 %300  ;;  %v188_v3 = vpop.permute.xlu0 %187  ;;  %v272_v19 = vsel %vm247_vm4, %v269_v9, %v271_v25 }
  0xfa   :  { %v1060_v6 = vsel %vm1053_vm7, %v3191_v43, %v188_v3  ;;  %v3512_v12 = vpop.permute.xlu2 %528  ;;  %v268_v43 = vrot.slane %v3488_v56, 2  ;;  %v754_v3 = vsel %vm723_vm5, %v752_v51, %v753_v53 }
  0xfb   :  { %v1085_v13 = vsel %vm1078_vm8, %v1060_v6, %v301_v63  ;;  %v755_v63 = vrot.slane %v3504_v62, 6 }
  0xfc   :  { %v1329_v52 = vld.sshfl [vmem:[#allocation1] sm:$0xff pattern:$0x75316420]  ;;  %v1110_v22 = vsel %vm1103_vm9, %v1085_v13, %v414_v33  ;;  %v270_v20 = vsel %vm247_vm4, %v268_v43, %v269_v9  ;;  %v884_v13 = vrot.slane %v3504_v62, 7 }
  0xfd   :  { %2830 = vmatmul.msk.f32.gmra.mxu0 %vm1369_vm15, %v1329_v52 }
  0xff   :  { %199 = vrot.lane.b32.xlu1 %v157_v8, %s2912_s19  ;;  %802 = vrot.lane.b32.xlu0 %v751_v10, %s2916_s25  ;;  %v756_v10 = vsel %vm723_vm5, %v753_v53, %v755_v63 }
 0x100   :  { %201 = vrot.lane.b32.xlu2 %v159_v40, %s2912_s19  ;;  %v881_v40 = vrot.slane %v3488_v56, 7 }
 0x101   :  { %v664_v17 = vpop.permute.xlu1 %663  ;;  %v527_v21 = vpop.permute.xlu0 %526 }
 0x102   :  { %v1135_v24 = vsel %vm1128_vm10, %v1110_v22, %v527_v21  ;;  %v924_v27 = vpop.permute.xlu2 %923 }
 0x103   :  { %v1160_v28 = vsel %vm1153_vm11, %v1135_v24, %v664_v17 }
 0x104   :  { %v1185_v14 = vsel %vm1178_vm12, %v1160_v28, %v793_v7  ;;  %v624_v7 = vrot.slane %v3493_v45, 5 }
 0x106   :  { %v625_v44 = vsel %vm594_vm2, %v623_v38, %v624_v7  ;;  %v627_v52 = vsel %vm594_vm2, %v624_v7, %v626_v54  ;;  %v276_v38 = vrot.slane %v3624_v39, 2 }
 0x107   :  { %312 = vrot.lane.b32.xlu1 %v270_v20, %s2915_s22  ;;  %931 = vrot.lane.b32.xlu0 %v880_v61, %s2918_s27  ;;  %v3610_v61 = vld [vmem:[%s4585_s0 + $0xa0] sm:$0xff] }
 0x108   :  { %314 = vrot.lane.b32.xlu2 %v272_v19, %s2915_s22  ;;  %v160_v28 = vrot.slane %v3610_v61, 1  ;;  %v273_v35 = vrot.slane %v3610_v61, 2 }
 0x109   :  { %v994_v11 = vpop.permute.xlu1 %993  ;;  %v922_v4 = vpop.permute.xlu0 %921 }
 0x10a   :  { %v1210_v29 = vsel %vm1203_vm13, %v1185_v14, %v922_v4  ;;  %v3546_v33 = vpop.permute.xlu2 %193  ;;  %v163_v14 = vrot.slane %v3624_v39, 1 }
 0x10b   :  { %v1235_v30 = vsel %vm1228_vm14, %v1210_v29, %v994_v11 }
 0x10c   :  { %v1281_v32 = vrot.slane %v1235_v30, 4  ;;  %1323 = vst [vmem:[#allocation1 + $0x10] ss:$2 sm:$0xff] %v1235_v30 }
 0x10e   :  { %1324 = vst [vmem:[#allocation1 + $0x11] ss:$2 sm:$0xff] %v1281_v32  ;;  %v3634_v32 = vld [vmem:[%s4585_s0 + $0xc0] sm:$0xff] }
 0x10f   :  { %425 = vrot.lane.b32.xlu1 %v383_v16, %s2911_s13  ;;  %1003 = vrot.lane.b32.xlu0 %v3475_v42, %s2917_s26  ;;  %v3639_v16 = vld [vmem:[%s4585_s0 + $0xc8] sm:$0xff] }
 0x110   :  { %427 = vrot.lane.b32.xlu2 %v385_v34, %s2911_s13 }
 0x111   :  { %v416_v26 = vpop.permute.xlu1 %415  ;;  %v303_v41 = vpop.permute.xlu0 %302 }
 0x112   :  { %v1086_v42 = vsel %vm1078_vm8, %v1061_v2, %v303_v41  ;;  %v3568_v49 = vpop.permute.xlu2 %417  ;;  %v166_v41 = vrot.slane %v3639_v16, 1 }
 0x113   :  { %v1111_v46 = vsel %vm1103_vm9, %v1086_v42, %v416_v26  ;;  %v165_v26 = vrot.slane %v3634_v32, 1 }
 0x114   :  { %v1136_v59 = vsel %vm1128_vm10, %v1111_v46, %v3512_v12  ;;  %v882_v12 = vrot.slane %v3493_v45, 7  ;;  %v278_v46 = vrot.slane %v3634_v32, 2 }
 0x115   :  { %v1330_v50 = vld.sshfl [vmem:[#allocation1 + $0x10] sm:$0xff pattern:$0x75316420] }
 0x116   :  { %2831 = vmatmul.msk.f32.gmra.mxu0 %vm1369_vm15, %v1330_v50  ;;  %v885_v22 = vsel %vm852_vm6, %v882_v12, %v884_v13  ;;  %v883_v24 = vsel %vm852_vm6, %v881_v40, %v882_v12  ;;  %v386_v12 = vrot.slane %v3610_v61, 3  ;;  %v391_v40 = vrot.slane %v3634_v32, 3 }
 0x117   :  { %540 = vrot.lane.b32.xlu1 %v498_v47, %s2914_s21  ;;  %538 = vrot.lane.b32.xlu0 %v496_v48, %s2914_s21  ;;  %v167_v47 = vsel %vm134_vm1, %v165_v26, %v166_v41  ;;  %v499_v26 = vrot.slane %v3610_v61, 4 }
 0x118   :  { %675 = vrot.lane.b32.xlu2 %v625_v44, %s2913_s20  ;;  %v279_v44 = vrot.slane %v3639_v16, 2 }
 0x119   :  { %v795_v55 = vpop.permute.xlu1 %794  ;;  %v666_v58 = vpop.permute.xlu0 %665 }
 0x11a   :  { %v1161_v60 = vsel %vm1153_vm11, %v1136_v59, %v666_v58  ;;  %v3587_v6 = vpop.permute.xlu2 %532  ;;  %v1063_v59 = vsel %vm1053_vm7, %v3307_v1, %v3546_v33 }
 0x11b   :  { %v1186_v8 = vsel %vm1178_vm12, %v1161_v60, %v795_v55  ;;  %v280_v55 = vsel %vm247_vm4, %v278_v46, %v279_v44 }
 0x11c   :  { %v1211_v9 = vsel %vm1203_vm13, %v1186_v8, %v924_v27  ;;  %v3615_v27 = vld [vmem:[%s4585_s0 + $0xa8] sm:$0xff] }
 0x11d   :  { %v161_v19 = vrot.slane %v3615_v27, 1  ;;  %v274_v37 = vrot.slane %v3615_v27, 2 }
 0x11f   :  { %804 = vrot.lane.b32.xlu1 %v754_v3, %s2916_s25  ;;  %677 = vrot.lane.b32.xlu0 %v627_v52, %s2913_s20  ;;  %v162_v29 = vsel %vm134_vm1, %v160_v28, %v161_v19  ;;  %v164_v34 = vsel %vm134_vm1, %v161_v19, %v163_v14  ;;  %v275_v42 = vsel %vm247_vm4, %v273_v35, %v274_v37  ;;  %v387_v3 = vrot.slane %v3615_v27, 3 }
 0x120   :  { %806 = vrot.lane.b32.xlu2 %v756_v10, %s2916_s25  ;;  %v277_v50 = vsel %vm247_vm4, %v274_v37, %v276_v38  ;;  %v389_v10 = vrot.slane %v3624_v39, 3  ;;  %v500_v37 = vrot.slane %v3615_v27, 4 }
 0x121   :  { %v192_v43 = vpop.permute.xlu1 %191  ;;  %v996_v15 = vpop.permute.xlu0 %995 }
 0x122   :  { %v1236_v17 = vsel %vm1228_vm14, %v1211_v9, %v996_v15  ;;  %v3605_v20 = vpop.permute.xlu2 %796  ;;  %v1062_v60 = vsel %vm1053_vm7, %v3248_v18, %v192_v43  ;;  %v392_v43 = vrot.slane %v3639_v16, 3 }
 0x123   :  { %v1282_v21 = vrot.slane %v1236_v17, 4  ;;  %1325 = vst [vmem:[#allocation1 + $0x20] ss:$2 sm:$0xff] %v1236_v17  ;;  %v390_v17 = vsel %vm360_vm0, %v387_v3, %v389_v10 }
 0x125   :  { %1326 = vst [vmem:[#allocation1 + $0x21] ss:$2 sm:$0xff] %v1282_v21  ;;  %v388_v21 = vsel %vm360_vm0, %v386_v12, %v387_v3 }
 0x127   :  { %935 = vrot.lane.b32.xlu1 %v885_v22, %s2918_s27  ;;  %933 = vrot.lane.b32.xlu0 %v883_v24, %s2918_s27 }
 0x128   :  { %1005 = vrot.lane.b32.xlu2 %v3493_v45, %s2917_s26 }
 0x129   :  { %v307_v23 = vpop.permute.xlu1 %306  ;;  %v305_v11 = vpop.permute.xlu0 %304 }
 0x12a   :  { %v928_v30 = vpop.permute.xlu2 %927  ;;  %v1088_v52 = vsel %vm1078_vm8, %v1063_v59, %v307_v23  ;;  %v1087_v8 = vsel %vm1078_vm8, %v1062_v60, %v305_v11 }
 0x12c   :  { %v1331_v4 = vld.sshfl [vmem:[#allocation1 + $0x20] sm:$0xff pattern:$0x75316420] }
 0x12d   :  { %2832 = vmatmul.msk.f32.gmra.mxu0 %vm1369_vm15, %v1331_v4 }
 0x12f   :  { %205 = vrot.lane.b32.xlu1 %v162_v29, %s2912_s19  ;;  %1007 = vrot.lane.b32.xlu0 %v3504_v62, %s2917_s26 }
 0x130   :  { %207 = vrot.lane.b32.xlu2 %v164_v34, %s2912_s19 }
 0x131   :  { %v531_v2 = vpop.permute.xlu1 %530  ;;  %v420_v7 = vpop.permute.xlu0 %419 }
 0x132   :  { %v3655_v48 = vpop.permute.xlu2 %195  ;;  %v1113_v1 = vsel %vm1103_vm9, %v1088_v52, %v420_v7  ;;  %v505_v7 = vrot.slane %v3639_v16, 4 }
 0x133   :  { %v1138_v15 = vsel %vm1128_vm10, %v1113_v1, %v3587_v6  ;;  %v393_v6 = vsel %vm360_vm0, %v391_v40, %v392_v43 }
 0x137   :  { %318 = vrot.lane.b32.xlu1 %v275_v42, %s2915_s22  ;;  %211 = vrot.lane.b32.xlu0 %v167_v47, %s2912_s19  ;;  %v502_v42 = vrot.slane %v3624_v39, 4 }
 0x138   :  { %320 = vrot.lane.b32.xlu2 %v277_v50, %s2915_s22 }
 0x139   :  { %v670_v51 = vpop.permute.xlu1 %669  ;;  %v668_v53 = vpop.permute.xlu0 %667 }
 0x13a   :  { %v3666_v58 = vpop.permute.xlu2 %534  ;;  %v1163_v24 = vsel %vm1153_vm11, %v1138_v15, %v670_v51  ;;  %v503_v51 = vsel %vm473_vm3, %v500_v37, %v502_v42 }
 0x13f   :  { %203 = vrot.lane.b32.xlu1 %v158_v5, %s2912_s19  ;;  %324 = vrot.lane.b32.xlu0 %v280_v55, %s2915_s22  ;;  %v1112_v5 = vsel %vm1103_vm9, %v1087_v8, %v3568_v49  ;;  %v633_v8 = vrot.slane %v3624_v39, 5 }
 0x140   :  { %209 = vrot.lane.b32.xlu2 %v163_v14, %s2912_s19  ;;  %v1137_v9 = vsel %vm1128_vm10, %v1112_v5, %v531_v2  ;;  %v504_v2 = vrot.slane %v3634_v32, 4  ;;  %v638_v5 = vrot.slane %v3639_v16, 5 }
 0x141   :  { %v926_v33 = vpop.permute.xlu1 %925  ;;  %v799_v18 = vpop.permute.xlu0 %798  ;;  %v1162_v49 = vsel %vm1153_vm11, %v1137_v9, %v668_v53 }
 0x142   :  { %v930_v22 = vpop.permute.xlu2 %929  ;;  %v1188_v28 = vsel %vm1178_vm12, %v1163_v24, %v799_v18  ;;  %v1187_v19 = vsel %vm1178_vm12, %v1162_v49, %v3605_v20  ;;  %v762_v49 = vrot.slane %v3624_v39, 6 }
 0x143   :  { %v1212_v23 = vsel %vm1203_vm13, %v1187_v19, %v926_v33  ;;  %v1213_v14 = vsel %vm1203_vm13, %v1188_v28, %v928_v30  ;;  %v501_v30 = vsel %vm473_vm3, %v499_v26, %v500_v37  ;;  %v759_v28 = vrot.slane %v3610_v61, 6 }
 0x147   :  { %433 = vrot.lane.b32.xlu1 %v390_v17, %s2911_s13  ;;  %431 = vrot.lane.b32.xlu0 %v388_v21, %s2911_s13 }
 0x148   :  { %437 = vrot.lane.b32.xlu2 %v393_v6, %s2911_s13 }
 0x149   :  { %v1000_v11 = vpop.permute.xlu1 %999  ;;  %v998_v4 = vpop.permute.xlu0 %997 }
 0x14a   :  { %v1238_v29 = vsel %vm1228_vm14, %v1213_v14, %v1000_v11  ;;  %v1237_v34 = vsel %vm1228_vm14, %v1212_v23, %v998_v4  ;;  %v3712_v20 = vpop.permute.xlu2 %310  ;;  %v766_v11 = vrot.slane %v3634_v32, 6  ;;  %v767_v14 = vrot.slane %v3639_v16, 6 }
 0x14b   :  { %v1283_v35 = vrot.slane %v1238_v29, 4  ;;  %1328 = vst [vmem:[#allocation1 + $0x31] ss:$2 sm:$0xff] %v1238_v29 }
 0x14c   :  { %1327 = vst [vmem:[#allocation1 + $0x30] ss:$2 sm:$0xff] %v1237_v34  ;;  %v3783_v34 = vld [vmem:[%s4585_s0 + $0xb8] sm:$0xf]  ;;  %v768_v37 = vsel %vm723_vm5, %v766_v11, %v767_v14 }
 0x14d   :  { %1333 = vst [vmem:[#allocation1] ss:$2 sm:$0xff] %v1283_v35  ;;  %v3788_v35 = vld [vmem:[%s4585_s0 + $0x98] sm:$0xf]  ;;  %v635_v26 = vrot.slane %v3783_v34, 5 }
 0x14f   :  { %322 = vrot.lane.b32.xlu1 %v276_v38, %s2915_s22  ;;  %316 = vrot.lane.b32.xlu0 %v271_v25, %s2915_s22  ;;  %v1064_v38 = vsel %vm1053_vm7, %v3312_v57, %v3655_v48  ;;  %v506_v25 = vsel %vm473_vm3, %v504_v2, %v505_v7  ;;  %v630_v57 = vrot.slane %v3610_v61, 5  ;;  %v631_v48 = vrot.slane %v3615_v27, 5 }
 0x150   :  { %544 = vrot.lane.b32.xlu2 %v501_v30, %s2914_s21  ;;  %v628_v30 = vrot.slane %v3788_v35, 5 }
 0x151   :  { %v422_v47 = vpop.permute.xlu1 %421  ;;  %v309_v50 = vpop.permute.xlu0 %308  ;;  %v632_v1 = vsel %vm594_vm2, %v630_v57, %v631_v48  ;;  %v896_v57 = vrot.slane %v3639_v16, 7 }
 0x152   :  { %v3731_v53 = vpop.permute.xlu2 %673  ;;  %v1089_v55 = vsel %vm1078_vm8, %v1064_v38, %v309_v50  ;;  %v888_v50 = vrot.slane %v3610_v61, 7  ;;  %v629_v38 = vsel %vm594_vm2, %v626_v54, %v628_v30 }
 0x153   :  { %v1332_v46 = vld.sshfl [vmem:[#allocation1 + $0x30] sm:$0xff pattern:$0x75316420]  ;;  %v1114_v59 = vsel %vm1103_vm9, %v1089_v55, %v422_v47  ;;  %v889_v47 = vrot.slane %v3615_v27, 7 }
 0x154   :  { %2833 = vmatmul.msk.f32.vlgmr.msra.gmra.mxu2 %vm1369_vm15, %v1332_v46  ;;  %v1139_v52 = vsel %vm1128_vm10, %v1114_v59, %v3666_v58  ;;  %v637_v58 = vrot.slane %v3634_v32, 5  ;;  %v636_v46 = vsel %vm594_vm2, %v633_v8, %v635_v26  ;;  %v895_v59 = vrot.slane %v3634_v32, 7  ;;  %v3875_v26 = vld [vmem:[%s4585_s0 + $0xf0] sm:$0xff] }
 0x155   :  { %v890_v55 = vsel %vm852_vm6, %v888_v50, %v889_v47 }
 0x157   :  { %550 = vrot.lane.b32.xlu1 %v506_v25, %s2914_s21  ;;  %546 = vrot.lane.b32.xlu0 %v503_v51, %s2914_s21 }
 0x158   :  { %429 = vrot.lane.b32.xlu2 %v384_v31, %s2911_s13  ;;  %v634_v31 = vsel %vm594_vm2, %v631_v48, %v633_v8  ;;  %v891_v48 = vrot.slane %v3624_v39, 7  ;;  %v897_v8 = vsel %vm852_vm6, %v895_v59, %v896_v57 }
 0x159   :  { %v801_v60 = vpop.permute.xlu1 %800  ;;  %v672_v3 = vpop.permute.xlu0 %671 }
 0x15a   :  { %v1164_v12 = vsel %vm1153_vm11, %v1139_v52, %v672_v3  ;;  %v3747_v33 = vpop.permute.xlu2 %201 }
 0x15b   :  { %v1189_v18 = vsel %vm1178_vm12, %v1164_v12, %v801_v60  ;;  %v892_v12 = vsel %vm852_vm6, %v889_v47, %v891_v48  ;;  %v173_v47 = vrot.slane %v3875_v26, 1 }
 0x15c   :  { %v1214_v9 = vsel %vm1203_vm13, %v1189_v18, %v930_v22  ;;  %v760_v22 = vrot.slane %v3615_v27, 6 }
 0x15e   :  { %v761_v4 = vsel %vm723_vm5, %v759_v28, %v760_v22  ;;  %v3855_v28 = vld [vmem:[%s4585_s0 + $0xe8] sm:$0xff] }
 0x15f   :  { %681 = vrot.lane.b32.xlu1 %v632_v1, %s2913_s20  ;;  %435 = vrot.lane.b32.xlu0 %v389_v10, %s2911_s13  ;;  %v639_v10 = vsel %vm594_vm2, %v637_v58, %v638_v5  ;;  %v764_v58 = vrot.slane %v3783_v34, 6  ;;  %v171_v11 = vrot.slane %v3855_v28, 1 }
 0x160   :  { %683 = vrot.lane.b32.xlu2 %v634_v31, %s2913_s20 }
 0x161   :  { %v198_v40 = vpop.permute.xlu1 %197  ;;  %v1002_v15 = vpop.permute.xlu0 %1001 }
 0x162   :  { %v1239_v17 = vsel %vm1228_vm14, %v1214_v9, %v1002_v15  ;;  %v3763_v24 = vpop.permute.xlu2 %314  ;;  %v1065_v51 = vsel %vm1053_vm7, %v3410_v0, %v198_v40  ;;  %v757_v0 = vrot.slane %v3788_v35, 6 }
 0x163   :  { %v1284_v21 = vrot.slane %v1239_v17, 4  ;;  %1334 = vst [vmem:[#allocation1 + $0x1] ss:$2 sm:$0xff] %v1239_v17  ;;  %v1090_v54 = vsel %vm1078_vm8, %v1065_v51, %v3712_v20  ;;  %v893_v51 = vrot.slane %v3783_v34, 7 }
 0x164   :  { %v758_v18 = vsel %vm723_vm5, %v755_v63, %v757_v0  ;;  %v3846_v63 = vld [vmem:[%s4585_s0 + $0xd0] sm:$0xff]  ;;  %v284_v0 = vrot.slane %v3855_v28, 2 }
 0x165   :  { %1335 = vst [vmem:[#allocation1 + $0x10] ss:$2 sm:$0xff] %v1284_v21 }
 0x167   :  { %542 = vrot.lane.b32.xlu1 %v497_v36, %s2914_s21  ;;  %687 = vrot.lane.b32.xlu0 %v639_v10, %s2913_s20  ;;  %v763_v36 = vsel %vm723_vm5, %v760_v22, %v762_v49  ;;  %v765_v10 = vsel %vm723_vm5, %v762_v49, %v764_v58  ;;  %v3860_v49 = vld [vmem:[%s4585_s0 + $0xe0] sm:$0xff] }
 0x168   :  { %548 = vrot.lane.b32.xlu2 %v502_v42, %s2914_s21 }
 0x169   :  { %v537_v6 = vpop.permute.xlu1 %536  ;;  %v424_v19 = vpop.permute.xlu0 %423 }
 0x16a   :  { %v1341_v23 = vld.sshfl [vmem:[#allocation1] sm:$0xff pattern:$0x75316420]  ;;  %v3778_v29 = vpop.permute.xlu2 %427  ;;  %v1115_v3 = vsel %vm1103_vm9, %v1090_v54, %v424_v19  ;;  %v174_v54 = vsel %vm134_vm1, %v171_v11, %v173_v47 }
 0x16b   :  { %2834 = vmatmul.msk.f32.gmra.mxu2 %vm1369_vm15, %v1341_v23  ;;  %v1140_v20 = vsel %vm1128_vm10, %v1115_v3, %v537_v6 }
 0x16c   :  { %v1165_v31 = vsel %vm1153_vm11, %v1140_v20, %v3731_v53  ;;  %v168_v53 = vrot.slane %v3846_v63, 1 }
 0x16f   :  { %812 = vrot.lane.b32.xlu1 %v763_v36, %s2916_s25  ;;  %810 = vrot.lane.b32.xlu0 %v761_v4, %s2916_s25  ;;  %v170_v36 = vrot.slane %v3860_v49, 1  ;;  %v169_v4 = vsel %vm134_vm1, %v166_v41, %v168_v53 }
 0x170   :  { %816 = vrot.lane.b32.xlu2 %v768_v37, %s2916_s25 }
 0x171   :  { %v3797_v2 = vpop.permute.xlu1 %199  ;;  %v803_v42 = vpop.permute.xlu0 %802  ;;  %v172_v30 = vsel %vm134_vm1, %v170_v36, %v171_v11  ;;  %vm1878_vm1 = vcmask 126976  }
 0x172   :  { %v3806_v25 = vpop.permute.xlu2 %675  ;;  %v1190_v40 = vsel %vm1178_vm12, %v1165_v31, %v803_v42  ;;  %v886_v42 = vrot.slane %v3788_v35, 7  ;;  %v286_v31 = vrot.slane %v3875_v26, 2 }
 0x174   :  { %v887_v59 = vsel %vm852_vm6, %v884_v13, %v886_v42  ;;  %v894_v13 = vsel %vm852_vm6, %v891_v48, %v893_v51 }
 0x177   :  { %685 = vrot.lane.b32.xlu1 %v636_v46, %s2913_s20  ;;  %679 = vrot.lane.b32.xlu0 %v629_v38, %s2913_s20  ;;  %v1066_v38 = vsel %vm1053_vm7, %v3488_v56, %v3797_v2  ;;  %v1067_v56 = vsel %vm1053_vm7, %v3493_v45, %v3747_v33 }
 0x178   :  { %939 = vrot.lane.b32.xlu2 %v890_v55, %s2918_s27 }
 0x179   :  { %v313_v60 = vpop.permute.xlu1 %312  ;;  %v932_v52 = vpop.permute.xlu0 %931 }
 0x17a   :  { %v3827_v1 = vpop.permute.xlu2 %806  ;;  %v1215_v15 = vsel %vm1203_vm13, %v1190_v40, %v932_v52  ;;  %v1091_v55 = vsel %vm1078_vm8, %v1066_v38, %v313_v60  ;;  %v283_v60 = vrot.slane %v3860_v49, 2  ;;  %v399_v38 = vrot.slane %v3875_v26, 3 }
 0x17f   :  { %945 = vrot.lane.b32.xlu1 %v897_v8, %s2918_s27  ;;  %941 = vrot.lane.b32.xlu0 %v892_v12, %s2918_s27  ;;  %v281_v8 = vrot.slane %v3846_v63, 2  ;;  %v1092_v12 = vsel %vm1078_vm8, %v1067_v56, %v3763_v24  ;;  %v285_v24 = vsel %vm247_vm4, %v283_v60, %v284_v0  ;;  %v507_v56 = vrot.slane %v3846_v63, 4 }
 0x180   :  { %808 = vrot.lane.b32.xlu2 %v758_v18, %s2916_s25  ;;  %v1117_v58 = vsel %vm1103_vm9, %v1092_v12, %v3778_v29  ;;  %v287_v29 = vsel %vm247_vm4, %v284_v0, %v286_v31 }
 0x181   :  { %v426_v9 = vpop.permute.xlu1 %425  ;;  %v1004_v17 = vpop.permute.xlu0 %1003 }
 0x182   :  { %v1240_v21 = vsel %vm1228_vm14, %v1215_v15, %v1004_v17  ;;  %v1006_v22 = vpop.permute.xlu2 %1005 }
 0x183   :  { %1336 = vst [vmem:[#allocation1 + $0x11] ss:$2 sm:$0xff] %v1240_v21 }
 0x187   :  { %1011 = vrot.lane.b32.xlu1 %v3615_v27, %s2917_s26  ;;  %814 = vrot.lane.b32.xlu0 %v765_v10, %s2916_s25 }
 0x188   :  { %1013 = vrot.lane.b32.xlu2 %v3624_v39, %s2917_s26 }
 0x189   :  { %v541_v6 = vpop.permute.xlu1 %540  ;;  %v539_v19 = vpop.permute.xlu0 %538 }
 0x18a   :  { %v1342_v23 = vld.sshfl [vmem:[#allocation1 + $0x10] sm:$0xff pattern:$0x75316420]  ;;  %v208_v37 = vpop.permute.xlu2 %207  ;;  %v1142_v15 = vsel %vm1128_vm10, %v1117_v58, %v541_v6 }
 0x18b   :  { %2835 = vmatmul.msk.f32.gmra.mxu2 %vm1369_vm15, %v1342_v23  ;;  %v1070_v41 = vsel %vm1053_vm7, %v3615_v27, %v208_v37  ;;  %v1116_v27 = vsel %vm1103_vm9, %v1091_v55, %v426_v9 }
 0x18c   :  { %v1141_v2 = vsel %vm1128_vm10, %v1116_v27, %v539_v19  ;;  %v510_v27 = vrot.slane %v3855_v28, 4 }
 0x18d   :  { %v1166_v45 = vsel %vm1153_vm11, %v1141_v2, %v3806_v25  ;;  %v282_v25 = vsel %vm247_vm4, %v279_v44, %v281_v8  ;;  %vm2231_vm4 = vcmask 1044484  }
 0x18f   :  { %213 = vrot.lane.b32.xlu1 %v169_v4, %s2912_s19  ;;  %1017 = vrot.lane.b32.xlu0 %v3639_v16, %s2917_s26 }
 0x190   :  { %217 = vrot.lane.b32.xlu2 %v172_v30, %s2912_s19 }
 0x191   :  { %v805_v50 = vpop.permute.xlu1 %804  ;;  %v678_v46 = vpop.permute.xlu0 %677 }
 0x192   :  { %v321_v3 = vpop.permute.xlu2 %320  ;;  %v1191_v20 = vsel %vm1178_vm12, %v1166_v45, %v805_v50  ;;  %v1167_v21 = vsel %vm1153_vm11, %v1142_v15, %v678_v46  ;;  %v397_v50 = vrot.slane %v3855_v28, 3 }
 0x193   :  { %v3899_v52 = vsel %vm1078_vm8, %v1070_v41, %v321_v3  ;;  %v1192_v10 = vsel %vm1178_vm12, %v1167_v21, %v3827_v1  ;;  %v394_v1 = vrot.slane %v3846_v63, 3 }
 0x194   :  { %v400_v3 = vsel %vm360_vm0, %v397_v50, %v399_v38 }
 0x197   :  { %937 = vrot.lane.b32.xlu1 %v887_v59, %s2918_s27  ;;  %219 = vrot.lane.b32.xlu0 %v174_v54, %s2912_s19 }
 0x198   :  { %943 = vrot.lane.b32.xlu2 %v894_v13, %s2918_s27  ;;  %v512_v13 = vrot.slane %v3875_v26, 4 }
 0x199   :  { %v936_v33 = vpop.permute.xlu1 %935  ;;  %v934_v18 = vpop.permute.xlu0 %933 }
 0x19a   :  { %v1216_v48 = vsel %vm1203_vm13, %v1191_v20, %v934_v18  ;;  %v3928_v9 = vpop.permute.xlu2 %209  ;;  %v1217_v44 = vsel %vm1203_vm13, %v1192_v10, %v936_v33  ;;  %v513_v12 = vsel %vm473_vm3, %v510_v27, %v512_v13 }
 0x19b   :  { %v1241_v40 = vsel %vm1228_vm14, %v1216_v48, %v1006_v22  ;;  %v1071_v45 = vsel %vm1053_vm7, %v3624_v39, %v3928_v9  ;;  %v644_v9 = vrot.slane %v3860_v49, 5 }
 0x19c   :  { %v1285_v17 = vrot.slane %v1241_v40, 4  ;;  %1337 = vst [vmem:[#allocation1 + $0x20] ss:$2 sm:$0xff] %v1241_v40 }
 0x19e   :  { %1338 = vst [vmem:[#allocation1 + $0x21] ss:$2 sm:$0xff] %v1285_v17 }
 0x19f   :  { %330 = vrot.lane.b32.xlu1 %v285_v24, %s2915_s22  ;;  %326 = vrot.lane.b32.xlu0 %v282_v25, %s2915_s22  ;;  %v647_v24 = vrot.slane %v3875_v26, 5 }
 0x1a0   :  { %332 = vrot.lane.b32.xlu2 %v287_v29, %s2915_s22 }
 0x1a1   :  { %v206_v22 = vpop.permute.xlu1 %205  ;;  %v1008_v19 = vpop.permute.xlu0 %1007 }
 0x1a2   :  { %v1242_v6 = vsel %vm1228_vm14, %v1217_v44, %v1008_v19  ;;  %v438_v11 = vpop.permute.xlu2 %437  ;;  %v1069_v4 = vsel %vm1053_vm7, %v3610_v61, %v206_v22  ;;  %v773_v19 = vrot.slane %v3860_v49, 6 }
 0x1a3   :  { %v1286_v23 = vrot.slane %v1242_v6, 4  ;;  %1339 = vst [vmem:[#allocation1 + $0x30] ss:$2 sm:$0xff] %v1242_v6 }
 0x1a5   :  { %v1343_v36 = vld.sshfl [vmem:[#allocation1 + $0x20] sm:$0xff pattern:$0x75316420]  ;;  %1340 = vst [vmem:[#allocation1 + $0x31] ss:$2 sm:$0xff] %v1286_v23 }
 0x1a6   :  { %2836 = vmatmul.msk.f32.gmra.mxu2 %vm1369_vm15, %v1343_v36  ;;  %v4040_v36 = vld [vmem:[%s4585_s0 + $0xd8] sm:$0xf] }
 0x1a7   :  { %1015 = vrot.lane.b32.xlu1 %v3783_v34, %s2917_s26  ;;  %1009 = vrot.lane.b32.xlu0 %v3788_v35, %s2917_s26  ;;  %v396_v34 = vrot.slane %v3860_v49, 3  ;;  %v395_v35 = vsel %vm360_vm0, %v392_v43, %v394_v1 }
 0x1a8   :  { %215 = vrot.lane.b32.xlu2 %v168_v53, %s2912_s19 }
 0x1a9   :  { %v319_v37 = vpop.permute.xlu1 %318  ;;  %v212_v42 = vpop.permute.xlu0 %211  ;;  %v398_v41 = vsel %vm360_vm0, %v396_v34, %v397_v50  ;;  %v776_v50 = vrot.slane %v3875_v26, 6 }
 0x1aa   :  { %v3949_v30 = vsel %vm1078_vm8, %v1069_v4, %v319_v37  ;;  %v3959_v46 = vpop.permute.xlu2 %544  ;;  %v1072_v51 = vsel %vm1053_vm7, %v3634_v32, %v212_v42  ;;  %v4050_v37 = vld [vmem:[%s4585_s0 + $0xf8] sm:$0xf] }
 0x1ac   :  { %v1344_v61 = vld.sshfl [vmem:[#allocation1 + $0x30] sm:$0xff pattern:$0x75316420] }
 0x1ae   :  { %2837 = vmatmul.msk.f32.gmra.mxu2 %vm1369_vm15, %v1344_v61 }
 0x1af   :  { %439 = vrot.lane.b32.xlu1 %v395_v35, %s2911_s13  ;;  %221 = vrot.lane.b32.xlu0 %v173_v47, %s2912_s19  ;;  %v509_v47 = vrot.slane %v3860_v49, 4  ;;  %v649_v35 = vrot.slane %v4050_v37, 5 }
 0x1b0   :  { %443 = vrot.lane.b32.xlu2 %v398_v41, %s2911_s13 }
 0x1b1   :  { %v204_v53 = vpop.permute.xlu1 %203  ;;  %v325_v43 = vpop.permute.xlu0 %324  ;;  %v511_v60 = vsel %vm473_vm3, %v509_v47, %v510_v27  ;;  %v905_v47 = vrot.slane %v3875_v26, 7 }
 0x1b2   :  { %v1097_v55 = vsel %vm1078_vm8, %v1072_v51, %v325_v43  ;;  %v430_v59 = vpop.permute.xlu2 %429  ;;  %v1068_v20 = vsel %vm1053_vm7, %v3504_v62, %v204_v53  ;;  %v645_v62 = vrot.slane %v3855_v28, 5  ;;  %v902_v51 = vrot.slane %v3860_v49, 7 }
 0x1b3   :  { %v3973_v54 = vsel %vm1103_vm9, %v1097_v55, %v438_v11  ;;  %v903_v43 = vrot.slane %v3855_v28, 7 }
 0x1b4   :  { %v648_v17 = vsel %vm594_vm2, %v645_v62, %v647_v24  ;;  %v646_v29 = vsel %vm594_vm2, %v644_v9, %v645_v62 }
 0x1b5   :  { %v904_v27 = vsel %vm852_vm6, %v902_v51, %v903_v43 }
 0x1b7   :  { %328 = vrot.lane.b32.xlu1 %v281_v8, %s2915_s22  ;;  %445 = vrot.lane.b32.xlu0 %v400_v3, %s2911_s13  ;;  %v508_v8 = vsel %vm473_vm3, %v505_v7, %v507_v56  ;;  %vm2228_vm3 = vcmask 1043459  }
 0x1b8   :  { %334 = vrot.lane.b32.xlu2 %v286_v31, %s2915_s22  ;;  %v640_v31 = vrot.slane %v3846_v63, 5 }
 0x1b9   :  { %v3980_v32 = vpop.permute.xlu1 %433  ;;  %v3983_v2 = vpop.permute.xlu0 %431 }
 0x1ba   :  { %v3988_v0 = vpop.permute.xlu2 %683  ;;  %v641_v39 = vsel %vm594_vm2, %v638_v5, %v640_v31  ;;  %v769_v5 = vrot.slane %v3846_v63, 6 }
 0x1bc   :  { %v770_v6 = vsel %vm723_vm5, %v767_v14, %v769_v5  ;;  %v642_v14 = vrot.slane %v4040_v36, 5 }
 0x1be   :  { %v643_v61 = vsel %vm594_vm2, %v640_v31, %v642_v14  ;;  %v1119_v31 = vsel %vm1103_vm9, %v3949_v30, %v3983_v2 }
 0x1bf   :  { %556 = vrot.lane.b32.xlu1 %v511_v60, %s2914_s21  ;;  %552 = vrot.lane.b32.xlu0 %v508_v8, %s2914_s21  ;;  %v906_v60 = vsel %vm852_vm6, %v903_v43, %v905_v47  ;;  %v778_v8 = vrot.slane %v4050_v37, 6 }
 0x1c0   :  { %558 = vrot.lane.b32.xlu2 %v513_v12, %s2914_s21 }
 0x1c1   :  { %v323_v33 = vpop.permute.xlu1 %322  ;;  %v317_v48 = vpop.permute.xlu0 %316 }
 0x1c2   :  { %v1096_v18 = vsel %vm1078_vm8, %v1071_v45, %v323_v33  ;;  %v1093_v7 = vsel %vm1078_vm8, %v1068_v20, %v317_v48  ;;  %v549_v58 = vpop.permute.xlu2 %548  ;;  %v771_v45 = vrot.slane %v4040_v36, 6  ;;  %v779_v20 = vsel %vm723_vm5, %v776_v50, %v778_v8 }
 0x1c3   :  { %v4006_v40 = vsel %vm1103_vm9, %v1093_v7, %v430_v59  ;;  %v898_v59 = vrot.slane %v3846_v63, 7  ;;  %v1120_v48 = vsel %vm1103_vm9, %v3899_v52, %v3980_v32  ;;  %v900_v32 = vrot.slane %v4040_v36, 7 }
 0x1c7   :  { %447 = vrot.lane.b32.xlu1 %v399_v38, %s2911_s13  ;;  %441 = vrot.lane.b32.xlu0 %v394_v1, %s2911_s13  ;;  %v774_v1 = vrot.slane %v3855_v28, 6  ;;  %v650_v38 = vsel %vm594_vm2, %v647_v24, %v649_v35  ;;  %v1144_v24 = vsel %vm1128_vm10, %v1119_v31, %v3959_v46  ;;  %vm2225_vm2 = vcmask 1042434  }
 0x1c8   :  { %689 = vrot.lane.b32.xlu2 %v641_v39, %s2913_s20 }
 0x1c9   :  { %v4015_v25 = vpop.permute.xlu1 %550  ;;  %v547_v15 = vpop.permute.xlu0 %546  ;;  %v775_v4 = vsel %vm723_vm5, %v773_v19, %v774_v1  ;;  %v777_v53 = vsel %vm723_vm5, %v774_v1, %v776_v50 }
 0x1ca   :  { %v4020_v21 = vpop.permute.xlu2 %816  ;;  %v1145_v7 = vsel %vm1128_vm10, %v1120_v48, %v547_v15 }
 0x1cb   :  { %v1170_v39 = vsel %vm1153_vm11, %v1145_v7, %v3988_v0 }
 0x1cf   :  { %695 = vrot.lane.b32.xlu1 %v648_v17, %s2913_s20  ;;  %693 = vrot.lane.b32.xlu0 %v646_v29, %s2913_s20  ;;  %v2919_v17 = vmov 0  }
 0x1d0   :  { %554 = vrot.lane.b32.xlu2 %v507_v56, %s2914_s21  ;;  %2873 = vset.pattern.permute.xlu0 %v2919_v17 }
 0x1d1   :  { %v682_v10 = vpop.permute.xlu1 %681  ;;  %v436_v22 = vpop.permute.xlu0 %435  ;;  %2874 = vset.pattern.permute.xlu2 %v2919_v17 }
 0x1d2   :  { %v1121_v44 = vsel %vm1103_vm9, %v1096_v18, %v436_v22  ;;  %v4032_v23 = vpop.permute.xlu2 %939  ;;  %v1169_v30 = vsel %vm1153_vm11, %v1144_v24, %v682_v10  ;;  %v907_v22 = vrot.slane %v4050_v37, 7 }
 0x1d3   :  { %v4035_v11 = vsel %vm1128_vm10, %v1121_v44, %v549_v58 }
 0x1d4   :  { %v908_v14 = vsel %vm852_vm6, %v905_v47, %v907_v22 }
 0x1d7   :  { %818 = vrot.lane.b32.xlu1 %v770_v6, %s2916_s25  ;;  %560 = vrot.lane.b32.xlu0 %v512_v13, %s2914_s21  ;;  %v899_v13 = vsel %vm852_vm6, %v896_v57, %v898_v59  ;;  %v772_v57 = vsel %vm723_vm5, %v769_v5, %v771_v45  ;;  %v901_v5 = vsel %vm852_vm6, %v898_v59, %v900_v32  ;;  %vm2431_vm5 = vcmask 392192  }
 0x1d8   :  { %822 = vrot.lane.b32.xlu2 %v775_v4, %s2916_s25  ;;  %v1147_v4 = vsel %vm1128_vm10, %v3973_v54, %v4015_v25 }
 0x1d9   :  { %v4052_v42 = vpop.permute.xlu1 %542  ;;  %v4055_v34 = vpop.permute.xlu0 %687 }
 0x1da   :  { %v4060_v41 = vpop.permute.xlu2 %808  ;;  %v1143_v8 = vsel %vm1128_vm10, %v4006_v40, %v4052_v42 }
 0x1df   :  { %691 = vrot.lane.b32.xlu1 %v643_v61, %s2913_s20  ;;  %824 = vrot.lane.b32.xlu0 %v777_v53, %s2916_s25 }
 0x1e0   :  { %697 = vrot.lane.b32.xlu2 %v650_v38, %s2913_s20 }
 0x1e1   :  { %v813_v55 = vpop.permute.xlu1 %812  ;;  %v811_v3 = vpop.permute.xlu0 %810 }
 0x1e2   :  { %v1014_v56 = vpop.permute.xlu2 %1013  ;;  %v1195_v52 = vsel %vm1178_vm12, %v1170_v39, %v813_v55  ;;  %v1194_v0 = vsel %vm1178_vm12, %v1169_v30, %v811_v3 }
 0x1e3   :  { %v1219_v10 = vsel %vm1203_vm13, %v1194_v0, %v4032_v23  ;;  %v1172_v23 = vsel %vm1153_vm11, %v1147_v4, %v4055_v34 }
 0x1e4   :  { %v1197_v50 = vsel %vm1178_vm12, %v1172_v23, %v4020_v21 }
 0x1e7   :  { %951 = vrot.lane.b32.xlu1 %v904_v27, %s2918_s27  ;;  %947 = vrot.lane.b32.xlu0 %v899_v13, %s2918_s27 }
 0x1e8   :  { %953 = vrot.lane.b32.xlu2 %v906_v60, %s2918_s27 }
 0x1e9   :  { %v4079_v12 = vpop.permute.xlu1 %685  ;;  %v4082_v33 = vpop.permute.xlu0 %679 }
 0x1ea   :  { %v4086_v18 = vpop.permute.xlu2 %217  ;;  %v1171_v45 = vsel %vm1153_vm11, %v4035_v11, %v4079_v12 }
 0x1eb   :  { %v1075_v3 = vsel %vm1053_vm7, %v3860_v49, %v4086_v18  ;;  %v1168_v49 = vsel %vm1153_vm11, %v1143_v8, %v4082_v33 }
 0x1ec   :  { %v1193_v18 = vsel %vm1178_vm12, %v1168_v49, %v4060_v41 }
 0x1ef   :  { %826 = vrot.lane.b32.xlu1 %v779_v20, %s2916_s25  ;;  %820 = vrot.lane.b32.xlu0 %v772_v57, %s2916_s25 }
 0x1f0   :  { %1019 = vrot.lane.b32.xlu2 %v3846_v63, %s2917_s26 }
 0x1f1   :  { %v946_v58 = vpop.permute.xlu1 %945  ;;  %v942_v62 = vpop.permute.xlu0 %941 }
 0x1f2   :  { %v1220_v9 = vsel %vm1203_vm13, %v1195_v52, %v942_v62  ;;  %v944_v15 = vpop.permute.xlu2 %943  ;;  %v1222_v61 = vsel %vm1203_vm13, %v1197_v50, %v946_v58 }
 0x1f3   :  { %v1245_v2 = vsel %vm1228_vm14, %v1220_v9, %v1014_v56 }
 0x1f4   :  { %v1288_v29 = vrot.slane %v1245_v2, 4  ;;  %1348 = vst [vmem:[#allocation1 + $0x11] ss:$2 sm:$0xff] %v1245_v2 }
 0x1f6   :  { %1349 = vst [vmem:[#allocation1 + $0x20] ss:$2 sm:$0xff] %v1288_v29 }
 0x1f7   :  { %1025 = vrot.lane.b32.xlu1 %v3875_v26, %s2917_s26  ;;  %1023 = vrot.lane.b32.xlu0 %v3855_v28, %s2917_s26 }
 0x1f8   :  { %949 = vrot.lane.b32.xlu2 %v901_v5, %s2918_s27 }
 0x1f9   :  { %v1012_v46 = vpop.permute.xlu1 %1011  ;;  %v815_v19 = vpop.permute.xlu0 %814 }
 0x1fa   :  { %v1244_v44 = vsel %vm1228_vm14, %v1219_v10, %v1012_v46  ;;  %v333_v1 = vpop.permute.xlu2 %332 }
 0x1fb   :  { %v1287_v6 = vrot.slane %v1244_v44, 4  ;;  %1346 = vst [vmem:[#allocation1 + $0x1] ss:$2 sm:$0xff] %v1244_v44 }
 0x1fd   :  { %1347 = vst [vmem:[#allocation1 + $0x10] ss:$2 sm:$0xff] %v1287_v6 }
 0x1ff   :  { %1021 = vrot.lane.b32.xlu1 %v4040_v36, %s2917_s26  ;;  %955 = vrot.lane.b32.xlu0 %v908_v14, %s2918_s27  ;;  %v82_v36 = vld [vmem:[%s4586_s1] sm:$0xff] }
 0x200   :  { %1027 = vrot.lane.b32.xlu2 %v4050_v37, %s2917_s26 }
 0x201   :  { %v214_v35 = vpop.permute.xlu1 %213  ;;  %v1018_v53 = vpop.permute.xlu0 %1017 }
 0x202   :  { %v1247_v54 = vsel %vm1228_vm14, %v1222_v61, %v1018_v53  ;;  %v216_v34 = vpop.permute.xlu2 %215  ;;  %v1073_v27 = vsel %vm1053_vm7, %v3639_v16, %v214_v35  ;;  %v1196_v16 = vsel %vm1178_vm12, %v1171_v45, %v815_v19 }
 0x203   :  { %v1289_v38 = vrot.slane %v1247_v54, 4  ;;  %1351 = vst [vmem:[#allocation1 + $0x30] ss:$2 sm:$0xff] %v1247_v54  ;;  %v1221_v20 = vsel %vm1203_vm13, %v1196_v16, %v944_v15  ;;  %v1074_v52 = vsel %vm1053_vm7, %v3846_v63, %v216_v34 }
 0x204   :  { %v1354_v25 = vld.sshfl [vmem:[#allocation1 + $0x10] sm:$0xff pattern:$0x75316420] }
 0x205   :  { %2839 = vmatmul.msk.f32.vlgmr.msra.gmra.mxu3 %vm1369_vm15, %v1354_v25  ;;  %1352 = vst [vmem:[#allocation1 + $0x31] ss:$2 sm:$0xff] %v1289_v38 }
 0x207   :  { %86 = vperm.xlu0 %2873, %v82_v36  }
 0x209   :  { %v938_v21 = vpop.permute.xlu1 %937  ;;  %v220_v51 = vpop.permute.xlu0 %219 }
 0x20a   :  { %v1076_v43 = vsel %vm1053_vm7, %v3855_v28, %v220_v51  ;;  %v444_v37 = vpop.permute.xlu2 %443  ;;  %v1218_v48 = vsel %vm1203_vm13, %v1193_v18, %v938_v21 }
 0x20b   :  { %v4142_v55 = vsel %vm1078_vm8, %v1076_v43, %v333_v1 }
 0x20c   :  { %v1356_v24 = vld.sshfl [vmem:[#allocation1 + $0x30] sm:$0xff pattern:$0x75316420] }
 0x211   :  { %v331_v59 = vpop.permute.xlu1 %330  ;;  %v327_v47 = vpop.permute.xlu0 %326 }
 0x212   :  { %v1100_v56 = vsel %vm1078_vm8, %v1075_v3, %v331_v59  ;;  %v1098_v13 = vsel %vm1078_vm8, %v1073_v27, %v327_v47  ;;  %v335_v28 = vpop.permute.xlu2 %334 }
 0x213   :  { %v1125_v60 = vsel %vm1103_vm9, %v1100_v56, %v444_v37 }
 0x219   :  { %v1016_v57 = vpop.permute.xlu1 %1015  ;;  %v1010_v40 = vpop.permute.xlu0 %1009 }
 0x21a   :  { %v1246_v7 = vsel %vm1228_vm14, %v1221_v20, %v1016_v57  ;;  %v1243_v42 = vsel %vm1228_vm14, %v1218_v48, %v1010_v40  ;;  %v559_v11 = vpop.permute.xlu2 %558  ;;  %v4204_v40 = vld [vmem:[%s4588_s3] ss:$0 sm:$0xff] }
 0x21b   :  { %1350 = vst [vmem:[#allocation1 + $0x21] ss:$2 sm:$0xff] %v1246_v7 }
 0x21c   :  { %1345 = vst [vmem:[#allocation1] ss:$2 sm:$0xff] %v1243_v42 }
 0x221   :  { %v440_v12 = vpop.permute.xlu1 %439  ;;  %v222_v31 = vpop.permute.xlu0 %221 }
 0x222   :  { %v1355_v33 = vld.sshfl [vmem:[#allocation1 + $0x20] sm:$0xff pattern:$0x75316420]  ;;  %v1077_v39 = vsel %vm1053_vm7, %v3875_v26, %v222_v31  ;;  %v690_v62 = vpop.permute.xlu2 %689  ;;  %v1123_v1 = vsel %vm1103_vm9, %v1098_v13, %v440_v12  ;;  %v1430_v31 = vpop.f32.mrf.mxu0  ;;  %vm2708_vm7 = vcmask 1047556  }
 0x223   :  { %v1353_v58 = vld.sshfl [vmem:[#allocation1] sm:$0xff pattern:$0x75316420]  ;;  %2840 = vmatmul.msk.f32.gmra.mxu3 %vm1369_vm15, %v1355_v33  ;;  %v1102_v41 = vsel %vm1078_vm8, %v1077_v39, %v335_v28 }
 0x224   :  { %2838 = vmatmul.msk.f32.gmra.mxu2 %vm1369_vm15, %v1353_v58 }
 0x229   :  { %v329_v32 = vpop.permute.xlu1 %328  ;;  %v446_v15 = vpop.permute.xlu0 %445 }
 0x22a   :  { %v1099_v9 = vsel %vm1078_vm8, %v1074_v52, %v329_v32  ;;  %v555_v2 = vpop.permute.xlu2 %554  ;;  %v1126_v38 = vsel %vm1103_vm9, %v4142_v55, %v446_v15  ;;  %v1431_v32 = vadd.f32 %v4204_v40, %v1430_v31  ;;  %vm2765_vm8 = vcmask 523264  }
 0x22b   :  { %2841 = vmatmul.msk.f32.gmra.mxu3 %vm1369_vm15, %v1356_v24  ;;  %v1151_v21 = vsel %vm1128_vm10, %v1126_v38, %v559_v11 }
 0x22c   :  { %v1511_v24 = vrot.slane %v1431_v32, 2 }
 0x231   :  { %v557_v30 = vpop.permute.xlu1 %556  ;;  %v553_v26 = vpop.permute.xlu0 %552 }
 0x232   :  { %v823_v29 = vpop.permute.xlu2 %822  ;;  %v1148_v4 = vsel %vm1128_vm10, %v1123_v1, %v553_v26  ;;  %v1150_v51 = vsel %vm1128_vm10, %v1125_v60, %v557_v30  ;;  %v1510_v30 = vrot.slane %v1431_v32, 1  ;;  %v1512_v26 = vrot.slane %v1431_v32, 3 }
 0x233   :  { %v1173_v14 = vsel %vm1153_vm11, %v1148_v4, %v690_v62 }
 0x239   :  { %v448_v17 = vpop.permute.xlu1 %447  ;;  %v442_v0 = vpop.permute.xlu0 %441 }
 0x23a   :  { %v698_v10 = vpop.permute.xlu2 %697  ;;  %v1124_v47 = vsel %vm1103_vm9, %v1099_v9, %v442_v0  ;;  %v1127_v18 = vsel %vm1103_vm9, %v1102_v41, %v448_v17  ;;  %v1513_v17 = vrot.slane %v1431_v32, 4  ;;  %v1433_v0 = vpop.f32.mrf.mxu0 }
 0x23b   :  { %v1149_v16 = vsel %vm1128_vm10, %v1124_v47, %v555_v2 }
 0x241   :  { %v696_v5 = vpop.permute.xlu1 %695  ;;  %v694_v46 = vpop.permute.xlu0 %693 }
 0x242   :  { %v954_v19 = vpop.permute.xlu2 %953  ;;  %v1176_v43 = vsel %vm1153_vm11, %v1151_v21, %v696_v5  ;;  %v1175_v37 = vsel %vm1153_vm11, %v1150_v51, %v694_v46  ;;  %v1434_v5 = vadd.f32 %v4204_v40, %v1433_v0  ;;  %v1515_v46 = vrot.slane %v1431_v32, 6 }
 0x243   :  { %v1200_v27 = vsel %vm1178_vm12, %v1175_v37, %v823_v29  ;;  %v1514_v29 = vrot.slane %v1431_v32, 5 }
 0x244   :  { %v1520_v1 = vrot.slane %v1434_v5, 4  ;;  %v1521_v4 = vrot.slane %v1434_v5, 5 }
 0x249   :  { %v819_v22 = vpop.permute.xlu1 %818  ;;  %v561_v44 = vpop.permute.xlu0 %560 }
 0x24a   :  { %v1020_v50 = vpop.permute.xlu2 %1019  ;;  %v1198_v35 = vsel %vm1178_vm12, %v1173_v14, %v819_v22  ;;  %v1152_v48 = vsel %vm1128_vm10, %v1127_v18, %v561_v44  ;;  %v1516_v22 = vrot.slane %v1431_v32, 7  ;;  %v1517_v44 = vrot.slane %v1434_v5, 1 }
 0x24b   :  { %v1177_v42 = vsel %vm1153_vm11, %v1152_v48, %v698_v10  ;;  %v1522_v14 = vrot.slane %v1434_v5, 6 }
 0x251   :  { %v692_v63 = vpop.permute.xlu1 %691  ;;  %v825_v6 = vpop.permute.xlu0 %824 }
 0x252   :  { %v1201_v59 = vsel %vm1178_vm12, %v1176_v43, %v825_v6  ;;  %v950_v56 = vpop.permute.xlu2 %949  ;;  %v1174_v57 = vsel %vm1153_vm11, %v1149_v16, %v692_v63  ;;  %v1519_v63 = vrot.slane %v1434_v5, 3 }
 0x253   :  { %v1226_v55 = vsel %vm1203_vm13, %v1201_v59, %v954_v19  ;;  %v1518_v19 = vrot.slane %v1434_v5, 2 }
 0x259   :  { %v952_v23 = vpop.permute.xlu1 %951  ;;  %v948_v61 = vpop.permute.xlu0 %947 }
 0x25a   :  { %v1223_v53 = vsel %vm1203_vm13, %v1198_v35, %v948_v61  ;;  %v1225_v28 = vsel %vm1203_vm13, %v1200_v27, %v952_v23  ;;  %v1028_v33 = vpop.permute.xlu2 %1027  ;;  %v1436_v23 = vpop.f32.mrf.mxu0  ;;  %v1523_v35 = vrot.slane %v1434_v5, 7 }
 0x25b   :  { %v1248_v54 = vsel %vm1228_vm14, %v1223_v53, %v1020_v50  ;;  %v1437_v50 = vadd.f32 %v4204_v40, %v1436_v23 }
 0x25c   :  { %v1290_v25 = vrot.slane %v1248_v54, 4  ;;  %1357 = vst [vmem:[#allocation1] ss:$2 sm:$0xff] %v1248_v54 }
 0x25d   :  { %v1524_v53 = vrot.slane %v1437_v50, 1  ;;  %v1525_v54 = vrot.slane %v1437_v50, 2  ;;  %v1527_v38 = vrot.slane %v1437_v50, 4  ;;  %v1529_v51 = vrot.slane %v1437_v50, 6 }
 0x25e   :  { %1358 = vst [vmem:[#allocation1 + $0x1] ss:$2 sm:$0xff] %v1290_v25  ;;  %v1526_v25 = vrot.slane %v1437_v50, 3  ;;  %v1530_v43 = vrot.slane %v1437_v50, 7 }
 0x261   :  { %v827_v34 = vpop.permute.xlu1 %826  ;;  %v821_v36 = vpop.permute.xlu0 %820 }
 0x262   :  { %v1199_v7 = vsel %vm1178_vm12, %v1174_v57, %v821_v36  ;;  %v1202_v58 = vsel %vm1178_vm12, %v1177_v42, %v827_v34  ;;  %v1528_v34 = vrot.slane %v1437_v50, 5  ;;  %v1439_v36 = vpop.f32.mrf.mxu0 }
 0x263   :  { %v1224_v11 = vsel %vm1203_vm13, %v1199_v7, %v950_v56  ;;  %v1440_v37 = vadd.f32 %v4204_v40, %v1439_v36 }
 0x265   :  { %v1365_v3 = vld.sshfl [vmem:[#allocation1] sm:$0xff pattern:$0x75316420]  ;;  %v1531_v59 = vrot.slane %v1440_v37, 1  ;;  %v1533_v27 = vrot.slane %v1440_v37, 3  ;;  %v1535_v56 = vrot.slane %v1440_v37, 5 }
 0x266   :  { %2842 = vmatmul.msk.f32.gmra.mxu3 %vm1369_vm15, %v1365_v3  ;;  %v1532_v3 = vrot.slane %v1440_v37, 2 }
 0x269   :  { %v1026_v13 = vpop.permute.xlu1 %1025  ;;  %v1024_v8 = vpop.permute.xlu0 %1023 }
 0x26a   :  { %v1251_v60 = vsel %vm1228_vm14, %v1226_v55, %v1026_v13  ;;  %v1250_v49 = vsel %vm1228_vm14, %v1225_v28, %v1024_v8  ;;  %v1534_v55 = vrot.slane %v1440_v37, 4  ;;  %v1442_v13 = vpop.f32.mrf.mxu0  ;;  %v1536_v8 = vrot.slane %v1440_v37, 6 }
 0x26b   :  { %v1292_v45 = vrot.slane %v1251_v60, 4  ;;  %1362 = vst [vmem:[#allocation1 + $0x21] ss:$2 sm:$0xff] %v1251_v60  ;;  %v1291_v20 = vrot.slane %v1250_v49, 4  ;;  %v1443_v28 = vadd.f32 %v4204_v40, %v1442_v13 }
 0x26c   :  { %1360 = vst [vmem:[#allocation1 + $0x11] ss:$2 sm:$0xff] %v1250_v49 }
 0x26d   :  { %1363 = vst [vmem:[#allocation1 + $0x30] ss:$2 sm:$0xff] %v1292_v45  ;;  %v1537_v45 = vrot.slane %v1440_v37, 7  ;;  %v1538_v18 = vrot.slane %v1443_v28, 1  ;;  %v1539_v48 = vrot.slane %v1443_v28, 2  ;;  %v1544_v0 = vrot.slane %v1443_v28, 7 }
 0x26e   :  { %1361 = vst [vmem:[#allocation1 + $0x20] ss:$2 sm:$0xff] %v1291_v20 }
 0x271   :  { %v1022_v12 = vpop.permute.xlu1 %1021  ;;  %v956_v41 = vpop.permute.xlu0 %955 }
 0x272   :  { %v1249_v39 = vsel %vm1228_vm14, %v1224_v11, %v1022_v12  ;;  %v1227_v62 = vsel %vm1203_vm13, %v1202_v58, %v956_v41  ;;  %v2876_v12 = vld [vmem:[%s4589_s4] ss:$0 sm:$0xff]  ;;  %v1540_v41 = vrot.slane %v1443_v28, 3 }
 0x273   :  { %1359 = vst [vmem:[#allocation1 + $0x10] ss:$2 sm:$0xff] %v1249_v39  ;;  %v1252_v52 = vsel %vm1228_vm14, %v1227_v62, %v1028_v33 }
 0x274   :  { %1364 = vst [vmem:[#allocation1 + $0x31] ss:$2 sm:$0xff] %v1252_v52  ;;  %v1541_v52 = vrot.slane %v1443_v28, 4 }
 0x275   :  { %v1367_v9 = vld.sshfl [vmem:[#allocation1 + $0x20] sm:$0xff pattern:$0x75316420] }
 0x279   :  { %v4232_v58 = vpop.permute.xlu0 %86 }
 0x27a   :  { %v1366_v15 = vld.sshfl [vmem:[#allocation1 + $0x10] sm:$0xff pattern:$0x75316420] }
 0x27b   :  { %1654 = vst [vmem:[#allocation1 + $0x2] ss:$9 sm:$0xff] %v1511_v24  ;;  %2843 = vmatmul.msk.f32.gmra.mxu3 %vm1369_vm15, %v1366_v15  ;;  %v1368_v2 = vld.sshfl [vmem:[#allocation1 + $0x30] sm:$0xff pattern:$0x75316420] }
 0x27c   :  { %1650 = vst [vmem:[#allocation1] ss:$9 sm:$0xff] %v1431_v32  ;;  %v2877_v15 = vld [vmem:[%s4590_s5] ss:$0 sm:$0xff] }
 0x27d   :  { %1652 = vst [vmem:[#allocation1 + $0x1] ss:$9 sm:$0xff] %v1510_v30  ;;  %v92_v30 = vmul.f32 %v2876_v12, %v4232_v58 }
 0x27e   :  { %1656 = vst [vmem:[#allocation1 + $0x3] ss:$9 sm:$0xff] %v1512_v26  ;;  %v1543_v26 = vrot.slane %v1443_v28, 6 }
 0x27f   :  { %1658 = vst [vmem:[#allocation1 + $0x4] ss:$9 sm:$0xff] %v1513_v17 }
 0x283   :  { %2844 = vmatmul.msk.f32.gmra.mxu3 %vm1369_vm15, %v1367_v9  ;;  %v1542_v9 = vrot.slane %v1443_v28, 5 }
 0x286   :  { %v1659_v10 = vld [vmem:[#allocation1] sm:$0xff] }
 0x287   :  { %1660 = vst [vmem:[#allocation1] ss:$9 sm:$0xff] %v1514_v29  ;;  %v1879_v60 = vsel %vm1878_vm1, %v1659_v10, -inf  ;;  %v97_v10 = vadd.f32 %v2877_v15, %v92_v30 }
 0x288   :  { %1661 = vst [vmem:[#allocation1 + $0x1] ss:$9 sm:$0xff] %v1515_v46  ;;  %v1880_v16 = vrot.slane %v1879_v60, 4  ;;  %v1445_v46 = vpop.f32.mrf.mxu0 }
 0x289   :  { %1662 = vst [vmem:[#allocation1 + $0x2] ss:$9 sm:$0xff] %v1516_v22  ;;  %v4243_v23 = vmax.f32 %v97_v10, 0.0 }
 0x28a   :  { %1663 = vst [vmem:[#allocation1 + $0x3] ss:$9 sm:$0xff] %v1434_v5  ;;  %v1881_v42 = vmax.f32 %v1879_v60, %v1880_v16 }
 0x28b   :  { %2845 = vmatmul.msk.f32.gmra.mxu3 %vm1369_vm15, %v1368_v2  ;;  %1664 = vst [vmem:[#allocation1 + $0x4] ss:$9 sm:$0xff] %v1517_v44 }
 0x28c   :  { %v1882_v33 = vrot.slane %v1881_v42, 2 }
 0x28e   :  { %v1883_v2 = vmax.f32 %v1881_v42, %v1882_v33 }
 0x290   :  { %v1884_v22 = vrot.slane %v1883_v2, 1  ;;  %v1448_v60 = vpop.f32.mrf.mxu0 }
 0x292   :  { %v1665_v6 = vld [vmem:[#allocation1] sm:$0xff] }
 0x293   :  { %1666 = vst [vmem:[#allocation1] ss:$9 sm:$0xff] %v1518_v19  ;;  %v1886_v20 = vsel %vm1878_vm1, %v1665_v6, -inf }
 0x294   :  { %1667 = vst [vmem:[#allocation1 + $0x1] ss:$9 sm:$0xff] %v1519_v63  ;;  %v1887_v57 = vrot.slane %v1886_v20, 4 }
 0x295   :  { %1668 = vst [vmem:[#allocation1 + $0x2] ss:$9 sm:$0xff] %v1520_v1  ;;  %v1446_v1 = vadd.f32 %v4204_v40, %v1445_v46 }
 0x296   :  { %1669 = vst [vmem:[#allocation1 + $0x3] ss:$9 sm:$0xff] %v1521_v4  ;;  %v1888_v7 = vmax.f32 %v1886_v20, %v1887_v57 }
 0x297   :  { %1670 = vst [vmem:[#allocation1 + $0x4] ss:$9 sm:$0xff] %v1522_v14  ;;  %v1549_v57 = vrot.slane %v1446_v1, 5 }
 0x298   :  { %v1889_v11 = vrot.slane %v1888_v7, 2 }
 0x29a   :  { %v1890_v62 = vmax.f32 %v1888_v7, %v1889_v11  ;;  %v4253_v7 = vadd.f32 %v4204_v40, %v1448_v60  ;;  %v1550_v11 = vrot.slane %v1446_v1, 6 }
 0x29c   :  { %v1891_v29 = vrot.slane %v1890_v62, 1  ;;  %v1553_v10 = vrot.slane %v4253_v7, 2 }
 0x29e   :  { %v1671_v61 = vld [vmem:[#allocation1] sm:$0xff]  ;;  %v1892_v6 = vmax.f32 %v1890_v62, %v1891_v29  ;;  %v1552_v62 = vrot.slane %v4253_v7, 1 }
 0x29f   :  { %1672 = vst [vmem:[#allocation1] ss:$9 sm:$0xff] %v1523_v35  ;;  %v1893_v31 = vsel %vm1878_vm1, %v1671_v61, -inf }
 0x2a0   :  { %1673 = vst [vmem:[#allocation1 + $0x1] ss:$9 sm:$0xff] %v1437_v50  ;;  %v1894_v39 = vrot.slane %v1893_v31, 4  ;;  %v1885_v50 = vmax.f32 %v1883_v2, %v1884_v22  ;;  %v2104_v61 = vmax.f32 %v1892_v6, 0.0  ;;  %v1554_v22 = vrot.slane %v4253_v7, 3 }
 0x2a1   :  { %1674 = vst [vmem:[#allocation1 + $0x2] ss:$9 sm:$0xff] %v1524_v53  ;;  %v1545_v53 = vrot.slane %v1446_v1, 1  ;;  %v1555_v6 = vrot.slane %v4253_v7, 4 }
 0x2a2   :  { %1675 = vst [vmem:[#allocation1 + $0x3] ss:$9 sm:$0xff] %v1525_v54  ;;  %v1895_v24 = vmax.f32 %v1893_v31, %v1894_v39  ;;  %v2103_v36 = vmax.f32 %v1885_v50, 0.0 }
 0x2a3   :  { %1676 = vst [vmem:[#allocation1 + $0x4] ss:$9 sm:$0xff] %v1526_v25 }
 0x2a4   :  { %v1896_v17 = vrot.slane %v1895_v24, 2 }
 0x2a6   :  { %v1897_v5 = vmax.f32 %v1895_v24, %v1896_v17 }
 0x2a8   :  { %v1898_v19 = vrot.slane %v1897_v5, 1 }
 0x2aa   :  { %v4218_v21 = vld [vmem:[#allocation1] sm:$0xff]  ;;  %v1899_v4 = vmax.f32 %v1897_v5, %v1898_v19 }
 0x2ab   :  { %1678 = vst [vmem:[#allocation1] ss:$9 sm:$0xff] %v1527_v38  ;;  %v1900_v44 = vsel %vm1878_vm1, %v4218_v21, -inf  ;;  %v2143_v21 = vperm.slane %v4243_v23, 0 }
 0x2ac   :  { %1679 = vst [vmem:[#allocation1 + $0x1] ss:$9 sm:$0xff] %v1528_v34  ;;  %v1901_v63 = vrot.slane %v1900_v44, 4  ;;  %v2105_v38 = vmax.f32 %v1899_v4, 0.0  ;;  %v1546_v34 = vrot.slane %v1446_v1, 2  ;;  %v1556_v4 = vrot.slane %v4253_v7, 5 }
 0x2ad   :  { %1680 = vst [vmem:[#allocation1 + $0x2] ss:$9 sm:$0xff] %v1529_v51  ;;  %v1547_v51 = vrot.slane %v1446_v1, 3 }
 0x2ae   :  { %1681 = vst [vmem:[#allocation1 + $0x3] ss:$9 sm:$0xff] %v1530_v43  ;;  %v1902_v14 = vmax.f32 %v1900_v44, %v1901_v63 }
 0x2af   :  { %1682 = vst [vmem:[#allocation1 + $0x4] ss:$9 sm:$0xff] %v1440_v37  ;;  %v1548_v37 = vrot.slane %v1446_v1, 4 }
 0x2b0   :  { %v1903_v35 = vrot.slane %v1902_v14, 2 }
 0x2b2   :  { %v1904_v25 = vmax.f32 %v1902_v14, %v1903_v35 }
 0x2b4   :  { %v1905_v43 = vrot.slane %v1904_v25, 1 }
 0x2b6   :  { %v4221_v47 = vld [vmem:[#allocation1] sm:$0xff] }
 0x2b7   :  { %1684 = vst [vmem:[#allocation1] ss:$9 sm:$0xff] %v1531_v59  ;;  %v2160_v59 = vmul.f32 %v2143_v21, %v2104_v61  ;;  %v1557_v61 = vrot.slane %v4253_v7, 6 }
 0x2b8   :  { %1685 = vst [vmem:[#allocation1 + $0x1] ss:$9 sm:$0xff] %v1532_v3  ;;  %v1906_v3 = vmax.f32 %v1904_v25, %v1905_v43 }
 0x2b9   :  { %1686 = vst [vmem:[#allocation1 + $0x2] ss:$9 sm:$0xff] %v1533_v27  ;;  %v2161_v27 = vmul.f32 %v2143_v21, %v2105_v38 }
 0x2ba   :  { %1687 = vst [vmem:[#allocation1 + $0x3] ss:$9 sm:$0xff] %v1534_v55  ;;  %v2159_v55 = vmul.f32 %v2143_v21, %v2103_v36  ;;  %v2106_v13 = vmax.f32 %v1906_v3, 0.0  ;;  %v1451_v36 = vpop.f32.mrf.mxu2 }
 0x2bb   :  { %1688 = vst [vmem:[#allocation1 + $0x4] ss:$9 sm:$0xff] %v1535_v56  ;;  %v1907_v56 = vsel %vm1878_vm1, %v4221_v47, -inf  ;;  %v1452_v3 = vadd.f32 %v4204_v40, %v1451_v36 }
 0x2bc   :  { %v2162_v16 = vmul.f32 %v2143_v21, %v2106_v13  ;;  %v2223_v20 = vrot.slane %v2159_v55, 7 }
 0x2be   :  { %v2230_v47 = vrot.slane %v2162_v16, 4 }
 0x2c2   :  { %v4225_v49 = vld [vmem:[#allocation1] sm:$0xff] }
 0x2c3   :  { %1690 = vst [vmem:[#allocation1] ss:$9 sm:$0xff] %v1536_v8  ;;  %v2227_v8 = vrot.slane %v2161_v27, 5 }
 0x2c4   :  { %1691 = vst [vmem:[#allocation1 + $0x1] ss:$9 sm:$0xff] %v1537_v45  ;;  %v1908_v45 = vrot.slane %v1907_v56, 4 }
 0x2c5   :  { %1692 = vst [vmem:[#allocation1 + $0x2] ss:$9 sm:$0xff] %v1443_v28  ;;  %v2224_v28 = vrot.slane %v2160_v59, 6 }
 0x2c6   :  { %1693 = vst [vmem:[#allocation1 + $0x3] ss:$9 sm:$0xff] %v1538_v18  ;;  %v1914_v18 = vsel %vm1878_vm1, %v4225_v49, -inf  ;;  %v1909_v31 = vmax.f32 %v1907_v56, %v1908_v45  ;;  %v1558_v56 = vrot.slane %v4253_v7, 7  ;;  %v1559_v45 = vrot.slane %v1452_v3, 1 }
 0x2c7   :  { %1694 = vst [vmem:[#allocation1 + $0x4] ss:$9 sm:$0xff] %v1539_v48  ;;  %v1915_v48 = vrot.slane %v1914_v18, 4  ;;  %v2226_v42 = vsel %vm2225_vm2, %v2224_v28, %v2223_v20  ;;  %v1560_v20 = vrot.slane %v1452_v3, 2 }
 0x2c8   :  { %v2229_v33 = vsel %vm2228_vm3, %v2227_v8, %v2226_v42 }
 0x2c9   :  { %v1916_v39 = vmax.f32 %v1914_v18, %v1915_v48  ;;  %v2232_v49 = vsel %vm2231_vm4, %v2230_v47, %v2229_v33  ;;  %v1561_v48 = vrot.slane %v1452_v3, 3 }
 0x2cb   :  { %v1917_v15 = vrot.slane %v1916_v39, 2 }
 0x2ce   :  { %v4234_v32 = vld [vmem:[#allocation1] sm:$0xff] }
 0x2cf   :  { %1696 = vst [vmem:[#allocation1] ss:$9 sm:$0xff] %v1540_v41  ;;  %v1551_v41 = vrot.slane %v1446_v1, 7  ;;  %v1921_v2 = vsel %vm1878_vm1, %v4234_v32, -inf }
 0x2d0   :  { %1697 = vst [vmem:[#allocation1 + $0x1] ss:$9 sm:$0xff] %v1541_v52  ;;  %v2290_v52 = vsel %vm852_vm6, 0.0, %v2232_v49  ;;  %v1922_v17 = vrot.slane %v1921_v2, 4 }
 0x2d1   :  { %1698 = vst [vmem:[#allocation1 + $0x2] ss:$9 sm:$0xff] %v1542_v9  ;;  %v4264_v24 = vsel %vm360_vm0, %v2290_v52, 0.0  ;;  %v1910_v9 = vrot.slane %v1909_v31, 2 }
 0x2d2   :  { %1699 = vst [vmem:[#allocation1 + $0x3] ss:$9 sm:$0xff] %v1543_v26  ;;  %v2314_v30 = vrot.slane %v4264_v24, 1  ;;  %v1918_v26 = vmax.f32 %v1916_v39, %v1917_v15  ;;  %v1923_v29 = vmax.f32 %v1921_v2, %v1922_v17  ;;  %v2346_v32 = vrot.slane %v4264_v24, 2 }
 0x2d3   :  { %1700 = vst [vmem:[#allocation1 + $0x4] ss:$9 sm:$0xff] %v1544_v0  ;;  %v1911_v0 = vmax.f32 %v1909_v31, %v1910_v9  ;;  %v1562_v2 = vrot.slane %v1452_v3, 4  ;;  %v1563_v17 = vrot.slane %v1452_v3, 5 }
 0x2d4   :  { %2322 = vrot.lane.b32.xlu1 %v2314_v30, %s2914_s21  ;;  %v1919_v5 = vrot.slane %v1918_v26, 1  ;;  %v1924_v46 = vrot.slane %v1923_v29, 2 }
 0x2d5   :  { %v1912_v19 = vrot.slane %v1911_v0, 1 }
 0x2d6   :  { %v1925_v63 = vmax.f32 %v1923_v29, %v1924_v46  ;;  %v1920_v14 = vmax.f32 %v1918_v26, %v1919_v5  ;;  %v1564_v46 = vrot.slane %v1452_v3, 6 }
 0x2d8   :  { %v1926_v50 = vrot.slane %v1925_v63, 1  ;;  %v2108_v21 = vmax.f32 %v1920_v14, 0.0 }
 0x2da   :  { %v4245_v54 = vld [vmem:[#allocation1] sm:$0xff]  ;;  %v1927_v25 = vmax.f32 %v1925_v63, %v1926_v50 }
 0x2db   :  { %1702 = vst [vmem:[#allocation1] ss:$9 sm:$0xff] %v1446_v1  ;;  %v1928_v1 = vsel %vm1878_vm1, %v4245_v54, -inf }
 0x2dc   :  { %1703 = vst [vmem:[#allocation1 + $0x1] ss:$9 sm:$0xff] %v1545_v53  ;;  %v1929_v35 = vrot.slane %v1928_v1, 4  ;;  %2354 = vrot.lane.b32.xlu1 %v2346_v32, %s2917_s26  ;;  %v1913_v53 = vmax.f32 %v1911_v0, %v1912_v19  ;;  %v1454_v0 = vpop.f32.mrf.mxu2 }
 0x2dd   :  { %1704 = vst [vmem:[#allocation1 + $0x2] ss:$9 sm:$0xff] %v1546_v34  ;;  %v2136_v34 = vrot.slane %v4243_v23, 1  ;;  %v1455_v63 = vadd.f32 %v4204_v40, %v1454_v0 }
 0x2de   :  { %1705 = vst [vmem:[#allocation1 + $0x3] ss:$9 sm:$0xff] %v1547_v51  ;;  %v1930_v38 = vmax.f32 %v1928_v1, %v1929_v35  ;;  %v2109_v51 = vmax.f32 %v1927_v25, 0.0 }
 0x2df   :  { %1706 = vst [vmem:[#allocation1 + $0x4] ss:$9 sm:$0xff] %v1548_v37  ;;  %v2107_v37 = vmax.f32 %v1913_v53, 0.0  ;;  %v2144_v59 = vperm.slane %v2136_v34, 0  ;;  %v1566_v34 = vrot.slane %v1455_v63, 1  ;;  %v1567_v36 = vrot.slane %v1455_v63, 2 }
 0x2e0   :  { %v1931_v54 = vrot.slane %v1930_v38, 2 }
 0x2e1   :  { %v2164_v55 = vmul.f32 %v2144_v59, %v2108_v21  ;;  %v2165_v13 = vmul.f32 %v2144_v59, %v2109_v51  ;;  %v2163_v8 = vmul.f32 %v2144_v59, %v2107_v37  ;;  %v2137_v37 = vrot.slane %v4243_v23, 2 }
 0x2e2   :  { %v1932_v43 = vmax.f32 %v1930_v38, %v1931_v54 }
 0x2e3   :  { %v2236_v42 = vrot.slane %v2165_v13, 5 }
 0x2e4   :  { %v1933_v27 = vrot.slane %v1932_v43, 1 }
 0x2e6   :  { %v4256_v12 = vld [vmem:[#allocation1] sm:$0xff]  ;;  %v1934_v60 = vmax.f32 %v1932_v43, %v1933_v27 }
 0x2e7   :  { %1708 = vst [vmem:[#allocation1] ss:$9 sm:$0xff] %v1549_v57  ;;  %v1935_v16 = vsel %vm1878_vm1, %v4256_v12, -inf  ;;  %v2234_v57 = vrot.slane %v2164_v55, 6 }
 0x2e8   :  { %1709 = vst [vmem:[#allocation1 + $0x1] ss:$9 sm:$0xff] %v1550_v11  ;;  %v2110_v18 = vmax.f32 %v1934_v60, 0.0  ;;  %v2233_v11 = vrot.slane %v2163_v8, 7  ;;  %v2145_v8 = vperm.slane %v2137_v37, 0 }
 0x2e9   :  { %1710 = vst [vmem:[#allocation1 + $0x2] ss:$9 sm:$0xff] %v1551_v41 }
 0x2ea   :  { %1711 = vst [vmem:[#allocation1 + $0x3] ss:$9 sm:$0xff] %v4253_v7  ;;  %v2166_v47 = vmul.f32 %v2144_v59, %v2110_v18  ;;  %v1936_v7 = vrot.slane %v1935_v16, 4  ;;  %v2235_v31 = vsel %vm2225_vm2, %v2234_v57, %v2233_v11  ;;  %v1568_v59 = vrot.slane %v1455_v63, 3 }
 0x2eb   :  { %1712 = vst [vmem:[#allocation1 + $0x4] ss:$9 sm:$0xff] %v1552_v62  ;;  %v2237_v12 = vsel %vm2228_vm3, %v2236_v42, %v2235_v31  ;;  %v1572_v31 = vrot.slane %v1455_v63, 7 }
 0x2ec   :  { %v2238_v39 = vrot.slane %v2166_v47, 4  ;;  %v1937_v62 = vmax.f32 %v1935_v16, %v1936_v7  ;;  %v1571_v7 = vrot.slane %v1455_v63, 6 }
 0x2ee   :  { %v2239_v49 = vsel %vm2231_vm4, %v2238_v39, %v2237_v12  ;;  %v1938_v5 = vrot.slane %v1937_v62, 2 }
 0x2ef   :  { %v2291_v9 = vsel %vm852_vm6, 0.0, %v2239_v49 }
 0x2f0   :  { %v4290_v15 = vsel %vm360_vm0, %v2291_v9, 0.0 }
 0x2f1   :  { %v2315_v26 = vrot.slane %v4290_v15, 1  ;;  %v2347_v14 = vrot.slane %v4290_v15, 2 }
 0x2f2   :  { %v1713_v44 = vld [vmem:[#allocation1] sm:$0xff] }
 0x2f3   :  { %1714 = vst [vmem:[#allocation1] ss:$9 sm:$0xff] %v1553_v10  ;;  %v1942_v33 = vsel %vm1878_vm1, %v1713_v44, -inf  ;;  %2324 = vrot.lane.b32.xlu2 %v2315_v26, %s2914_s21 }
 0x2f4   :  { %1715 = vst [vmem:[#allocation1 + $0x1] ss:$9 sm:$0xff] %v1554_v22  ;;  %v1943_v41 = vrot.slane %v1942_v33, 4  ;;  %v1565_v22 = vrot.slane %v1452_v3, 7 }
 0x2f5   :  { %1716 = vst [vmem:[#allocation1 + $0x2] ss:$9 sm:$0xff] %v1555_v6  ;;  %v1939_v6 = vmax.f32 %v1937_v62, %v1938_v5 }
 0x2f6   :  { %1717 = vst [vmem:[#allocation1 + $0x3] ss:$9 sm:$0xff] %v1556_v4  ;;  %v1944_v52 = vmax.f32 %v1942_v33, %v1943_v41 }
 0x2f7   :  { %1718 = vst [vmem:[#allocation1 + $0x4] ss:$9 sm:$0xff] %v1557_v61  ;;  %v1940_v50 = vrot.slane %v1939_v6, 1 }
 0x2f8   :  { %v1945_v30 = vrot.slane %v1944_v52, 2 }
 0x2f9   :  { %v1941_v21 = vmax.f32 %v1939_v6, %v1940_v50 }
 0x2fa   :  { %v1946_v44 = vmax.f32 %v1944_v52, %v1945_v30 }
 0x2fb   :  { %2356 = vrot.lane.b32.xlu2 %v2347_v14, %s2917_s26  ;;  %v2111_v60 = vmax.f32 %v1941_v21, 0.0 }
 0x2fc   :  { %v1947_v1 = vrot.slane %v1946_v44, 1 }
 0x2fe   :  { %v1719_v28 = vld [vmem:[#allocation1] sm:$0xff]  ;;  %v1948_v53 = vmax.f32 %v1946_v44, %v1947_v1 }
 0x2ff   :  { %1720 = vst [vmem:[#allocation1] ss:$9 sm:$0xff] %v1558_v56  ;;  %v1949_v10 = vsel %vm1878_vm1, %v1719_v28, -inf  ;;  %v1570_v56 = vrot.slane %v1455_v63, 5 }
 0x300   :  { %1721 = vst [vmem:[#allocation1 + $0x1] ss:$9 sm:$0xff] %v1452_v3  ;;  %v1950_v19 = vrot.slane %v1949_v10, 4  ;;  %v1569_v3 = vrot.slane %v1455_v63, 4  ;;  %v2112_v55 = vmax.f32 %v1948_v53, 0.0 }
 0x301   :  { %1722 = vst [vmem:[#allocation1 + $0x2] ss:$9 sm:$0xff] %v1559_v45 }
 0x302   :  { %1723 = vst [vmem:[#allocation1 + $0x3] ss:$9 sm:$0xff] %v1560_v20  ;;  %v1951_v32 = vmax.f32 %v1949_v10, %v1950_v19  ;;  %v2168_v16 = vmul.f32 %v2145_v8, %v2112_v55  ;;  %v1457_v20 = vpop.f32.mrf.mxu2 }
 0x303   :  { %1724 = vst [vmem:[#allocation1 + $0x4] ss:$9 sm:$0xff] %v1561_v48  ;;  %v2167_v48 = vmul.f32 %v2145_v8, %v2111_v60  ;;  %v1458_v42 = vadd.f32 %v4204_v40, %v1457_v20 }
 0x304   :  { %v1952_v4 = vrot.slane %v1951_v32, 2  ;;  %v2241_v11 = vrot.slane %v2168_v16, 6 }
 0x305   :  { %v2240_v12 = vrot.slane %v2167_v48, 7  ;;  %v1573_v49 = vrot.slane %v1458_v42, 1  ;;  %v1574_v9 = vrot.slane %v1458_v42, 2  ;;  %v1575_v44 = vrot.slane %v1458_v42, 3 }
 0x306   :  { %v1953_v35 = vmax.f32 %v1951_v32, %v1952_v4  ;;  %v1577_v32 = vrot.slane %v1458_v42, 5  ;;  %v1578_v14 = vrot.slane %v1458_v42, 6 }
 0x307   :  { %v2242_v62 = vsel %vm2225_vm2, %v2241_v11, %v2240_v12 }
 0x308   :  { %v1954_v25 = vrot.slane %v1953_v35, 1 }
 0x30a   :  { %v1725_v29 = vld [vmem:[#allocation1] sm:$0xff]  ;;  %v1955_v51 = vmax.f32 %v1953_v35, %v1954_v25  ;;  %v1579_v35 = vrot.slane %v1458_v42, 7  ;;  %v1460_v25 = vpop.f32.mrf.mxu2 }
 0x30b   :  { %1726 = vst [vmem:[#allocation1] ss:$9 sm:$0xff] %v1562_v2  ;;  %v1956_v61 = vsel %vm1878_vm1, %v1725_v29, -inf }
 0x30c   :  { %1727 = vst [vmem:[#allocation1 + $0x1] ss:$9 sm:$0xff] %v1563_v17  ;;  %v1957_v38 = vrot.slane %v1956_v61, 4  ;;  %v2113_v13 = vmax.f32 %v1955_v51, 0.0 }
 0x30d   :  { %1728 = vst [vmem:[#allocation1 + $0x2] ss:$9 sm:$0xff] %v1564_v46 }
 0x30e   :  { %1729 = vst [vmem:[#allocation1 + $0x3] ss:$9 sm:$0xff] %v1565_v22  ;;  %v1958_v43 = vmax.f32 %v1956_v61, %v1957_v38  ;;  %v2169_v18 = vmul.f32 %v2145_v8, %v2113_v13 }
 0x30f   :  { %1730 = vst [vmem:[#allocation1 + $0x4] ss:$9 sm:$0xff] %v1455_v63  ;;  %v1576_v63 = vrot.slane %v1458_v42, 4 }
 0x310   :  { %v1959_v27 = vrot.slane %v1958_v43, 2  ;;  %v2243_v33 = vrot.slane %v2169_v18, 5  ;;  %v2138_v18 = vrot.slane %v4243_v23, 3 }
 0x312   :  { %v1960_v28 = vmax.f32 %v1958_v43, %v1959_v27  ;;  %v2244_v30 = vsel %vm2228_vm3, %v2243_v33, %v2242_v62  ;;  %v2146_v33 = vperm.slane %v2138_v18, 0 }
 0x314   :  { %v1961_v45 = vrot.slane %v1960_v28, 1 }
 0x316   :  { %v1731_v54 = vld [vmem:[#allocation1] sm:$0xff]  ;;  %v1962_v57 = vmax.f32 %v1960_v28, %v1961_v45 }
 0x317   :  { %1732 = vst [vmem:[#allocation1] ss:$9 sm:$0xff] %v1566_v34  ;;  %v1963_v29 = vsel %vm1878_vm1, %v1731_v54, -inf  ;;  %v1461_v54 = vadd.f32 %v4204_v40, %v1460_v25 }
 0x318   :  { %1733 = vst [vmem:[#allocation1 + $0x1] ss:$9 sm:$0xff] %v1567_v36  ;;  %v2114_v47 = vmax.f32 %v1962_v57, 0.0  ;;  %v1964_v22 = vrot.slane %v1963_v29, 4 }
 0x319   :  { %1734 = vst [vmem:[#allocation1 + $0x2] ss:$9 sm:$0xff] %v1568_v59  ;;  %v1580_v37 = vrot.slane %v1461_v54, 1  ;;  %v1581_v27 = vrot.slane %v1461_v54, 2  ;;  %v1582_v13 = vrot.slane %v1461_v54, 3  ;;  %v1583_v60 = vrot.slane %v1461_v54, 4 }
 0x31a   :  { %1735 = vst [vmem:[#allocation1 + $0x3] ss:$9 sm:$0xff] %v1569_v3  ;;  %v2170_v41 = vmul.f32 %v2145_v8, %v2114_v47  ;;  %v1965_v1 = vmax.f32 %v1963_v29, %v1964_v22 }
 0x31b   :  { %1736 = vst [vmem:[#allocation1 + $0x4] ss:$9 sm:$0xff] %v1570_v56 }
 0x31c   :  { %v2245_v52 = vrot.slane %v2170_v41, 4  ;;  %v1966_v38 = vrot.slane %v1965_v1, 2 }
 0x31e   :  { %v2246_v2 = vsel %vm2231_vm4, %v2245_v52, %v2244_v30  ;;  %v1967_v51 = vmax.f32 %v1965_v1, %v1966_v38 }
 0x31f   :  { %v2292_v17 = vsel %vm852_vm6, 0.0, %v2246_v2 }
 0x320   :  { %v4307_v0 = vsel %vm360_vm0, %v2292_v17, 0.0  ;;  %v1968_v55 = vrot.slane %v1967_v51, 1 }
 0x321   :  { %v2316_v5 = vrot.slane %v4307_v0, 1  ;;  %v2348_v46 = vrot.slane %v4307_v0, 2 }
 0x322   :  { %v1737_v39 = vld [vmem:[#allocation1] sm:$0xff]  ;;  %v1969_v20 = vmax.f32 %v1967_v51, %v1968_v55 }
 0x323   :  { %1738 = vst [vmem:[#allocation1] ss:$9 sm:$0xff] %v1571_v7  ;;  %v1970_v26 = vsel %vm1878_vm1, %v1737_v39, -inf  ;;  %2326 = vrot.lane.b32.xlu0 %v2316_v5, %s2914_s21  ;;  %2358 = vrot.lane.b32.xlu2 %v2348_v46, %s2917_s26 }
 0x324   :  { %1739 = vst [vmem:[#allocation1 + $0x1] ss:$9 sm:$0xff] %v1572_v31  ;;  %v1971_v10 = vrot.slane %v1970_v26, 4  ;;  %v2115_v7 = vmax.f32 %v1969_v20, 0.0  ;;  %v1584_v31 = vrot.slane %v1461_v54, 5 }
 0x325   :  { %1740 = vst [vmem:[#allocation1 + $0x2] ss:$9 sm:$0xff] %v1458_v42  ;;  %v1463_v42 = vpop.f32.mrf.mxu2 }
 0x326   :  { %1741 = vst [vmem:[#allocation1 + $0x3] ss:$9 sm:$0xff] %v1573_v49  ;;  %v1972_v19 = vmax.f32 %v1970_v26, %v1971_v10  ;;  %v1464_v39 = vadd.f32 %v4204_v40, %v1463_v42  ;;  %v1585_v49 = vrot.slane %v1461_v54, 6  ;;  %v2171_v2 = vmul.f32 %v2146_v33, %v2115_v7 }
 0x327   :  { %1742 = vst [vmem:[#allocation1 + $0x4] ss:$9 sm:$0xff] %v1574_v9  ;;  %v1586_v9 = vrot.slane %v1461_v54, 7 }
 0x328   :  { %v1973_v61 = vrot.slane %v1972_v19, 2  ;;  %v1587_v26 = vrot.slane %v1464_v39, 1  ;;  %v2247_v10 = vrot.slane %v2171_v2, 7  ;;  %v1592_v25 = vrot.slane %v1464_v39, 6 }
 0x32a   :  { %v1974_v36 = vmax.f32 %v1972_v19, %v1973_v61  ;;  %v1590_v61 = vrot.slane %v1464_v39, 4 }
 0x32c   :  { %v1975_v43 = vrot.slane %v1974_v36, 1 }
 0x32e   :  { %v1743_v6 = vld [vmem:[#allocation1] sm:$0xff]  ;;  %v1976_v8 = vmax.f32 %v1974_v36, %v1975_v43  ;;  %v1466_v36 = vpop.f32.mrf.mxu2 }
 0x32f   :  { %1744 = vst [vmem:[#allocation1] ss:$9 sm:$0xff] %v1575_v44  ;;  %v1977_v4 = vsel %vm1878_vm1, %v1743_v6, -inf  ;;  %v1467_v51 = vadd.f32 %v4204_v40, %v1466_v36 }
 0x330   :  { %1745 = vst [vmem:[#allocation1 + $0x1] ss:$9 sm:$0xff] %v1576_v63  ;;  %v1978_v50 = vrot.slane %v1977_v4, 4  ;;  %v2116_v48 = vmax.f32 %v1976_v8, 0.0 }
 0x331   :  { %1746 = vst [vmem:[#allocation1 + $0x2] ss:$9 sm:$0xff] %v1577_v32  ;;  %v1588_v32 = vrot.slane %v1464_v39, 2  ;;  %v1597_v42 = vrot.slane %v1467_v51, 4  ;;  %v1598_v7 = vrot.slane %v1467_v51, 5 }
 0x332   :  { %1747 = vst [vmem:[#allocation1 + $0x3] ss:$9 sm:$0xff] %v1578_v14  ;;  %v1979_v53 = vmax.f32 %v1977_v4, %v1978_v50  ;;  %v2172_v12 = vmul.f32 %v2146_v33, %v2116_v48  ;;  %v1589_v4 = vrot.slane %v1464_v39, 3 }
 0x333   :  { %1748 = vst [vmem:[#allocation1 + $0x4] ss:$9 sm:$0xff] %v1579_v35 }
 0x334   :  { %v1980_v34 = vrot.slane %v1979_v53, 2  ;;  %v2248_v29 = vrot.slane %v2172_v12, 6  ;;  %v1600_v12 = vrot.slane %v1467_v51, 7 }
 0x336   :  { %v1981_v21 = vmax.f32 %v1979_v53, %v1980_v34  ;;  %v2249_v22 = vsel %vm2225_vm2, %v2248_v29, %v2247_v10  ;;  %v1591_v53 = vrot.slane %v1464_v39, 5 }
 0x338   :  { %v1982_v3 = vrot.slane %v1981_v21, 1 }
 0x33a   :  { %v1749_v59 = vld [vmem:[#allocation1] sm:$0xff]  ;;  %v1983_v45 = vmax.f32 %v1981_v21, %v1982_v3 }
 0x33b   :  { %1750 = vst [vmem:[#allocation1] ss:$9 sm:$0xff] %v1461_v54  ;;  %v1984_v56 = vsel %vm1878_vm1, %v1749_v59, -inf }
 0x33c   :  { %1751 = vst [vmem:[#allocation1 + $0x1] ss:$9 sm:$0xff] %v1580_v37  ;;  %v1985_v28 = vrot.slane %v1984_v56, 4  ;;  %v2117_v47 = vmax.f32 %v1983_v45, 0.0  ;;  %v1593_v37 = vrot.slane %v1464_v39, 7 }
 0x33d   :  { %1752 = vst [vmem:[#allocation1 + $0x2] ss:$9 sm:$0xff] %v1581_v27  ;;  %v1594_v27 = vrot.slane %v1467_v51, 1 }
 0x33e   :  { %1753 = vst [vmem:[#allocation1 + $0x3] ss:$9 sm:$0xff] %v1582_v13  ;;  %v1986_v16 = vmax.f32 %v1984_v56, %v1985_v28  ;;  %v2173_v52 = vmul.f32 %v2146_v33, %v2117_v47  ;;  %v1595_v56 = vrot.slane %v1467_v51, 2 }
 0x33f   :  { %1754 = vst [vmem:[#allocation1 + $0x4] ss:$9 sm:$0xff] %v1583_v60  ;;  %v1596_v60 = vrot.slane %v1467_v51, 3 }
 0x340   :  { %v1987_v57 = vrot.slane %v1986_v16, 2  ;;  %v2250_v5 = vrot.slane %v2173_v52, 5 }
 0x342   :  { %v1988_v11 = vmax.f32 %v1986_v16, %v1987_v57  ;;  %v2251_v19 = vsel %vm2228_vm3, %v2250_v5, %v2249_v22 }
 0x344   :  { %v1989_v41 = vrot.slane %v1988_v11, 1 }
 0x346   :  { %v1755_v62 = vld [vmem:[#allocation1] sm:$0xff]  ;;  %v1990_v30 = vmax.f32 %v1988_v11, %v1989_v41  ;;  %v1469_v11 = vpop.f32.mrf.mxu3 }
 0x347   :  { %1756 = vst [vmem:[#allocation1] ss:$9 sm:$0xff] %v1584_v31  ;;  %v1991_v34 = vsel %vm1878_vm1, %v1755_v62, -inf  ;;  %v1470_v52 = vadd.f32 %v4204_v40, %v1469_v11 }
 0x348   :  { %1757 = vst [vmem:[#allocation1 + $0x1] ss:$9 sm:$0xff] %v1585_v49  ;;  %v2118_v17 = vmax.f32 %v1990_v30, 0.0  ;;  %v1992_v21 = vrot.slane %v1991_v34, 4 }
 0x349   :  { %1758 = vst [vmem:[#allocation1 + $0x2] ss:$9 sm:$0xff] %v1586_v9 }
 0x34a   :  { %1759 = vst [vmem:[#allocation1 + $0x3] ss:$9 sm:$0xff] %v1464_v39  ;;  %v2174_v46 = vmul.f32 %v2146_v33, %v2118_v17  ;;  %v1993_v3 = vmax.f32 %v1991_v34, %v1992_v21  ;;  %v1599_v39 = vrot.slane %v1467_v51, 6 }
 0x34b   :  { %1760 = vst [vmem:[#allocation1 + $0x4] ss:$9 sm:$0xff] %v1587_v26  ;;  %v2139_v26 = vrot.slane %v4243_v23, 4 }
 0x34c   :  { %v2252_v44 = vrot.slane %v2174_v46, 4  ;;  %v1994_v8 = vrot.slane %v1993_v3, 2 }
 0x34d   :  { %v2147_v22 = vperm.slane %v2139_v26, 0 }
 0x34e   :  { %v2253_v63 = vsel %vm2231_vm4, %v2252_v44, %v2251_v19  ;;  %v1995_v18 = vmax.f32 %v1993_v3, %v1994_v8  ;;  %v4344_v3 = vld [vmem:[%s4588_s3] ss:$0 sm:$0xff] }
 0x34f   :  { %v2293_v6 = vsel %vm852_vm6, 0.0, %v2253_v63  ;;  %v1601_v63 = vrot.slane %v1470_v52, 1 }
 0x350   :  { %v4324_v1 = vsel %vm360_vm0, %v2293_v6, 0.0  ;;  %v1996_v31 = vrot.slane %v1995_v18, 1 }
 0x351   :  { %v2317_v50 = vrot.slane %v4324_v1, 1  ;;  %v2349_v35 = vrot.slane %v4324_v1, 2 }
 0x352   :  { %v1761_v14 = vld [vmem:[#allocation1] sm:$0xff]  ;;  %v1997_v30 = vmax.f32 %v1995_v18, %v1996_v31 }
 0x353   :  { %1762 = vst [vmem:[#allocation1] ss:$9 sm:$0xff] %v1588_v32  ;;  %2328 = vrot.lane.b32.xlu1 %v2317_v50, %s2914_s21  ;;  %2360 = vrot.lane.b32.xlu0 %v2349_v35, %s2917_s26  ;;  %v1998_v38 = vsel %vm1878_vm1, %v1761_v14, -inf  ;;  %v1602_v32 = vrot.slane %v1470_v52, 2  ;;  %v1603_v50 = vrot.slane %v1470_v52, 3  ;;  %v1604_v35 = vrot.slane %v1470_v52, 4 }
 0x354   :  { %1763 = vst [vmem:[#allocation1 + $0x1] ss:$9 sm:$0xff] %v1589_v4  ;;  %v1999_v54 = vrot.slane %v1998_v38, 4  ;;  %v2119_v10 = vmax.f32 %v1997_v30, 0.0 }
 0x355   :  { %1764 = vst [vmem:[#allocation1 + $0x2] ss:$9 sm:$0xff] %v1590_v61 }
 0x356   :  { %1765 = vst [vmem:[#allocation1 + $0x3] ss:$9 sm:$0xff] %v1591_v53  ;;  %v2000_v43 = vmax.f32 %v1998_v38, %v1999_v54  ;;  %v2175_v14 = vmul.f32 %v2147_v22, %v2119_v10 }
 0x357   :  { %1766 = vst [vmem:[#allocation1 + $0x4] ss:$9 sm:$0xff] %v1592_v25  ;;  %v1605_v25 = vrot.slane %v1470_v52, 5 }
 0x358   :  { %v2001_v13 = vrot.slane %v2000_v43, 2  ;;  %v2254_v36 = vrot.slane %v2175_v14, 7 }
 0x35a   :  { %v2002_v16 = vmax.f32 %v2000_v43, %v2001_v13 }
 0x35c   :  { %v2003_v48 = vrot.slane %v2002_v16, 1 }
 0x35e   :  { %v1767_v59 = vld [vmem:[#allocation1] sm:$0xff]  ;;  %v2004_v49 = vmax.f32 %v2002_v16, %v2003_v48 }
 0x35f   :  { %1768 = vst [vmem:[#allocation1] ss:$9 sm:$0xff] %v1593_v37  ;;  %v2005_v55 = vsel %vm1878_vm1, %v1767_v59, -inf }
 0x360   :  { %1769 = vst [vmem:[#allocation1 + $0x1] ss:$9 sm:$0xff] %v1467_v51  ;;  %v2006_v28 = vrot.slane %v2005_v55, 4  ;;  %v2120_v29 = vmax.f32 %v2004_v49, 0.0  ;;  %v1472_v51 = vpop.f32.mrf.mxu3 }
 0x361   :  { %1770 = vst [vmem:[#allocation1 + $0x2] ss:$9 sm:$0xff] %v1594_v27  ;;  %v1473_v27 = vadd.f32 %v4344_v3, %v1472_v51 }
 0x362   :  { %1771 = vst [vmem:[#allocation1 + $0x3] ss:$9 sm:$0xff] %v1595_v56  ;;  %v2007_v45 = vmax.f32 %v2005_v55, %v2006_v28  ;;  %v2176_v19 = vmul.f32 %v2147_v22, %v2120_v29  ;;  %v1606_v56 = vrot.slane %v1470_v52, 6 }
 0x363   :  { %1772 = vst [vmem:[#allocation1 + $0x4] ss:$9 sm:$0xff] %v1596_v60  ;;  %v1607_v60 = vrot.slane %v1470_v52, 7  ;;  %v1609_v16 = vrot.slane %v1473_v27, 2  ;;  %v1611_v11 = vrot.slane %v1473_v27, 4  ;;  %v1612_v31 = vrot.slane %v1473_v27, 5 }
 0x364   :  { %v2008_v20 = vrot.slane %v2007_v45, 2  ;;  %v2255_v53 = vrot.slane %v2176_v19, 6 }
 0x366   :  { %v2009_v57 = vmax.f32 %v2007_v45, %v2008_v20  ;;  %v2256_v54 = vsel %vm2225_vm2, %v2255_v53, %v2254_v36  ;;  %v1608_v45 = vrot.slane %v1473_v27, 1  ;;  %v2140_v53 = vrot.slane %v4243_v23, 5 }
 0x368   :  { %v2010_v47 = vrot.slane %v2009_v57, 1  ;;  %v1475_v30 = vpop.f32.mrf.mxu3  ;;  %v2148_v51 = vperm.slane %v2140_v53, 0  ;;  %v2399_v53 = vld [vmem:[%s4591_s6 + $0x28] sm:$0xff] }
 0x369   :  { %2450 = vmatpush.msra.mxu1 %v2399_v53 }
 0x36a   :  { %v1773_v33 = vld [vmem:[#allocation1] sm:$0xff]  ;;  %v2011_v9 = vmax.f32 %v2009_v57, %v2010_v47  ;;  %v1610_v47 = vrot.slane %v1473_v27, 3 }
 0x36b   :  { %1774 = vst [vmem:[#allocation1] ss:$9 sm:$0xff] %v1597_v42  ;;  %v2012_v41 = vsel %vm1878_vm1, %v1773_v33, -inf }
 0x36c   :  { %1775 = vst [vmem:[#allocation1 + $0x1] ss:$9 sm:$0xff] %v1598_v7  ;;  %v2013_v62 = vrot.slane %v2012_v41, 4  ;;  %v2121_v5 = vmax.f32 %v2011_v9, 0.0 }
 0x36d   :  { %1776 = vst [vmem:[#allocation1 + $0x2] ss:$9 sm:$0xff] %v1599_v39 }
 0x36e   :  { %1777 = vst [vmem:[#allocation1 + $0x3] ss:$9 sm:$0xff] %v1600_v12  ;;  %v2014_v2 = vmax.f32 %v2012_v41, %v2013_v62  ;;  %v2177_v6 = vmul.f32 %v2147_v22, %v2121_v5  ;;  %v1613_v41 = vrot.slane %v1473_v27, 6  ;;  %v1614_v62 = vrot.slane %v1473_v27, 7 }
 0x36f   :  { %1778 = vst [vmem:[#allocation1 + $0x4] ss:$9 sm:$0xff] %v1470_v52 }
 0x370   :  { %v2015_v17 = vrot.slane %v2014_v2, 2  ;;  %v2257_v38 = vrot.slane %v2177_v6, 5  ;;  %v1478_v36 = vpop.f32.mrf.mxu3 }
 0x372   :  { %v2016_v46 = vmax.f32 %v2014_v2, %v2015_v17  ;;  %v2258_v43 = vsel %vm2228_vm3, %v2257_v38, %v2256_v54  ;;  %v1476_v17 = vadd.f32 %v4344_v3, %v1475_v30 }
 0x374   :  { %v2017_v44 = vrot.slane %v2016_v46, 1  ;;  %v1618_v14 = vrot.slane %v1476_v17, 4 }
 0x376   :  { %v1779_v40 = vld [vmem:[#allocation1] sm:$0xff]  ;;  %v2018_v4 = vmax.f32 %v2016_v46, %v2017_v44 }
 0x377   :  { %1780 = vst [vmem:[#allocation1] ss:$9 sm:$0xff] %v1601_v63  ;;  %v2019_v18 = vsel %vm1878_vm1, %v1779_v40, -inf  ;;  %v1616_v63 = vrot.slane %v1476_v17, 2 }
 0x378   :  { %1781 = vst [vmem:[#allocation1 + $0x1] ss:$9 sm:$0xff] %v1602_v32  ;;  %v2122_v61 = vmax.f32 %v2018_v4, 0.0  ;;  %v2020_v48 = vrot.slane %v2019_v18, 4  ;;  %v1617_v32 = vrot.slane %v1476_v17, 3 }
 0x379   :  { %1782 = vst [vmem:[#allocation1 + $0x2] ss:$9 sm:$0xff] %v1603_v50 }
 0x37a   :  { %1783 = vst [vmem:[#allocation1 + $0x3] ss:$9 sm:$0xff] %v1604_v35  ;;  %v2178_v34 = vmul.f32 %v2147_v22, %v2122_v61  ;;  %v2021_v33 = vmax.f32 %v2019_v18, %v2020_v48  ;;  %v1615_v22 = vrot.slane %v1476_v17, 1 }
 0x37b   :  { %1784 = vst [vmem:[#allocation1 + $0x4] ss:$9 sm:$0xff] %v1605_v25 }
 0x37c   :  { %v2259_v21 = vrot.slane %v2178_v34, 4  ;;  %v2022_v52 = vrot.slane %v2021_v33, 2 }
 0x37e   :  { %v2260_v37 = vsel %vm2231_vm4, %v2259_v21, %v2258_v43  ;;  %v2023_v29 = vmax.f32 %v2021_v33, %v2022_v52 }
 0x37f   :  { %v2294_v59 = vsel %vm852_vm6, 0.0, %v2260_v37 }
 0x380   :  { %v4348_v55 = vsel %vm360_vm0, %v2294_v59, 0.0  ;;  %v2024_v19 = vrot.slane %v2023_v29, 1  ;;  %v1619_v59 = vrot.slane %v1476_v17, 5 }
 0x381   :  { %v2318_v13 = vrot.slane %v4348_v55, 1  ;;  %v2350_v28 = vrot.slane %v4348_v55, 2 }
 0x382   :  { %v1785_v8 = vld [vmem:[#allocation1] sm:$0xff]  ;;  %v2025_v35 = vmax.f32 %v2023_v29, %v2024_v19  ;;  %v1481_v29 = vpop.f32.mrf.mxu3 }
 0x383   :  { %2330 = vrot.lane.b32.xlu1 %v2318_v13, %s2914_s21  ;;  %2362 = vrot.lane.b32.xlu0 %v2350_v28, %s2917_s26  ;;  %1786 = vst [vmem:[#allocation1] ss:$9 sm:$0xff] %v1606_v56  ;;  %v2026_v20 = vsel %vm1878_vm1, %v1785_v8, -inf  ;;  %v1620_v13 = vrot.slane %v1476_v17, 6 }
 0x384   :  { %1787 = vst [vmem:[#allocation1 + $0x1] ss:$9 sm:$0xff] %v1607_v60  ;;  %v2027_v57 = vrot.slane %v2026_v20, 4  ;;  %v2123_v21 = vmax.f32 %v2025_v35, 0.0 }
 0x385   :  { %1788 = vst [vmem:[#allocation1 + $0x2] ss:$9 sm:$0xff] %v1473_v27  ;;  %v1479_v27 = vadd.f32 %v4344_v3, %v1478_v36  ;;  %v2397_v36 = vld [vmem:[%s4591_s6 + $0x18] sm:$0xff] }
 0x386   :  { %1789 = vst [vmem:[#allocation1 + $0x3] ss:$9 sm:$0xff] %v1608_v45  ;;  %v2028_v42 = vmax.f32 %v2026_v20, %v2027_v57  ;;  %v2179_v60 = vmul.f32 %v2148_v51, %v2123_v21  ;;  %v1621_v45 = vrot.slane %v1476_v17, 7 }
 0x387   :  { %1790 = vst [vmem:[#allocation1 + $0x4] ss:$9 sm:$0xff] %v1609_v16  ;;  %v1622_v18 = vrot.slane %v1479_v27, 1  ;;  %v1626_v30 = vrot.slane %v1479_v27, 5 }
 0x388   :  { %v2029_v12 = vrot.slane %v2028_v42, 2 }
 0x38a   :  { %v2030_v2 = vmax.f32 %v2028_v42, %v2029_v12  ;;  %v2261_v42 = vrot.slane %v2179_v60, 7 }
 0x38c   :  { %v2031_v46 = vrot.slane %v2030_v2, 1 }
 0x38e   :  { %v1791_v7 = vld [vmem:[#allocation1] sm:$0xff]  ;;  %v2032_v40 = vmax.f32 %v2030_v2, %v2031_v46  ;;  %v1627_v2 = vrot.slane %v1479_v27, 6 }
 0x38f   :  { %1792 = vst [vmem:[#allocation1] ss:$9 sm:$0xff] %v1610_v47  ;;  %v2033_v39 = vsel %vm1878_vm1, %v1791_v7, -inf }
 0x390   :  { %1793 = vst [vmem:[#allocation1 + $0x1] ss:$9 sm:$0xff] %v1611_v11  ;;  %v2034_v49 = vrot.slane %v2033_v39, 4  ;;  %v2124_v38 = vmax.f32 %v2032_v40, 0.0 }
 0x391   :  { %1794 = vst [vmem:[#allocation1 + $0x2] ss:$9 sm:$0xff] %v1612_v31 }
 0x392   :  { %1795 = vst [vmem:[#allocation1 + $0x3] ss:$9 sm:$0xff] %v1613_v41  ;;  %v2035_v9 = vmax.f32 %v2033_v39, %v2034_v49  ;;  %v2180_v37 = vmul.f32 %v2148_v51, %v2124_v38  ;;  %v1623_v41 = vrot.slane %v1479_v27, 2 }
 0x393   :  { %1796 = vst [vmem:[#allocation1 + $0x4] ss:$9 sm:$0xff] %v1614_v62  ;;  %v1624_v62 = vrot.slane %v1479_v27, 3 }
 0x394   :  { %v2036_v26 = vrot.slane %v2035_v9, 2  ;;  %v2262_v20 = vrot.slane %v2180_v37, 6 }
 0x396   :  { %v2037_v5 = vmax.f32 %v2035_v9, %v2036_v26  ;;  %v2263_v47 = vsel %vm2225_vm2, %v2262_v20, %v2261_v42  ;;  %v1625_v9 = vrot.slane %v1479_v27, 4 }
 0x398   :  { %v2038_v10 = vrot.slane %v2037_v5, 1 }
 0x39a   :  { %v1797_v44 = vld [vmem:[#allocation1] sm:$0xff]  ;;  %v2039_v50 = vmax.f32 %v2037_v5, %v2038_v10  ;;  %v1482_v10 = vadd.f32 %v4344_v3, %v1481_v29 }
 0x39b   :  { %v2040_v6 = vsel %vm1878_vm1, %v1797_v44, -inf  ;;  %1798 = vst [vmem:[#allocation1] ss:$9 sm:$0xff] %v1476_v17  ;;  %v1628_v44 = vrot.slane %v1479_v27, 7 }
 0x39c   :  { %v2041_v4 = vrot.slane %v2040_v6, 4  ;;  %1799 = vst [vmem:[#allocation1 + $0x1] ss:$9 sm:$0xff] %v1615_v22  ;;  %v2125_v34 = vmax.f32 %v2039_v50, 0.0  ;;  %v1630_v40 = vrot.slane %v1482_v10, 2  ;;  %v1631_v50 = vrot.slane %v1482_v10, 3 }
 0x39d   :  { %1800 = vst [vmem:[#allocation1 + $0x2] ss:$9 sm:$0xff] %v1616_v63  ;;  %v1632_v37 = vrot.slane %v1482_v10, 4  ;;  %v1635_v20 = vrot.slane %v1482_v10, 7 }
 0x39e   :  { %v2042_v61 = vmax.f32 %v2040_v6, %v2041_v4  ;;  %1801 = vst [vmem:[#allocation1 + $0x3] ss:$9 sm:$0xff] %v1617_v32  ;;  %v2181_v56 = vmul.f32 %v2148_v51, %v2125_v34  ;;  %v1629_v6 = vrot.slane %v1482_v10, 1 }
 0x39f   :  { %1802 = vst [vmem:[#allocation1 + $0x4] ss:$9 sm:$0xff] %v1618_v14 }
 0x3a0   :  { %v2043_v25 = vrot.slane %v2042_v61, 2  ;;  %v2264_v57 = vrot.slane %v2181_v56, 5  ;;  %v1633_v56 = vrot.slane %v1482_v10, 5 }
 0x3a2   :  { %v2044_v54 = vmax.f32 %v2042_v61, %v2043_v25  ;;  %v2265_v7 = vsel %vm2228_vm3, %v2264_v57, %v2263_v47  ;;  %v2398_v25 = vld [vmem:[%s4591_s6 + $0x20] sm:$0xff] }
 0x3a3   :  { %2451 = vmatpush.msra.mxu1 %v2398_v25 }
 0x3a4   :  { %v2045_v43 = vrot.slane %v2044_v54, 1 }
 0x3a5   :  { %2452 = vmatpush.msra.mxu1 %v2397_v36 }
 0x3a6   :  { %v2046_v28 = vmax.f32 %v2044_v54, %v2045_v43  ;;  %v1803_v8 = vld [vmem:[#allocation1] sm:$0xff] }
 0x3a7   :  { %1804 = vst [vmem:[#allocation1] ss:$9 sm:$0xff] %v1619_v59  ;;  %v2047_v17 = vsel %vm1878_vm1, %v1803_v8, -inf  ;;  %v1634_v8 = vrot.slane %v1482_v10, 6 }
 0x3a8   :  { %v2126_v16 = vmax.f32 %v2046_v28, 0.0  ;;  %1805 = vst [vmem:[#allocation1 + $0x1] ss:$9 sm:$0xff] %v1620_v13  ;;  %v2048_v46 = vrot.slane %v2047_v17, 4  ;;  %v1484_v13 = vpop.f32.mrf.mxu3 }
 0x3a9   :  { %1806 = vst [vmem:[#allocation1 + $0x2] ss:$9 sm:$0xff] %v1621_v45 }
 0x3aa   :  { %v2182_v48 = vmul.f32 %v2148_v51, %v2126_v16  ;;  %1807 = vst [vmem:[#allocation1 + $0x3] ss:$9 sm:$0xff] %v1479_v27  ;;  %v2049_v63 = vmax.f32 %v2047_v17, %v2048_v46  ;;  %v2396_v51 = vld [vmem:[%s4591_s6 + $0x10] sm:$0xff]  ;;  %v2395_v27 = vld [vmem:[%s4591_s6 + $0x8] sm:$0xff]  ;;  %v2394_v16 = vld [vmem:[%s4591_s6] sm:$0xff] }
 0x3ab   :  { %1808 = vst [vmem:[#allocation1 + $0x4] ss:$9 sm:$0xff] %v1622_v18  ;;  %2453 = vmatpush.msra.mxu1 %v2396_v51 }
 0x3ac   :  { %v2266_v11 = vrot.slane %v2182_v48, 4  ;;  %v2050_v35 = vrot.slane %v2049_v63, 2  ;;  %v1485_v48 = vadd.f32 %v4344_v3, %v1484_v13 }
 0x3ad   :  { %2454 = vmatpush.msra.mxu1 %v2395_v27  ;;  %v2327_v27 = vpop.permute.xlu0 %2326 }
 0x3ae   :  { %v2267_v33 = vsel %vm2231_vm4, %v2266_v11, %v2265_v7  ;;  %v2051_v54 = vmax.f32 %v2049_v63, %v2050_v35  ;;  %v2141_v7 = vrot.slane %v4243_v23, 6  ;;  %v1638_v46 = vrot.slane %v1485_v48, 3 }
 0x3af   :  { %v2295_v31 = vsel %vm852_vm6, 0.0, %v2267_v33  ;;  %2455 = vmatpush.msra.mxu1 %v2394_v16  ;;  %v1641_v36 = vrot.slane %v1485_v48, 6  ;;  %v1642_v51 = vrot.slane %v1485_v48, 7 }
 0x3b0   :  { %v4366_v39 = vsel %vm360_vm0, %v2295_v31, 0.0  ;;  %v2052_v60 = vrot.slane %v2051_v54, 1 }
 0x3b1   :  { %v2351_v12 = vrot.slane %v4366_v39, 2  ;;  %v2319_v49 = vrot.slane %v4366_v39, 1 }
 0x3b2   :  { %v1809_v52 = vld [vmem:[#allocation1] sm:$0xff]  ;;  %v2053_v47 = vmax.f32 %v2051_v54, %v2052_v60 }
 0x3b3   :  { %2364 = vrot.lane.b32.xlu1 %v2351_v12, %s2917_s26  ;;  %2332 = vrot.lane.b32.xlu2 %v2319_v49, %s2914_s21  ;;  %1810 = vst [vmem:[#allocation1] ss:$9 sm:$0xff] %v1623_v41  ;;  %v2054_v26 = vsel %vm1878_vm1, %v1809_v52, -inf }
 0x3b4   :  { %1811 = vst [vmem:[#allocation1 + $0x1] ss:$9 sm:$0xff] %v1624_v62  ;;  %v2055_v5 = vrot.slane %v2054_v26, 4  ;;  %v2127_v49 = vmax.f32 %v2053_v47, 0.0  ;;  %v2149_v62 = vperm.slane %v2141_v7, 0 }
 0x3b5   :  { %1812 = vst [vmem:[#allocation1 + $0x2] ss:$9 sm:$0xff] %v1625_v9 }
 0x3b6   :  { %1813 = vst [vmem:[#allocation1 + $0x3] ss:$9 sm:$0xff] %v1626_v30  ;;  %v2056_v22 = vmax.f32 %v2054_v26, %v2055_v5  ;;  %v1636_v30 = vrot.slane %v1485_v48, 1  ;;  %v1637_v26 = vrot.slane %v1485_v48, 2  ;;  %v2183_v29 = vmul.f32 %v2149_v62, %v2127_v49 }
 0x3b7   :  { %1814 = vst [vmem:[#allocation1 + $0x4] ss:$9 sm:$0xff] %v1627_v2 }
 0x3b8   :  { %v2057_v4 = vrot.slane %v2056_v22, 2 }
 0x3ba   :  { %v2058_v38 = vmax.f32 %v2056_v22, %v2057_v4 }
 0x3bc   :  { %v2059_v43 = vrot.slane %v2058_v38, 1 }
 0x3be   :  { %v1815_v19 = vld [vmem:[#allocation1] sm:$0xff]  ;;  %v2060_v18 = vmax.f32 %v2058_v38, %v2059_v43  ;;  %v4404_v38 = vpop.permute.xlu2 %2324 }
 0x3bf   :  { %1816 = vst [vmem:[#allocation1] ss:$9 sm:$0xff] %v1628_v44  ;;  %v2061_v32 = vsel %vm1878_vm1, %v1815_v19, -inf  ;;  %v1640_v19 = vrot.slane %v1485_v48, 5 }
 0x3c0   :  { %1817 = vst [vmem:[#allocation1 + $0x1] ss:$9 sm:$0xff] %v1482_v10  ;;  %v2062_v14 = vrot.slane %v2061_v32, 4  ;;  %v2128_v31 = vmax.f32 %v2060_v18, 0.0  ;;  %v1639_v10 = vrot.slane %v1485_v48, 4 }
 0x3c1   :  { %1818 = vst [vmem:[#allocation1 + $0x2] ss:$9 sm:$0xff] %v1629_v6  ;;  %v4397_v6 = vpop.permute.xlu1 %2322 }
 0x3c2   :  { %1819 = vst [vmem:[#allocation1 + $0x3] ss:$9 sm:$0xff] %v1630_v40  ;;  %v2063_v61 = vmax.f32 %v2061_v32, %v2062_v14  ;;  %v2184_v9 = vmul.f32 %v2149_v62, %v2128_v31  ;;  %v2268_v40 = vrot.slane %v2183_v29, 7  ;;  %v2380_v31 = vsel %vm1128_vm10, %v4307_v0, %v2327_v27 }
 0x3c3   :  { %1820 = vst [vmem:[#allocation1 + $0x4] ss:$9 sm:$0xff] %v1631_v50  ;;  %v1487_v50 = vpop.f32.mrf.mxu3 }
 0x3c4   :  { %v2064_v34 = vrot.slane %v2063_v61, 2  ;;  %v2269_v44 = vrot.slane %v2184_v9, 6  ;;  %v1488_v25 = vadd.f32 %v4344_v3, %v1487_v50 }
 0x3c5   :  { %v2361_v18 = vpop.permute.xlu0 %2360 }
 0x3c6   :  { %v2065_v21 = vmax.f32 %v2063_v61, %v2064_v34  ;;  %v2270_v4 = vsel %vm2225_vm2, %v2269_v44, %v2268_v40  ;;  %v1644_v3 = vrot.slane %v1488_v25, 2  ;;  %v2357_v60 = vpop.permute.xlu2 %2356  ;;  %v1647_v47 = vrot.slane %v1488_v25, 5 }
 0x3c7   :  { %v1649_v49 = vrot.slane %v1488_v25, 7  ;;  %v2378_v44 = vsel %vm1128_vm10, %v4264_v24, %v4397_v6  ;;  %v2142_v6 = vrot.slane %v4243_v23, 7 }
 0x3c8   :  { %v2066_v59 = vrot.slane %v2065_v21, 1 }
 0x3ca   :  { %v1821_v28 = vld [vmem:[#allocation1] sm:$0xff]  ;;  %v2067_v42 = vmax.f32 %v2065_v21, %v2066_v59  ;;  %v2355_v59 = vpop.permute.xlu1 %2354 }
 0x3cb   :  { %v2068_v45 = vsel %vm1878_vm1, %v1821_v28, -inf  ;;  %1822 = vst [vmem:[#allocation1] ss:$9 sm:$0xff] %v1632_v37  ;;  %v1643_v37 = vrot.slane %v1488_v25, 1 }
 0x3cc   :  { %v2069_v57 = vrot.slane %v2068_v45, 4  ;;  %1823 = vst [vmem:[#allocation1 + $0x1] ss:$9 sm:$0xff] %v1633_v56  ;;  %v2129_v41 = vmax.f32 %v2067_v42, 0.0 }
 0x3cd   :  { %1824 = vst [vmem:[#allocation1 + $0x2] ss:$9 sm:$0xff] %v1634_v8 }
 0x3ce   :  { %v2070_v11 = vmax.f32 %v2068_v45, %v2069_v57  ;;  %1825 = vst [vmem:[#allocation1 + $0x3] ss:$9 sm:$0xff] %v1635_v20  ;;  %v2185_v2 = vmul.f32 %v2149_v62, %v2129_v41  ;;  %v1645_v20 = vrot.slane %v1488_v25, 3  ;;  %v1646_v57 = vrot.slane %v1488_v25, 4 }
 0x3cf   :  { %1826 = vst [vmem:[#allocation1 + $0x4] ss:$9 sm:$0xff] %v1485_v48 }
 0x3d0   :  { %v2071_v33 = vrot.slane %v2070_v11, 2  ;;  %v2271_v63 = vrot.slane %v2185_v2, 5 }
 0x3d2   :  { %v2072_v12 = vmax.f32 %v2070_v11, %v2071_v33  ;;  %v2272_v35 = vsel %vm2228_vm3, %v2271_v63, %v2270_v4  ;;  %v2329_v45 = vpop.permute.xlu1 %2328  ;;  %v1648_v33 = vrot.slane %v1488_v25, 6  ;;  %v2386_v63 = vsel %vm1228_vm14, %v2378_v44, %v2355_v59 }
 0x3d3   :  { %v2381_v11 = vsel %vm1128_vm10, %v4324_v1, %v2329_v45 }
 0x3d4   :  { %v2073_v52 = vrot.slane %v2072_v12, 1 }
 0x3d6   :  { %v2074_v17 = vmax.f32 %v2072_v12, %v2073_v52  ;;  %v1827_v5 = vld [vmem:[#allocation1] sm:$0xff]  ;;  %v2389_v52 = vsel %vm1228_vm14, %v2381_v11, %v2361_v18 }
 0x3d7   :  { %1828 = vst [vmem:[#allocation1] ss:$9 sm:$0xff] %v1636_v30  ;;  %v2075_v13 = vsel %vm1878_vm1, %v1827_v5, -inf }
 0x3d8   :  { %v2130_v22 = vmax.f32 %v2074_v17, 0.0  ;;  %1829 = vst [vmem:[#allocation1 + $0x1] ss:$9 sm:$0xff] %v1637_v26  ;;  %v2076_v8 = vrot.slane %v2075_v13, 4 }
 0x3d9   :  { %1830 = vst [vmem:[#allocation1 + $0x2] ss:$9 sm:$0xff] %v1638_v46 }
 0x3da   :  { %v2186_v32 = vmul.f32 %v2149_v62, %v2130_v22  ;;  %1831 = vst [vmem:[#allocation1 + $0x3] ss:$9 sm:$0xff] %v1639_v10  ;;  %v2077_v42 = vmax.f32 %v2075_v13, %v2076_v8  ;;  %v2359_v62 = vpop.permute.xlu2 %2358 }
 0x3db   :  { %1832 = vst [vmem:[#allocation1 + $0x4] ss:$9 sm:$0xff] %v1640_v19  ;;  %v2388_v2 = vsel %vm1228_vm14, %v2380_v31, %v2359_v62 }
 0x3dc   :  { %v2273_v14 = vrot.slane %v2186_v32, 4  ;;  %v2078_v9 = vrot.slane %v2077_v42, 2  ;;  %v2379_v32 = vsel %vm1128_vm10, %v4290_v15, %v4404_v38 }
 0x3de   :  { %v2274_v61 = vsel %vm2231_vm4, %v2273_v14, %v2272_v35  ;;  %v2079_v29 = vmax.f32 %v2077_v42, %v2078_v9  ;;  %v2387_v14 = vsel %vm1228_vm14, %v2379_v32, %v2357_v60 }
 0x3df   :  { %v2296_v53 = vsel %vm852_vm6, 0.0, %v2274_v61 }
 0x3e0   :  { %v4407_v34 = vsel %vm360_vm0, %v2296_v53, 0.0  ;;  %v2080_v4 = vrot.slane %v2079_v29, 1 }
 0x3e1   :  { %v2352_v54 = vrot.slane %v4407_v34, 2  ;;  %v2320_v21 = vrot.slane %v4407_v34, 1 }
 0x3e2   :  { %v1833_v43 = vld [vmem:[#allocation1] sm:$0xff]  ;;  %v2081_v53 = vmax.f32 %v2079_v29, %v2080_v4 }
 0x3e3   :  { %2366 = vrot.lane.b32.xlu1 %v2352_v54, %s2917_s26  ;;  %2334 = vrot.lane.b32.xlu2 %v2320_v21, %s2914_s21  ;;  %1834 = vst [vmem:[#allocation1] ss:$9 sm:$0xff] %v1641_v36  ;;  %v2082_v56 = vsel %vm1878_vm1, %v1833_v43, -inf  ;;  %v2150_v21 = vperm.slane %v2142_v6, 0 }
 0x3e4   :  { %1835 = vst [vmem:[#allocation1 + $0x1] ss:$9 sm:$0xff] %v1642_v51  ;;  %v2083_v28 = vrot.slane %v2082_v56, 4  ;;  %v2131_v38 = vmax.f32 %v2081_v53, 0.0 }
 0x3e5   :  { %1836 = vst [vmem:[#allocation1 + $0x2] ss:$9 sm:$0xff] %v1488_v25 }
 0x3e6   :  { %1837 = vst [vmem:[#allocation1 + $0x3] ss:$9 sm:$0xff] %v1643_v37  ;;  %v2084_v16 = vmax.f32 %v2082_v56, %v2083_v28  ;;  %v2187_v27 = vmul.f32 %v2150_v21, %v2131_v38 }
 0x3e7   :  { %1838 = vst [vmem:[#allocation1 + $0x4] ss:$9 sm:$0xff] %v1644_v3 }
 0x3e8   :  { %v2085_v41 = vrot.slane %v2084_v16, 2  ;;  %v2275_v8 = vrot.slane %v2187_v27, 7 }
 0x3ea   :  { %v2086_v1 = vmax.f32 %v2084_v16, %v2085_v41 }
 0x3ec   :  { %v2087_v22 = vrot.slane %v2086_v1, 1 }
 0x3ee   :  { %v1839_v48 = vld [vmem:[#allocation1] sm:$0xff]  ;;  %v2088_v50 = vmax.f32 %v2086_v1, %v2087_v22 }
 0x3ef   :  { %1840 = vst [vmem:[#allocation1] ss:$9 sm:$0xff] %v1645_v20  ;;  %v2089_v7 = vsel %vm1878_vm1, %v1839_v48, -inf }
 0x3f0   :  { %1841 = vst [vmem:[#allocation1 + $0x1] ss:$9 sm:$0xff] %v1646_v57  ;;  %v2090_v12 = vrot.slane %v2089_v7, 4  ;;  %v2132_v36 = vmax.f32 %v2088_v50, 0.0  ;;  %v2879_v50 = vld [vmem:[%s4594_s9] ss:$0 sm:$0xff] }
 0x3f1   :  { %1842 = vst [vmem:[#allocation1 + $0x2] ss:$9 sm:$0xff] %v1647_v47 }
 0x3f2   :  { %1843 = vst [vmem:[#allocation1 + $0x3] ss:$9 sm:$0xff] %v1648_v33  ;;  %v2091_v30 = vmax.f32 %v2089_v7, %v2090_v12  ;;  %v2188_v37 = vmul.f32 %v2150_v21, %v2132_v36 }
 0x3f3   :  { %1844 = vst [vmem:[#allocation1 + $0x4] ss:$9 sm:$0xff] %v1649_v49 }
 0x3f4   :  { %2416 = vst [vmem:[#allocation1 + $0x10] ss:$2 sm:$0xff] %v2388_v2  ;;  %v2092_v26 = vrot.slane %v2091_v30, 2  ;;  %v2276_v13 = vrot.slane %v2188_v37, 6 }
 0x3f5   :  { %2418 = vst [vmem:[#allocation1 + $0x11] ss:$2 sm:$0xff] %v2389_v52  ;;  %v2331_v17 = vpop.permute.xlu1 %2330  ;;  %v2363_v0 = vpop.permute.xlu0 %2362 }
 0x3f6   :  { %v2093_v5 = vmax.f32 %v2091_v30, %v2092_v26  ;;  %v2382_v46 = vsel %vm1128_vm10, %v4348_v55, %v2331_v17  ;;  %v2277_v45 = vsel %vm2225_vm2, %v2276_v13, %v2275_v8 }
 0x3f7   :  { %v2390_v10 = vsel %vm1228_vm14, %v2382_v46, %v2363_v0 }
 0x3f8   :  { %2420 = vst [vmem:[#allocation1 + $0x20] ss:$2 sm:$0xff] %v2390_v10  ;;  %v2094_v19 = vrot.slane %v2093_v5, 1 }
 0x3fa   :  { %v1845_v40 = vld [vmem:[#allocation1] sm:$0xff]  ;;  %v2095_v61 = vmax.f32 %v2093_v5, %v2094_v19 }
 0x3fb   :  { %2412 = vst [vmem:[#allocation1] ss:$2 sm:$0xff] %v2386_v63  ;;  %v2096_v55 = vsel %vm1878_vm1, %v1845_v40, -inf  ;;  %v2878_v19 = vld [vmem:[%s4593_s8] ss:$0 sm:$0xff] }
 0x3fc   :  { %2414 = vst [vmem:[#allocation1 + $0x1] ss:$2 sm:$0xff] %v2387_v14  ;;  %v2097_v35 = vrot.slane %v2096_v55, 4  ;;  %v2133_v54 = vmax.f32 %v2095_v61, 0.0 }
 0x3fd   :  { %v2428_v28 = vld.sshfl [vmem:[#allocation1 + $0x10] sm:$0xff pattern:$0x75316420] }
 0x3fe   :  { %v2098_v24 = vmax.f32 %v2096_v55, %v2097_v35  ;;  %v2189_v59 = vmul.f32 %v2150_v21, %v2133_v54  ;;  %v103_v35 = vmul.f32 %v2878_v19, %v4232_v58 }
 0x400   :  { %v2099_v25 = vrot.slane %v2098_v24, 2  ;;  %v2278_v60 = vrot.slane %v2189_v59, 5 }
 0x402   :  { %v2100_v15 = vmax.f32 %v2098_v24, %v2099_v25  ;;  %v2279_v20 = vsel %vm2228_vm3, %v2278_v60, %v2277_v45 }
 0x403   :  { %v2427_v51 = vld.sshfl [vmem:[#allocation1] sm:$0xff pattern:$0x75316420] }
 0x404   :  { %2846 = vmatmul.msk.f32.vlgmr.msra.gmra.mxu1 %vm2431_vm5, %v2427_v51  ;;  %v2101_v43 = vrot.slane %v2100_v15, 1  ;;  %v108_v51 = vadd.f32 %v2879_v50, %v103_v35 }
 0x406   :  { %v2102_v3 = vmax.f32 %v2100_v15, %v2101_v43  ;;  %v4477_v60 = vmax.f32 %v108_v51, 0.0 }
 0x408   :  { %v2134_v56 = vmax.f32 %v2102_v3, 0.0 }
 0x40a   :  { %v2190_v23 = vmul.f32 %v2150_v21, %v2134_v56 }
 0x40c   :  { %2847 = vmatmul.msk.f32.gmra.mxu1 %vm2431_vm5, %v2428_v28  ;;  %v2280_v16 = vrot.slane %v2190_v23, 4 }
 0x40d   :  { %v2333_v11 = vpop.permute.xlu2 %2332 }
 0x40e   :  { %v2281_v18 = vsel %vm2231_vm4, %v2280_v16, %v2279_v20  ;;  %v2383_v7 = vsel %vm1128_vm10, %v4366_v39, %v2333_v11 }
 0x40f   :  { %v2297_v57 = vsel %vm852_vm6, 0.0, %v2281_v18  ;;  %vm2683_vm6 = vcmask 1041409  }
 0x410   :  { %v2305_v48 = vsel %vm360_vm0, %v2297_v57, 0.0  ;;  %vm2497_vm0 = vcmask 254976  }
 0x411   :  { %v2321_v42 = vrot.slane %v2305_v48, 1  ;;  %v2353_v47 = vrot.slane %v2305_v48, 2 }
 0x413   :  { %2336 = vrot.lane.b32.xlu0 %v2321_v42, %s2914_s21  ;;  %2368 = vrot.lane.b32.xlu2 %v2353_v47, %s2917_s26 }
 0x425   :  { %v2365_v33 = vpop.permute.xlu1 %2364 }
 0x426   :  { %v2391_v31 = vsel %vm1228_vm14, %v2383_v7, %v2365_v33  ;;  %v2627_v7 = vrot.slane %v4477_v60, 1  ;;  %v2628_v33 = vrot.slane %v4477_v60, 2 }
 0x427   :  { %2422 = vst [vmem:[#allocation1 + $0x21] ss:$2 sm:$0xff] %v2391_v31 }
 0x42e   :  { %v2429_v41 = vld.sshfl [vmem:[#allocation1 + $0x20] sm:$0xff pattern:$0x75316420] }
 0x42f   :  { %2848 = vmatmul.msk.f32.gmra.mxu1 %vm2431_vm5, %v2429_v41  ;;  %v2634_v41 = vperm.slane %v4477_v60, 0 }
 0x43d   :  { %v2335_v12 = vpop.permute.xlu2 %2334 }
 0x43e   :  { %v2384_v49 = vsel %vm1128_vm10, %v4407_v34, %v2335_v12  ;;  %v4457_v34 = vld [vmem:[%s4592_s7] ss:$0 sm:$0xff] }
 0x455   :  { %v2367_v62 = vpop.permute.xlu1 %2366 }
 0x456   :  { %v2392_v52 = vsel %vm1228_vm14, %v2384_v49, %v2367_v62 }
 0x457   :  { %2424 = vst [vmem:[#allocation1 + $0x30] ss:$2 sm:$0xff] %v2392_v52 }
 0x46d   :  { %v2369_v2 = vpop.permute.xlu2 %2368 }
 0x481   :  { %v2457_v26 = vpop.f32.mrf.mxu1 }
 0x482   :  { %v2458_v29 = vadd.f32 %v4457_v34, %v2457_v26  ;;  %v2630_v26 = vrot.slane %v4477_v60, 4 }
 0x484   :  { %v2473_v46 = vrot.slane %v2458_v29, 2  ;;  %v2474_v22 = vrot.slane %v2458_v29, 4  ;;  %v2475_v44 = vrot.slane %v2458_v29, 6  ;;  %v2498_v24 = vsel %vm2497_vm0, %v2458_v29, -inf }
 0x485   :  { %v2337_v9 = vpop.permute.xlu0 %2336  ;;  %v2499_v43 = vrot.slane %v2498_v24, 4  ;;  %v4486_v29 = vperm.slane %v2628_v33, 0  ;;  %v4489_v50 = vperm.slane %v2630_v26, 0 }
 0x486   :  { %v2385_v30 = vsel %vm1128_vm10, %v2305_v48, %v2337_v9  ;;  %v2505_v4 = vsel %vm2497_vm0, %v2473_v46, -inf  ;;  %v2512_v14 = vsel %vm2497_vm0, %v2474_v22, -inf  ;;  %v2519_v55 = vsel %vm2497_vm0, %v2475_v44, -inf }
 0x487   :  { %v2393_v39 = vsel %vm1228_vm14, %v2385_v30, %v2369_v2  ;;  %v2506_v6 = vrot.slane %v2505_v4, 4  ;;  %v2513_v36 = vrot.slane %v2512_v14, 4  ;;  %v2520_v54 = vrot.slane %v2519_v55, 4 }
 0x488   :  { %2426 = vst [vmem:[#allocation1 + $0x31] ss:$2 sm:$0xff] %v2393_v39  ;;  %v2500_v23 = vmax.f32 %v2498_v24, %v2499_v43  ;;  %v2629_v9 = vrot.slane %v4477_v60, 3 }
 0x489   :  { %v2460_v17 = vpop.f32.mrf.mxu1  ;;  %v2507_v37 = vmax.f32 %v2505_v4, %v2506_v6  ;;  %v2514_v3 = vmax.f32 %v2512_v14, %v2513_v36  ;;  %v2521_v27 = vmax.f32 %v2519_v55, %v2520_v54  ;;  %v2631_v55 = vrot.slane %v4477_v60, 5 }
 0x48a   :  { %v2461_v0 = vadd.f32 %v4457_v34, %v2460_v17  ;;  %v2501_v11 = vrot.slane %v2500_v23, 2 }
 0x48b   :  { %v2508_v8 = vrot.slane %v2507_v37, 2  ;;  %v2515_v20 = vrot.slane %v2514_v3, 2  ;;  %v2522_v18 = vrot.slane %v2521_v27, 2 }
 0x48c   :  { %v2478_v5 = vrot.slane %v2461_v0, 6  ;;  %v2476_v63 = vrot.slane %v2461_v0, 2  ;;  %v2477_v32 = vrot.slane %v2461_v0, 4  ;;  %v2526_v58 = vsel %vm2497_vm0, %v2461_v0, -inf }
 0x48d   :  { %v2527_v45 = vrot.slane %v2526_v58, 4  ;;  %v2509_v31 = vmax.f32 %v2507_v37, %v2508_v8  ;;  %v2516_v62 = vmax.f32 %v2514_v3, %v2515_v20  ;;  %v2523_v52 = vmax.f32 %v2521_v27, %v2522_v18 }
 0x48e   :  { %v2547_v10 = vsel %vm2497_vm0, %v2478_v5, -inf  ;;  %v2533_v61 = vsel %vm2497_vm0, %v2476_v63, -inf  ;;  %v2540_v53 = vsel %vm2497_vm0, %v2477_v32, -inf  ;;  %v2502_v17 = vmax.f32 %v2500_v23, %v2501_v11 }
 0x48f   :  { %v2430_v1 = vld.sshfl [vmem:[#allocation1 + $0x30] sm:$0xff pattern:$0x75316420]  ;;  %v2548_v40 = vrot.slane %v2547_v10, 4  ;;  %v2534_v15 = vrot.slane %v2533_v61, 4  ;;  %v2541_v38 = vrot.slane %v2540_v53, 4  ;;  %v2528_v12 = vmax.f32 %v2526_v58, %v2527_v45 }
 0x490   :  { %2849 = vmatmul.msk.f32.gmra.mxu1 %vm2431_vm5, %v2430_v1  ;;  %v2635_v0 = vperm.slane %v2627_v7, 0  ;;  %v2510_v46 = vrot.slane %v2509_v31, 1  ;;  %v2517_v19 = vrot.slane %v2516_v62, 1  ;;  %v2524_v63 = vrot.slane %v2523_v52, 1 }
 0x491   :  { %v2549_v25 = vmax.f32 %v2547_v10, %v2548_v40  ;;  %v2535_v13 = vmax.f32 %v2533_v61, %v2534_v15  ;;  %v2542_v28 = vmax.f32 %v2540_v53, %v2541_v38  ;;  %v2529_v10 = vrot.slane %v2528_v12, 2 }
 0x492   :  { %v2637_v32 = vperm.slane %v2629_v9, 0  ;;  %v2503_v35 = vrot.slane %v2502_v17, 1  ;;  %v2511_v24 = vmax.f32 %v2509_v31, %v2510_v46  ;;  %v2518_v54 = vmax.f32 %v2516_v62, %v2517_v19 }
 0x493   :  { %v2550_v59 = vrot.slane %v2549_v25, 2  ;;  %v2536_v48 = vrot.slane %v2535_v13, 2  ;;  %v2543_v42 = vrot.slane %v2542_v28, 2  ;;  %v2530_v6 = vmax.f32 %v2528_v12, %v2529_v10 }
 0x494   :  { %v2525_v15 = vmax.f32 %v2523_v52, %v2524_v63  ;;  %v4494_v3 = vmax.f32 %v2502_v17, %v2503_v35  ;;  %v4496_v27 = vperm.slane %v2631_v55, 0  ;;  %v2633_v58 = vrot.slane %v4477_v60, 7 }
 0x495   :  { %v2551_v16 = vmax.f32 %v2549_v25, %v2550_v59  ;;  %v2537_v2 = vmax.f32 %v2535_v13, %v2536_v48  ;;  %v2544_v39 = vmax.f32 %v2542_v28, %v2543_v42  ;;  %v2611_v28 = vmax.f32 %v2511_v24, 0.0 }
 0x496   :  { %v2531_v23 = vrot.slane %v2530_v6, 1  ;;  %v2613_v20 = vmax.f32 %v2525_v15, 0.0  ;;  %v2610_v7 = vmax.f32 %v4494_v3, 0.0  ;;  %v4502_v33 = vperm.slane %v2633_v58, 0  ;;  %v2757_v58 = vld [vmem:[%s4595_s10 + $0x20] sm:$0xff] }
 0x497   :  { %v2552_v49 = vrot.slane %v2551_v16, 1  ;;  %v2538_v4 = vrot.slane %v2537_v2, 1  ;;  %v2545_v14 = vrot.slane %v2544_v39, 1  ;;  %v4508_v12 = vmul.f32 %v2634_v41, %v2611_v28 }
 0x499   :  { %v2553_v22 = vmax.f32 %v2551_v16, %v2552_v49  ;;  %v2539_v51 = vmax.f32 %v2537_v2, %v2538_v4  ;;  %v2546_v43 = vmax.f32 %v2544_v39, %v2545_v14  ;;  %v2612_v16 = vmax.f32 %v2518_v54, 0.0 }
 0x49a   :  { %v2532_v49 = vmax.f32 %v2530_v6, %v2531_v23  ;;  %v2653_v2 = vmul.f32 %v2635_v0, %v2613_v20 }
 0x49b   :  { %v2617_v25 = vmax.f32 %v2553_v22, 0.0  ;;  %v2615_v48 = vmax.f32 %v2539_v51, 0.0  ;;  %v2616_v42 = vmax.f32 %v2546_v43, 0.0 }
 0x49c   :  { %v2614_v63 = vmax.f32 %v2532_v49, 0.0  ;;  %v2685_v54 = vrot.slane %v2653_v2, 7  ;;  %v2682_v2 = vrot.slane %v4508_v12, 7 }
 0x49d   :  { %v2657_v8 = vmul.f32 %v2637_v32, %v2617_v25  ;;  %v2655_v26 = vmul.f32 %v4486_v29, %v2615_v48  ;;  %v2656_v17 = vmul.f32 %v2637_v32, %v2616_v42 }
 0x49f   :  { %v2689_v62 = vrot.slane %v2657_v8, 7  ;;  %v2687_v15 = vrot.slane %v2655_v26, 7 }
 0x4a1   :  { %v2690_v14 = vsel %vm2683_vm6, %v2689_v62, %v2656_v17 }
 0x4a2   :  { %v2714_v23 = vrot.slane %v2690_v14, 4  ;;  %v2753_v14 = vld [vmem:[%s4595_s10] sm:$0xff] }
 0x4ac   :  { %v2463_v21 = vpop.f32.mrf.mxu1 }
 0x4ad   :  { %v2464_v56 = vadd.f32 %v4457_v34, %v2463_v21  ;;  %v2632_v21 = vrot.slane %v4477_v60, 6 }
 0x4af   :  { %v2479_v57 = vrot.slane %v2464_v56, 2  ;;  %v2481_v47 = vrot.slane %v2464_v56, 6  ;;  %v2480_v5 = vrot.slane %v2464_v56, 4  ;;  %v2554_v61 = vsel %vm2497_vm0, %v2464_v56, -inf }
 0x4b0   :  { %v2555_v37 = vrot.slane %v2554_v61, 4  ;;  %v2920_v56 = vmov 1983009808  }
 0x4b1   :  { %v2561_v30 = vsel %vm2497_vm0, %v2479_v57, -inf  ;;  %v2575_v1 = vsel %vm2497_vm0, %v2481_v47, -inf  ;;  %v2568_v53 = vsel %vm2497_vm0, %v2480_v5, -inf  ;;  %v2711_v13 = vunpack.c.l.s4 %v2920_v56 }
 0x4b2   :  { %v2562_v44 = vrot.slane %v2561_v30, 4  ;;  %v2576_v40 = vrot.slane %v2575_v1, 4  ;;  %v2569_v59 = vrot.slane %v2568_v53, 4  ;;  %v4499_v57 = vperm.slane %v2632_v21, 0 }
 0x4b3   :  { %v2556_v47 = vmax.f32 %v2554_v61, %v2555_v37  ;;  %v4504_v31 = vunpack.c.0.s8 %v2711_v13  ;;  %v2654_v56 = vmul.f32 %v4486_v29, %v2614_v63 }
 0x4b4   :  { %v2563_v36 = vmax.f32 %v2561_v30, %v2562_v44  ;;  %v2577_v38 = vmax.f32 %v2575_v1, %v2576_v40  ;;  %v2570_v11 = vmax.f32 %v2568_v53, %v2569_v59  ;;  %v2652_v30 = vmul.f32 %v2635_v0, %v2612_v16  ;;  %v2759_v0 = vld [vmem:[%s4595_s10 + $0x30] sm:$0xff] }
 0x4b5   :  { %v2557_v5 = vrot.slane %v2556_v47, 2  ;;  %v2688_v48 = vsel %vm2683_vm6, %v2687_v15, %v2654_v56  ;;  %v2921_v15 = vmov 1934713408  }
 0x4b6   :  { %v2564_v45 = vrot.slane %v2563_v36, 2  ;;  %v2578_v18 = vrot.slane %v2577_v38, 2  ;;  %v2571_v46 = vrot.slane %v2570_v11, 2 }
 0x4b8   :  { %v2565_v52 = vmax.f32 %v2563_v36, %v2564_v45  ;;  %v2579_v39 = vmax.f32 %v2577_v38, %v2578_v18  ;;  %v2758_v36 = vld [vmem:[%s4595_s10 + $0x28] sm:$0xff]  ;;  %v2558_v38 = vmax.f32 %v2556_v47, %v2557_v5  ;;  %v2572_v21 = vmax.f32 %v2570_v11, %v2571_v46  ;;  %v2756_v18 = vld [vmem:[%s4595_s10 + $0x18] sm:$0xff] }
 0x4b9   :  { %v2686_v11 = vsel %vm2683_vm6, %v2685_v54, %v2652_v30 }
 0x4ba   :  { %v2566_v40 = vrot.slane %v2565_v52, 1  ;;  %v2580_v32 = vrot.slane %v2579_v39, 1  ;;  %v2559_v42 = vrot.slane %v2558_v38, 1  ;;  %v2573_v47 = vrot.slane %v2572_v21, 1 }
 0x4bb   :  { %v2715_v26 = vsel %vm2708_vm7, %v2714_v23, %v2686_v11 }
 0x4bc   :  { %v2567_v13 = vmax.f32 %v2565_v52, %v2566_v40  ;;  %v2581_v28 = vmax.f32 %v2579_v39, %v2580_v32  ;;  %v2560_v12 = vmax.f32 %v2558_v38, %v2559_v42  ;;  %v2719_v60 = vperm.slane %v2715_v26, %v4504_v31  ;;  %v2882_v26 = vld [vmem:[%s4597_s12] ss:$0 sm:$0xff] }
 0x4bd   :  { %v2735_v38 = vunpack.c.l.s4 %v2921_v15 }
 0x4be   :  { %v2619_v39 = vmax.f32 %v2567_v13, 0.0  ;;  %v2732_v54 = vrot.slane %v2719_v60, 4 }
 0x50d   :  { %v2466_v9 = vpop.f32.mrf.mxu1 }
 0x50e   :  { %v2467_v1 = vadd.f32 %v4457_v34, %v2466_v9  ;;  %v2760_v34 = vld [vmem:[%s4595_s10 + $0x38] sm:$0xff]  ;;  %v2755_v9 = vld [vmem:[%s4595_s10 + $0x10] sm:$0xff] }
 0x50f   :  { %2777 = vmatpush.msrb.mxu2 %v2760_v34  ;;  %v2659_v34 = vmul.f32 %v4489_v50, %v2619_v39 }
 0x510   :  { %v2482_v10 = vrot.slane %v2467_v1, 2  ;;  %v2483_v22 = vrot.slane %v2467_v1, 4  ;;  %v2484_v44 = vrot.slane %v2467_v1, 6  ;;  %v2582_v19 = vsel %vm2497_vm0, %v2467_v1, -inf }
 0x511   :  { %v2583_v4 = vrot.slane %v2582_v19, 4  ;;  %2778 = vmatpush.msrb.mxu2 %v2759_v0  ;;  %v2621_v1 = vmax.f32 %v2581_v28, 0.0 }
 0x512   :  { %v2589_v55 = vsel %vm2497_vm0, %v2482_v10, -inf  ;;  %v2596_v35 = vsel %vm2497_vm0, %v2483_v22, -inf  ;;  %v2603_v61 = vsel %vm2497_vm0, %v2484_v44, -inf  ;;  %v2754_v10 = vld [vmem:[%s4595_s10 + $0x8] sm:$0xff]  ;;  %v2650_v22 = vmul.f32 %v2634_v41, %v2610_v7 }
 0x513   :  { %v2584_v53 = vmax.f32 %v2582_v19, %v2583_v4  ;;  %v2590_v24 = vrot.slane %v2589_v55, 4  ;;  %v2597_v6 = vrot.slane %v2596_v35, 4  ;;  %v2604_v25 = vrot.slane %v2603_v61, 4  ;;  %2779 = vmatpush.msrb.mxu2 %v2758_v36 }
 0x514   :  { %v2707_v44 = vrot.slane %v2688_v48, 4  ;;  %v2574_v19 = vmax.f32 %v2572_v21, %v2573_v47  ;;  %v2661_v0 = vmul.f32 %v4496_v27, %v2621_v1  ;;  %v2684_v3 = vsel %vm2683_vm6, %v2682_v2, %v2650_v22 }
 0x515   :  { %v2585_v51 = vrot.slane %v2584_v53, 2  ;;  %v2591_v43 = vmax.f32 %v2589_v55, %v2590_v24  ;;  %v2598_v37 = vmax.f32 %v2596_v35, %v2597_v6  ;;  %v2605_v59 = vmax.f32 %v2603_v61, %v2604_v25  ;;  %2780 = vmatpush.msrb.mxu2 %v2757_v58 }
 0x516   :  { %v2709_v35 = vsel %vm2708_vm7, %v2707_v44, %v2684_v3  ;;  %v2618_v61 = vmax.f32 %v2560_v12, 0.0  ;;  %v2691_v25 = vrot.slane %v2659_v34, 7  ;;  %v2693_v36 = vrot.slane %v2661_v0, 7 }
 0x517   :  { %v2586_v8 = vmax.f32 %v2584_v53, %v2585_v51  ;;  %v2592_v45 = vrot.slane %v2591_v43, 2  ;;  %v2599_v16 = vrot.slane %v2598_v37, 2  ;;  %v2606_v20 = vrot.slane %v2605_v59, 2  ;;  %2781 = vmatpush.msrb.mxu2 %v2756_v18 }
 0x518   :  { %v2620_v53 = vmax.f32 %v2574_v19, 0.0  ;;  %v2658_v58 = vmul.f32 %v4489_v50, %v2618_v61 }
 0x519   :  { %v2587_v29 = vrot.slane %v2586_v8, 1  ;;  %v2593_v49 = vmax.f32 %v2591_v43, %v2592_v45  ;;  %v2600_v62 = vmax.f32 %v2598_v37, %v2599_v16  ;;  %v2607_v52 = vmax.f32 %v2605_v59, %v2606_v20  ;;  %2782 = vmatpush.msrb.mxu2 %v2755_v9 }
 0x51a   :  { %v2713_v59 = vperm.slane %v2709_v35, %v4504_v31  ;;  %v2660_v56 = vmul.f32 %v4496_v27, %v2620_v53  ;;  %v2736_v45 = vunpack.c.0.s8 %v2735_v38  ;;  %v2692_v16 = vsel %vm2683_vm6, %v2691_v25, %v2658_v58 }
 0x51b   :  { %v2588_v17 = vmax.f32 %v2586_v8, %v2587_v29  ;;  %v2594_v5 = vrot.slane %v2593_v49, 1  ;;  %v2601_v46 = vrot.slane %v2600_v62, 1  ;;  %v2608_v30 = vrot.slane %v2607_v52, 1  ;;  %2783 = vmatpush.msrb.mxu2 %v2754_v10 }
 0x51d   :  { %v2595_v63 = vmax.f32 %v2593_v49, %v2594_v5  ;;  %v2602_v40 = vmax.f32 %v2600_v62, %v2601_v46  ;;  %v2609_v4 = vmax.f32 %v2607_v52, %v2608_v30  ;;  %v2622_v41 = vmax.f32 %v2588_v17, 0.0  ;;  %2784 = vmatpush.msrb.mxu2 %v2753_v14  ;;  %v2883_v30 = vld [vmem:[#allocation2] ss:$0 sm:$0xff] }
 0x51f   :  { %v2623_v7 = vmax.f32 %v2595_v63, 0.0  ;;  %v2624_v32 = vmax.f32 %v2602_v40, 0.0  ;;  %v2625_v55 = vmax.f32 %v2609_v4, 0.0  ;;  %v2662_v21 = vmul.f32 %v4499_v57, %v2622_v41 }
 0x521   :  { %v2663_v24 = vmul.f32 %v4499_v57, %v2623_v7  ;;  %v2665_v6 = vmul.f32 %v4502_v33, %v2625_v55  ;;  %v2664_v51 = vmul.f32 %v4502_v33, %v2624_v32  ;;  %v2694_v57 = vsel %vm2683_vm6, %v2693_v36, %v2660_v56 }
 0x522   :  { %v2733_v33 = vsel %vm2708_vm7, %v2732_v54, %v2713_v59 }
 0x523   :  { %v2695_v43 = vrot.slane %v2663_v24, 7  ;;  %v2697_v37 = vrot.slane %v2665_v6, 7  ;;  %v2737_v27 = vperm.slane %v2733_v33, %v2736_v45 }
 0x525   :  { %v2696_v13 = vsel %vm2683_vm6, %v2695_v43, %v2662_v21  ;;  %v2698_v28 = vsel %vm2683_vm6, %v2697_v37, %v2664_v51  ;;  %v2746_v29 = vrot.slane %v2737_v27, 4 }
 0x526   :  { %v2720_v23 = vrot.slane %v2696_v13, 4  ;;  %v2726_v8 = vrot.slane %v2698_v28, 4 }
 0x528   :  { %v2721_v20 = vsel %vm2708_vm7, %v2720_v23, %v2692_v16  ;;  %v2727_v18 = vsel %vm2708_vm7, %v2726_v8, %v2694_v57 }
 0x529   :  { %v2731_v50 = vperm.slane %v2727_v18, %v4504_v31  ;;  %v2725_v48 = vperm.slane %v2721_v20, %v4504_v31  ;;  %v2881_v31 = vld [vmem:[%s4596_s11] ss:$0 sm:$0xff]  ;;  %s2816_s11 = sshll.u32 %s4599_s14, 4  ;;  %s2817_s11 = int_to_ptr.hbm [resolvable:$true] %s2816_s11 }
 0x52b   :  { %v2738_v42 = vrot.slane %v2731_v50, 4 }
 0x52d   :  { %v2739_v47 = vsel %vm2708_vm7, %v2738_v42, %v2725_v48 }
 0x52e   :  { %v2743_v11 = vperm.slane %v2739_v47, %v2736_v45 }
 0x530   :  { %v2747_v49 = vsel %vm2708_vm7, %v2743_v11, %v2746_v29  ;;  %v2744_v62 = vrot.slane %v2743_v11, 4 }
 0x531   :  { %2749 = vrot.lane.b32.xlu0 %v2747_v49, %s2917_s26  ;;  %s2922_s26 = smov [#allocation3]  }
 0x532   :  { %v2745_v9 = vsel %vm2708_vm7, %v2744_v62, %v2737_v27  ;;  %s2814_s0 = sshll.u32 %s2922_s26, 4  ;;  %s2815_s0 = int_to_ptr.vmem [resolvable:$true] %s2814_s0 }
 0x5a3   :  { %v2750_v52 = vpop.permute.xlu0 %2749 }
 0x5a4   :  { %v2752_v2 = vsel %vm1228_vm14, %v2745_v9, %v2750_v52 }
 0x5a5   :  { %2850 = vmatmul.msk.f32.vlgmr.msrb.gmra.mxu2 %vm2765_vm8, %v2752_v2 }
 0x628   :  { %v2786_v39 = vpop.f32.mrf.mxu2 }
 0x629   :  { %v2787_v1 = vadd.f32 %v2881_v31, %v2786_v39 }
 0x62b   :  { %v2789_v17 = vmax.f32 %v2787_v1, 0.0 }
 0x62d   :  { %v2794_v5 = vmul.f32 %v2882_v26, %v2789_v17 }
 0x62f   :  { %v2795_v46 = vsel %vm2765_vm8, %v2794_v5, 0.0 }
 0x630   :  { %2796 = vadd.xlane.f32.xlu1 %v2795_v46 }
 0x6a3   :  { %v2797_v10 = vpop.xlane.xlu1 %2796 }
 0x6a4   :  { %v2802_v22 = vadd.f32 %v2883_v30, %v2797_v10 }
 0x6a6   :  { %2805 = vperm.xlu2 %2874, %v2802_v22  }
 0x700   :  { %v2806_v44 = vpop.permute.xlu2 %2805 }
 0x701   :  { %2808 = vst [vmem:[#allocation3] sm:$0xff] %v2806_v44 }
 0x702   :  { %2819 = dma.vmem_to_hbm [thread:$0]  %s2815_s0, 128, %s2817_s11, [#allocation4]  }
 0x703   :  { %2909 = dma.done.wait [#allocation4], 128  }
 0x704   :  { %2910 = vsyncadd [#allocation4], 4294967168 }
 0x705   :  { %2824 = vsyncpa [#allocation4], 1 }

</bundles_post_ra>
